<compile_context>
chip_gen: v5e
topology: v5e:2x2
jax: 0.10.0
libtpu: 0.0.40
codegen_flags: <defaults>
</compile_context>

<pallas_src>
import math
from functools import partial

import jax
import jax.numpy as jnp
from jax.experimental import pallas as pl
from jax.experimental.pallas import tpu as pltpu

NUM_HEADS = 4
NUM_LAYERS = 3
LN_EPS = 1e-5


# ----------------------------- in-kernel helpers -----------------------------

def _layernorm(x, g, b):
    mu = jnp.mean(x, axis=-1, keepdims=True)
    var = jnp.mean(jnp.square(x - mu), axis=-1, keepdims=True)
    return (x - mu) * jax.lax.rsqrt(var + LN_EPS) * g + b


# ----------------------- per-(encoder, layer) grid kernel ---------------------
# grid = (NE, NUM_LAYERS); the layer axis is "arbitrary", activations are carried in a
# VMEM scratch accumulator across layer steps.

def fused_encoder_kernel(*refs, num_heads, self_attn, out_last_only):
    if self_attn:
        xq_ref, pos_ref = refs[0], refs[1]
        xkv_ref = None
        wrefs = refs[2:18]
        out_ref = refs[18]
        x_scr, kv_scr = refs[19], None
    else:
        xq_ref, xkv_ref, pos_ref = refs[0], refs[1], refs[2]
        wrefs = refs[3:19]
        out_ref = refs[19]
        x_scr, kv_scr = refs[20], refs[21]

    (ln0g, ln0b, wq, bq, wkv, bkv, wo, bo,
     ln1g, ln1b, w1, b1, w2, b2, lng, lnb) = wrefs

    _, B, Tq, E = xq_ref.shape
    Tk = Tq if self_attn else xkv_ref.shape[2]
    H = num_heads
    hd = E // H

    l = pl.program_id(1)
    n_layers = pl.num_programs(1)

    # ---- layer 0: fused embedding (sqrt(E)*x + positional table) into the carry ----
    @pl.when(l == 0)
    def _():
        scale = math.sqrt(E)
        pe = pos_ref[...][None, :, :]                              # (1, T, E)
        x_scr[...] = (scale * xq_ref[0] + pe).reshape(B * Tq, E)
        if not self_attn:
            kv_scr[...] = (scale * xkv_ref[0] + pe).reshape(B * Tk, E)

    # ---- one transformer layer (pre-LN) --------------------------------------------
    x = x_scr[...]                                                 # (B*Tq, E) f32
    g0, b0 = ln0g[0, 0], ln0b[0, 0]
    q_in = _layernorm(x, g0, b0)
    # x_k == x_v in the reference; same LN0 weights; in self-attention reuse LN(x).
    kv_in = q_in if self_attn else _layernorm(kv_scr[...], g0, b0)

    # bf16 weights / bf16 operands on the MXU, f32 accumulation; q-scale folded in wq.
    q = jnp.dot(q_in.astype(jnp.bfloat16), wq[0, 0],
                preferred_element_type=jnp.float32) + bq[0, 0]
    kv = jnp.dot(kv_in.astype(jnp.bfloat16), wkv[0, 0],
                 preferred_element_type=jnp.float32) + bkv[0, 0]

    q3 = q.reshape(B, Tq, E)
    k3 = kv[:, :E].reshape(B, Tk, E)
    v3 = kv[:, E:].reshape(B, Tk, E)

    # All heads in one batched einsum pair: leading batch dim = H*B.
    qh = jnp.concatenate([q3[:, :, h * hd:(h + 1) * hd] for h in range(H)], axis=0)
    kh = jnp.concatenate([k3[:, :, h * hd:(h + 1) * hd] for h in range(H)], axis=0)
    vh = jnp.concatenate([v3[:, :, h * hd:(h + 1) * hd] for h in range(H)], axis=0)

    s = jnp.einsum('bqd,bkd->bqk', qh, kh,
                   preferred_element_type=jnp.float32)             # (H*B, Tq, Tk)
    s = s - jnp.max(s, axis=-1, keepdims=True)
    p = jnp.exp(s)
    p = p * pl.reciprocal(jnp.sum(p, axis=-1, keepdims=True), approx=True)
    oh = jnp.einsum('bqk,bkd->bqd', p, vh,
                    preferred_element_type=jnp.float32)            # (H*B, Tq, hd)

    # Re-assemble head blocks along lanes, single (E, E) output projection.
    o = jnp.concatenate([oh[h * B:(h + 1) * B] for h in range(H)],
                        axis=-1).reshape(B * Tq, E)
    attn = jnp.dot(o.astype(jnp.bfloat16), wo[0, 0],
                   preferred_element_type=jnp.float32) + bo[0, 0]
    x = x + attn                                                   # residual 1

    y = _layernorm(x, ln1g[0, 0], ln1b[0, 0])
    y = jnp.maximum(
        jnp.dot(y.astype(jnp.bfloat16), w1[0, 0],
                preferred_element_type=jnp.float32) + b1[0, 0], 0.0)
    y = jnp.dot(y.astype(jnp.bfloat16), w2[0, 0],
                preferred_element_type=jnp.float32) + b2[0, 0]
    x = x + y                                                      # residual 2
    x_scr[...] = x

    # ---- last layer: final LayerNorm + (optionally last-time-step-only) store ------
    @pl.when(l == n_layers - 1)
    def _():
        if out_last_only:
            last = x.reshape(B, Tq, E)[:, Tq - 1:Tq, :]            # (B, 1, E)
            out_ref[0] = _layernorm(last, lng[0], lnb[0])
        else:
            out_ref[0] = _layernorm(x, lng[0], lnb[0]).reshape(B, Tq, E)


# --------------------------------- JAX glue ----------------------------------

_PARAM_ORDER = ('ln0g', 'ln0b', 'wq', 'bq', 'wkv', 'bkv', 'wo', 'bo',
                'ln1g', 'ln1b', 'w1', 'b1', 'w2', 'b2', 'lng', 'lnb')


def _nbytes(shape, dtype):
    n = 1
    for d in shape:
        n *= int(d)
    return n * jnp.dtype(dtype).itemsize


def fused_encoder_group(xq, xkv, pos, group_params, *, self_attn, out_last_only):
    """Run NE independent 3-layer encoders in one pallas_call.

    xq : (NE, B, T, E)  raw query streams (embedding happens in-kernel)
    xkv: (NE, B, T, E)  shared key/value stream (cross), or None (self-attention)
    pos: (T, E)         sinusoidal position table
    """
    NE, B, T, E = xq.shape
    Tout = 1 if out_last_only else T
    weights = [group_params[k] for k in _PARAM_ORDER]
    inputs = ([xq] if self_attn else [xq, xkv]) + [pos]

    # Activations / pos table / final-LN weights: resident per encoder (index does not
    # depend on the layer axis).  Per-layer weights: one layer resident, double-buffered
    # by Pallas => layer l+1 weights prefetch behind layer l compute.
    def act_spec(a):
        return pl.BlockSpec((1,) + tuple(a.shape[1:]), lambda n, l: (n, 0, 0, 0))

    pos_spec = pl.BlockSpec(tuple(pos.shape), lambda n, l: (0, 0))

    def w_spec(a):
        if a.ndim == 4:                                   # per-layer (NE, L, d1, d2)
            return pl.BlockSpec((1, 1) + tuple(a.shape[2:]), lambda n, l: (n, l, 0, 0))
        return pl.BlockSpec((1,) + tuple(a.shape[1:]), lambda n, l: (n, 0, 0))

    in_specs = ([act_spec(xq)] if self_attn else [act_spec(xq), act_spec(xkv)])
    in_specs += [pos_spec] + [w_spec(w) for w in weights]
    out_spec = pl.BlockSpec((1, B, Tout, E), lambda n, l: (n, 0, 0, 0))

    scratch = [pltpu.VMEM((B * T, E), jnp.float32)]        # activation carry
    if not self_attn:
        scratch.append(pltpu.VMEM((B * T, E), jnp.float32))  # embedded K/V stream

    # Scoped-VMEM budget: double-buffered per-layer weight blocks + resident blocks
    # + transient headroom, clamped so it is legal on v5e/v6e (128 MiB) and v7x (64 MiB).
    per_layer_w = sum(_nbytes(w.shape[2:], w.dtype) for w in weights if w.ndim == 4)
    resident = sum(_nbytes(w.shape[1:], w.dtype) for w in weights if w.ndim == 3)
    resident += sum(_nbytes(a.shape[1:], a.dtype) for a in inputs[:-1])
    resident += _nbytes(pos.shape, pos.dtype)
    resident += _nbytes((B, Tout, E), jnp.float32)
    resident += len(scratch) * B * T * E * 4
    transient = 8 * B * T * 4 * E * 4                      # fc1 act + attention temps
    est = 2 * (2 * per_layer_w + resident) + transient
    vmem_limit = int(min(max(est, 32 * 1024 * 1024), 64 * 1024 * 1024))

    return pl.pallas_call(
        partial(fused_encoder_kernel, num_heads=NUM_HEADS,
                self_attn=self_attn, out_last_only=out_last_only),
        out_shape=jax.ShapeDtypeStruct((NE, B, Tout, E), jnp.float32),
        grid=(NE, NUM_LAYERS),
        in_specs=in_specs,
        out_specs=out_spec,
        scratch_shapes=scratch,
        compiler_params=pltpu.CompilerParams(
            dimension_semantics=("parallel", "arbitrary"),
            vmem_limit_bytes=vmem_limit),
    )(*inputs, *weights)


def sinusoidal_pos_emb(seq_len, dim):
    # fairseq-style table, positions 1..seq_len (assumes no zero padding tokens)
    half = dim // 2
    scale = math.log(10000.0) / (half - 1)
    freqs = jnp.exp(jnp.arange(half, dtype=jnp.float32) * -scale)
    pos = jnp.arange(1, seq_len + 1, dtype=jnp.float32)[:, None]
    ang = pos * freqs[None, :]
    pe = jnp.concatenate([jnp.sin(ang), jnp.cos(ang)], axis=1)
    if dim % 2 == 1:
        pe = jnp.concatenate([pe, jnp.zeros((seq_len, 1), jnp.float32)], axis=1)
    return pe                                              # (seq_len, dim)


def acl_forward(params, x_ego, x_pose, x_bbox):
    """Inputs: (B, T, feat_dim) batch-first. Output: (B, 6*feat_dim)."""
    B, T, F = x_ego.shape
    pos1 = sinusoidal_pos_emb(T, F)
    pos2 = sinusoidal_pos_emb(T, 2 * F)

    # ---- 6 independent cross-attention encoders in ONE pallas_call -------------
    # order: [ego|pose, ego|bbox, pose|ego, pose|bbox, bbox|ego, bbox|pose]
    xq = jnp.stack([x_ego, x_ego, x_pose, x_pose, x_bbox, x_bbox], axis=0)
    xkv = jnp.stack([x_pose, x_bbox, x_ego, x_bbox, x_ego, x_pose], axis=0)
    h = fused_encoder_group(xq, xkv, pos1, params['cross'],
                            self_attn=False, out_last_only=False)

    # fuse pairs along the feature dim -> [h_ego_raw, h_pose_raw, h_bbox_raw]
    raw = jnp.concatenate([h[0::2], h[1::2]], axis=-1)     # (3, B, T, 2*feat)

    # ---- 3 independent self-attention encoders (only the last time step is needed)
    hb = fused_encoder_group(raw, None, pos2, params['self'],
                             self_attn=True, out_last_only=True)   # (3, B, 1, 2*feat)

    last = hb[:, :, 0, :]                                  # (3, B, 2*feat)
    return jnp.transpose(last, (1, 0, 2)).reshape(B, -1)   # (B, 6*feat)


# ------------------------------ parameter init -------------------------------

def init_group_params(key, num_enc, embed_dim):
    """Synthetic weights for `num_enc` stacked encoders of width `embed_dim`."""
    E, L = embed_dim, NUM_LAYERS
    hd = E // NUM_HEADS
    qscale = hd ** -0.5
    ks = jax.random.split(key, 5)

    def lin(k, fin, fout):
        return jax.random.normal(k, (num_enc, L, fin, fout), jnp.float32) / math.sqrt(fin)

    bf = lambda w: w.astype(jnp.bfloat16)   # matmul weights streamed as bf16
    z = lambda *s: jnp.zeros(s, jnp.float32)
    o = lambda *s: jnp.ones(s, jnp.float32)
    return {
        'ln0g': o(num_enc, L, 1, E), 'ln0b': z(num_enc, L, 1, E),
        # q-scale (hd**-0.5) folded into wq at init time.  NOTE: if real (non-zero)
        # checkpoint q biases are loaded, they must also be multiplied by qscale.
        'wq': bf(lin(ks[0], E, E) * qscale), 'bq': z(num_enc, L, 1, E),
        # K and V projections packed into one (E, 2E) weight
        'wkv': bf(lin(ks[1], E, 2 * E)), 'bkv': z(num_enc, L, 1, 2 * E),
        'wo': bf(lin(ks[2], E, E)), 'bo': z(num_enc, L, 1, E),
        'ln1g': o(num_enc, L, 1, E), 'ln1b': z(num_enc, L, 1, E),
        'w1': bf(lin(ks[3], E, 4 * E)), 'b1': z(num_enc, L, 1, 4 * E),
        'w2': bf(lin(ks[4], 4 * E, E)), 'b2': z(num_enc, L, 1, E),
        'lng': o(num_enc, 1, E), 'lnb': z(num_enc, 1, E),
    }


def init_acl_params(key, feat_dim):
    k_cross, k_self = jax.random.split(key, 2)
    return {'cross': init_group_params(k_cross, 6, feat_dim),
            'self': init_group_params(k_self, 3, 2 * feat_dim)}


# ----------------------------------- main ------------------------------------

if __name__ == "__main__":
    FEAT = 32      # small stand-in for the default feat_dim=272
    B, T = 2, 8

    key = jax.random.PRNGKey(0)
    k_e, k_p, k_b, k_params = jax.random.split(key, 4)
    x_ego = jax.random.normal(k_e, (B, T, FEAT), jnp.float32)
    x_pose = jax.random.normal(k_p, (B, T, FEAT), jnp.float32)
    x_bbox = jax.random.normal(k_b, (B, T, FEAT), jnp.float32)

    params = init_acl_params(k_params, FEAT)

    fwd = jax.jit(acl_forward)
    out = fwd(params, x_ego, x_pose, x_bbox)
    jax.block_until_ready(out)

    assert out.shape == (B, 6 * FEAT), out.shape
    assert bool(jnp.all(jnp.isfinite(out)))
    print("KERNEL_OK")
</pallas_src>

<mosaic_0001>
module attributes {stable_mosaic.version = 11 : i64} {
  func.func @fused_encoder_kernel(%arg0: i32, %arg1: i32, %arg2: memref<1x2x8x32xf32, #tpu.memory_space<vmem>>, %arg3: memref<1x2x8x32xf32, #tpu.memory_space<vmem>>, %arg4: memref<8x32xf32, #tpu.memory_space<vmem>>, %arg5: memref<1x1x1x32xf32, #tpu.memory_space<vmem>>, %arg6: memref<1x1x1x32xf32, #tpu.memory_space<vmem>>, %arg7: memref<1x1x32x32xbf16, #tpu.memory_space<vmem>>, %arg8: memref<1x1x1x32xf32, #tpu.memory_space<vmem>>, %arg9: memref<1x1x32x64xbf16, #tpu.memory_space<vmem>>, %arg10: memref<1x1x1x64xf32, #tpu.memory_space<vmem>>, %arg11: memref<1x1x32x32xbf16, #tpu.memory_space<vmem>>, %arg12: memref<1x1x1x32xf32, #tpu.memory_space<vmem>>, %arg13: memref<1x1x1x32xf32, #tpu.memory_space<vmem>>, %arg14: memref<1x1x1x32xf32, #tpu.memory_space<vmem>>, %arg15: memref<1x1x32x128xbf16, #tpu.memory_space<vmem>>, %arg16: memref<1x1x1x128xf32, #tpu.memory_space<vmem>>, %arg17: memref<1x1x128x32xbf16, #tpu.memory_space<vmem>>, %arg18: memref<1x1x1x32xf32, #tpu.memory_space<vmem>>, %arg19: memref<1x1x32xf32, #tpu.memory_space<vmem>>, %arg20: memref<1x1x32xf32, #tpu.memory_space<vmem>>, %arg21: memref<1x2x8x32xf32, #tpu.memory_space<vmem>>, %arg22: memref<16x32xf32, #tpu.memory_space<vmem>>, %arg23: memref<16x32xf32, #tpu.memory_space<vmem>>) attributes {dimension_semantics = [#tpu.dimension_semantics<parallel>, #tpu.dimension_semantics<arbitrary>], iteration_bounds = array<i64: 6, 3>, scalar_prefetch = 0 : i64, scratch_operands = 2 : i64, tpu.core_type = #tpu.core_type<tc>, window_params = [{transform_indices = @transform_0, window_bounds = array<i64: 1, 2, 8, 32>}, {transform_indices = @transform_1, window_bounds = array<i64: 1, 2, 8, 32>}, {pipeline_mode = #tpu.pipeline_mode<synchronous>, transform_indices = @transform_2, window_bounds = array<i64: 8, 32>}, {transform_indices = @transform_3, window_bounds = array<i64: 1, 1, 1, 32>}, {transform_indices = @transform_4, window_bounds = array<i64: 1, 1, 1, 32>}, {transform_indices = @transform_5, window_bounds = array<i64: 1, 1, 32, 32>}, {transform_indices = @transform_6, window_bounds = array<i64: 1, 1, 1, 32>}, {transform_indices = @transform_7, window_bounds = array<i64: 1, 1, 32, 64>}, {transform_indices = @transform_8, window_bounds = array<i64: 1, 1, 1, 64>}, {transform_indices = @transform_9, window_bounds = array<i64: 1, 1, 32, 32>}, {transform_indices = @transform_10, window_bounds = array<i64: 1, 1, 1, 32>}, {transform_indices = @transform_11, window_bounds = array<i64: 1, 1, 1, 32>}, {transform_indices = @transform_12, window_bounds = array<i64: 1, 1, 1, 32>}, {transform_indices = @transform_13, window_bounds = array<i64: 1, 1, 32, 128>}, {transform_indices = @transform_14, window_bounds = array<i64: 1, 1, 1, 128>}, {transform_indices = @transform_15, window_bounds = array<i64: 1, 1, 128, 32>}, {transform_indices = @transform_16, window_bounds = array<i64: 1, 1, 1, 32>}, {transform_indices = @transform_17, window_bounds = array<i64: 1, 1, 32>}, {transform_indices = @transform_18, window_bounds = array<i64: 1, 1, 32>}, {transform_indices = @transform_19, window_bounds = array<i64: 1, 2, 8, 32>}]} {
    %c0_i32 = arith.constant 0 : i32
    %0 = arith.cmpi eq, %arg1, %c0_i32 : i32
    %1 = arith.extui %0 : i1 to i32
    %c0_i32_0 = arith.constant 0 : i32
    %2 = arith.cmpi ne, %1, %c0_i32_0 : i32
    scf.if %2 {
      %c0_87 = arith.constant 0 : index
      %c0_88 = arith.constant 0 : index
      %165 = vector.load %arg4[%c0_87, %c0_88] : memref<8x32xf32, #tpu.memory_space<vmem>>, vector<8x32xf32>
      %166 = vector.shape_cast %165 : vector<8x32xf32> to vector<1x8x32xf32>
      %c0_89 = arith.constant 0 : index
      %c0_90 = arith.constant 0 : index
      %c0_91 = arith.constant 0 : index
      %c0_92 = arith.constant 0 : index
      %167 = vector.load %arg2[%c0_89, %c0_90, %c0_91, %c0_92] : memref<1x2x8x32xf32, #tpu.memory_space<vmem>>, vector<1x2x8x32xf32>
      %168 = vector.shape_cast %167 : vector<1x2x8x32xf32> to vector<2x8x32xf32>
      %cst_93 = arith.constant 5.65685415 : f32
      %169 = vector.broadcast %cst_93 : f32 to vector<2x8x32xf32>
      %170 = arith.mulf %169, %168 : vector<2x8x32xf32>
      %171 = vector.broadcast %166 : vector<1x8x32xf32> to vector<2x8x32xf32>
      %172 = arith.addf %170, %171 : vector<2x8x32xf32>
      %173 = vector.shape_cast %172 : vector<2x8x32xf32> to vector<16x32xf32>
      %c0_94 = arith.constant 0 : index
      %c0_95 = arith.constant 0 : index
      %174 = vector.load %arg22[%c0_94, %c0_95] : memref<16x32xf32, #tpu.memory_space<vmem>>, vector<16x32xf32>
      tpu.vector_store %arg22[%c0_94, %c0_95], %173 {strides = array<i32>} : memref<16x32xf32, #tpu.memory_space<vmem>>, vector<16x32xf32>,
      %c0_96 = arith.constant 0 : index
      %c0_97 = arith.constant 0 : index
      %c0_98 = arith.constant 0 : index
      %c0_99 = arith.constant 0 : index
      %175 = vector.load %arg3[%c0_96, %c0_97, %c0_98, %c0_99] : memref<1x2x8x32xf32, #tpu.memory_space<vmem>>, vector<1x2x8x32xf32>
      %176 = vector.shape_cast %175 : vector<1x2x8x32xf32> to vector<2x8x32xf32>
      %cst_100 = arith.constant 5.65685415 : f32
      %177 = vector.broadcast %cst_100 : f32 to vector<2x8x32xf32>
      %178 = arith.mulf %177, %176 : vector<2x8x32xf32>
      %179 = vector.broadcast %166 : vector<1x8x32xf32> to vector<2x8x32xf32>
      %180 = arith.addf %178, %179 : vector<2x8x32xf32>
      %181 = vector.shape_cast %180 : vector<2x8x32xf32> to vector<16x32xf32>
      %c0_101 = arith.constant 0 : index
      %c0_102 = arith.constant 0 : index
      %182 = vector.load %arg23[%c0_101, %c0_102] : memref<16x32xf32, #tpu.memory_space<vmem>>, vector<16x32xf32>
      tpu.vector_store %arg23[%c0_101, %c0_102], %181 {strides = array<i32>} : memref<16x32xf32, #tpu.memory_space<vmem>>, vector<16x32xf32>,
    } else {
    }
    %c0 = arith.constant 0 : index
    %c0_1 = arith.constant 0 : index
    %3 = vector.load %arg22[%c0, %c0_1] : memref<16x32xf32, #tpu.memory_space<vmem>>, vector<16x32xf32>
    %c0_2 = arith.constant 0 : index
    %c0_3 = arith.constant 0 : index
    %c0_4 = arith.constant 0 : index
    %c0_5 = arith.constant 0 : index
    %4 = vector.load %arg5[%c0_2, %c0_3, %c0_4, %c0_5] : memref<1x1x1x32xf32, #tpu.memory_space<vmem>>, vector<1x1x1x32xf32>
    %5 = vector.shape_cast %4 : vector<1x1x1x32xf32> to vector<1x32xf32>
    %c0_6 = arith.constant 0 : index
    %c0_7 = arith.constant 0 : index
    %c0_8 = arith.constant 0 : index
    %c0_9 = arith.constant 0 : index
    %6 = vector.load %arg6[%c0_6, %c0_7, %c0_8, %c0_9] : memref<1x1x1x32xf32, #tpu.memory_space<vmem>>, vector<1x1x1x32xf32>
    %7 = vector.shape_cast %6 : vector<1x1x1x32xf32> to vector<1x32xf32>
    %cst = arith.constant dense<0.000000e+00> : vector<16xf32>
    %8 = vector.multi_reduction <add>, %3, %cst [1] : vector<16x32xf32> to vector<16xf32>
    %9 = vector.shape_cast %8 : vector<16xf32> to vector<16x1xf32>
    %cst_10 = arith.constant 3.200000e+01 : f32
    %10 = vector.broadcast %cst_10 : f32 to vector<16x1xf32>
    %11 = arith.divf %9, %10 : vector<16x1xf32>
    %12 = vector.broadcast %11 : vector<16x1xf32> to vector<16x32xf32>
    %13 = arith.subf %3, %12 : vector<16x32xf32>
    %14 = arith.mulf %13, %13 : vector<16x32xf32>
    %cst_11 = arith.constant dense<0.000000e+00> : vector<16xf32>
    %15 = vector.multi_reduction <add>, %14, %cst_11 [1] : vector<16x32xf32> to vector<16xf32>
    %16 = vector.shape_cast %15 : vector<16xf32> to vector<16x1xf32>
    %cst_12 = arith.constant 3.200000e+01 : f32
    %17 = vector.broadcast %cst_12 : f32 to vector<16x1xf32>
    %18 = arith.divf %16, %17 : vector<16x1xf32>
    %19 = vector.broadcast %11 : vector<16x1xf32> to vector<16x32xf32>
    %20 = arith.subf %3, %19 : vector<16x32xf32>
    %cst_13 = arith.constant 9.99999974E-6 : f32
    %21 = vector.broadcast %cst_13 : f32 to vector<16x1xf32>
    %22 = arith.addf %18, %21 : vector<16x1xf32>
    %23 = math.rsqrt %22 : vector<16x1xf32>
    %24 = vector.broadcast %23 : vector<16x1xf32> to vector<16x32xf32>
    %25 = arith.mulf %20, %24 : vector<16x32xf32>
    %26 = vector.broadcast %5 : vector<1x32xf32> to vector<16x32xf32>
    %27 = arith.mulf %25, %26 : vector<16x32xf32>
    %28 = vector.broadcast %7 : vector<1x32xf32> to vector<16x32xf32>
    %29 = arith.addf %27, %28 : vector<16x32xf32>
    %c0_14 = arith.constant 0 : index
    %c0_15 = arith.constant 0 : index
    %30 = vector.load %arg23[%c0_14, %c0_15] : memref<16x32xf32, #tpu.memory_space<vmem>>, vector<16x32xf32>
    %cst_16 = arith.constant dense<0.000000e+00> : vector<16xf32>
    %31 = vector.multi_reduction <add>, %30, %cst_16 [1] : vector<16x32xf32> to vector<16xf32>
    %32 = vector.shape_cast %31 : vector<16xf32> to vector<16x1xf32>
    %cst_17 = arith.constant 3.200000e+01 : f32
    %33 = vector.broadcast %cst_17 : f32 to vector<16x1xf32>
    %34 = arith.divf %32, %33 : vector<16x1xf32>
    %35 = vector.broadcast %34 : vector<16x1xf32> to vector<16x32xf32>
    %36 = arith.subf %30, %35 : vector<16x32xf32>
    %37 = arith.mulf %36, %36 : vector<16x32xf32>
    %cst_18 = arith.constant dense<0.000000e+00> : vector<16xf32>
    %38 = vector.multi_reduction <add>, %37, %cst_18 [1] : vector<16x32xf32> to vector<16xf32>
    %39 = vector.shape_cast %38 : vector<16xf32> to vector<16x1xf32>
    %cst_19 = arith.constant 3.200000e+01 : f32
    %40 = vector.broadcast %cst_19 : f32 to vector<16x1xf32>
    %41 = arith.divf %39, %40 : vector<16x1xf32>
    %42 = vector.broadcast %34 : vector<16x1xf32> to vector<16x32xf32>
    %43 = arith.subf %30, %42 : vector<16x32xf32>
    %cst_20 = arith.constant 9.99999974E-6 : f32
    %44 = vector.broadcast %cst_20 : f32 to vector<16x1xf32>
    %45 = arith.addf %41, %44 : vector<16x1xf32>
    %46 = math.rsqrt %45 : vector<16x1xf32>
    %47 = vector.broadcast %46 : vector<16x1xf32> to vector<16x32xf32>
    %48 = arith.mulf %43, %47 : vector<16x32xf32>
    %49 = vector.broadcast %5 : vector<1x32xf32> to vector<16x32xf32>
    %50 = arith.mulf %48, %49 : vector<16x32xf32>
    %51 = vector.broadcast %7 : vector<1x32xf32> to vector<16x32xf32>
    %52 = arith.addf %50, %51 : vector<16x32xf32>
    %53 = arith.truncf %29 : vector<16x32xf32> to vector<16x32xbf16>
    %c0_21 = arith.constant 0 : index
    %c0_22 = arith.constant 0 : index
    %c0_23 = arith.constant 0 : index
    %c0_24 = arith.constant 0 : index
    %54 = vector.load %arg7[%c0_21, %c0_22, %c0_23, %c0_24] : memref<1x1x32x32xbf16, #tpu.memory_space<vmem>>, vector<1x1x32x32xbf16>
    %55 = vector.shape_cast %54 : vector<1x1x32x32xbf16> to vector<32x32xbf16>
    %cst_25 = arith.constant dense<0.000000e+00> : vector<16x32xf32>
    %56 = tpu.matmul %53, %55, %cst_25 {dimension_numbers = #tpu.dot_dimension_numbers<[1], [0], [0], [1], [0, 0, 1, 1], [], []>} : vector<16x32xbf16>, vector<32x32xbf16>, vector<16x32xf32> -> vector<16x32xf32>
    %c0_26 = arith.constant 0 : index
    %c0_27 = arith.constant 0 : index
    %c0_28 = arith.constant 0 : index
    %c0_29 = arith.constant 0 : index
    %57 = vector.load %arg8[%c0_26, %c0_27, %c0_28, %c0_29] : memref<1x1x1x32xf32, #tpu.memory_space<vmem>>, vector<1x1x1x32xf32>
    %58 = vector.shape_cast %57 : vector<1x1x1x32xf32> to vector<1x32xf32>
    %59 = vector.broadcast %58 : vector<1x32xf32> to vector<16x32xf32>
    %60 = arith.addf %56, %59 : vector<16x32xf32>
    %61 = arith.truncf %52 : vector<16x32xf32> to vector<16x32xbf16>
    %c0_30 = arith.constant 0 : index
    %c0_31 = arith.constant 0 : index
    %c0_32 = arith.constant 0 : index
    %c0_33 = arith.constant 0 : index
    %62 = vector.load %arg9[%c0_30, %c0_31, %c0_32, %c0_33] : memref<1x1x32x64xbf16, #tpu.memory_space<vmem>>, vector<1x1x32x64xbf16>
    %63 = vector.shape_cast %62 : vector<1x1x32x64xbf16> to vector<32x64xbf16>
    %cst_34 = arith.constant dense<0.000000e+00> : vector<16x64xf32>
    %64 = tpu.matmul %61, %63, %cst_34 {dimension_numbers = #tpu.dot_dimension_numbers<[1], [0], [0], [1], [0, 0, 1, 1], [], []>} : vector<16x32xbf16>, vector<32x64xbf16>, vector<16x64xf32> -> vector<16x64xf32>
    %c0_35 = arith.constant 0 : index
    %c0_36 = arith.constant 0 : index
    %c0_37 = arith.constant 0 : index
    %c0_38 = arith.constant 0 : index
    %65 = vector.load %arg10[%c0_35, %c0_36, %c0_37, %c0_38] : memref<1x1x1x64xf32, #tpu.memory_space<vmem>>, vector<1x1x1x64xf32>
    %66 = vector.shape_cast %65 : vector<1x1x1x64xf32> to vector<1x64xf32>
    %67 = vector.broadcast %66 : vector<1x64xf32> to vector<16x64xf32>
    %68 = arith.addf %64, %67 : vector<16x64xf32>
    %69 = vector.shape_cast %60 : vector<16x32xf32> to vector<2x8x32xf32>
    %70 = vector.extract_strided_slice %68 {offsets = [0, 0], sizes = [16, 32], strides = [1, 1]} : vector<16x64xf32> to vector<16x32xf32>
    %71 = vector.shape_cast %70 : vector<16x32xf32> to vector<2x8x32xf32>
    %72 = vector.extract_strided_slice %68 {offsets = [0, 32], sizes = [16, 32], strides = [1, 1]} : vector<16x64xf32> to vector<16x32xf32>
    %73 = vector.shape_cast %72 : vector<16x32xf32> to vector<2x8x32xf32>
    %74 = vector.extract_strided_slice %69 {offsets = [0, 0, 0], sizes = [2, 8, 8], strides = [1, 1, 1]} : vector<2x8x32xf32> to vector<2x8x8xf32>
    %75 = vector.extract_strided_slice %69 {offsets = [0, 0, 8], sizes = [2, 8, 8], strides = [1, 1, 1]} : vector<2x8x32xf32> to vector<2x8x8xf32>
    %76 = vector.extract_strided_slice %69 {offsets = [0, 0, 16], sizes = [2, 8, 8], strides = [1, 1, 1]} : vector<2x8x32xf32> to vector<2x8x8xf32>
    %77 = vector.extract_strided_slice %69 {offsets = [0, 0, 24], sizes = [2, 8, 8], strides = [1, 1, 1]} : vector<2x8x32xf32> to vector<2x8x8xf32>
    %78 = tpu.concatenate %74, %75, %76, %77 in 0 : vector<2x8x8xf32>, vector<2x8x8xf32>, vector<2x8x8xf32>, vector<2x8x8xf32> -> vector<8x8x8xf32>
    %79 = vector.extract_strided_slice %71 {offsets = [0, 0, 0], sizes = [2, 8, 8], strides = [1, 1, 1]} : vector<2x8x32xf32> to vector<2x8x8xf32>
    %80 = vector.extract_strided_slice %71 {offsets = [0, 0, 8], sizes = [2, 8, 8], strides = [1, 1, 1]} : vector<2x8x32xf32> to vector<2x8x8xf32>
    %81 = vector.extract_strided_slice %71 {offsets = [0, 0, 16], sizes = [2, 8, 8], strides = [1, 1, 1]} : vector<2x8x32xf32> to vector<2x8x8xf32>
    %82 = vector.extract_strided_slice %71 {offsets = [0, 0, 24], sizes = [2, 8, 8], strides = [1, 1, 1]} : vector<2x8x32xf32> to vector<2x8x8xf32>
    %83 = tpu.concatenate %79, %80, %81, %82 in 0 : vector<2x8x8xf32>, vector<2x8x8xf32>, vector<2x8x8xf32>, vector<2x8x8xf32> -> vector<8x8x8xf32>
    %84 = vector.extract_strided_slice %73 {offsets = [0, 0, 0], sizes = [2, 8, 8], strides = [1, 1, 1]} : vector<2x8x32xf32> to vector<2x8x8xf32>
    %85 = vector.extract_strided_slice %73 {offsets = [0, 0, 8], sizes = [2, 8, 8], strides = [1, 1, 1]} : vector<2x8x32xf32> to vector<2x8x8xf32>
    %86 = vector.extract_strided_slice %73 {offsets = [0, 0, 16], sizes = [2, 8, 8], strides = [1, 1, 1]} : vector<2x8x32xf32> to vector<2x8x8xf32>
    %87 = vector.extract_strided_slice %73 {offsets = [0, 0, 24], sizes = [2, 8, 8], strides = [1, 1, 1]} : vector<2x8x32xf32> to vector<2x8x8xf32>
    %88 = tpu.concatenate %84, %85, %86, %87 in 0 : vector<2x8x8xf32>, vector<2x8x8xf32>, vector<2x8x8xf32>, vector<2x8x8xf32> -> vector<8x8x8xf32>
    "tpu.trace_start"() <{level = 10 : i32, message = "bqd,bkd->bqk"}> : () -> ()
    %cst_39 = arith.constant dense<0.000000e+00> : vector<8x8x8xf32>
    %89 = tpu.matmul %78, %83, %cst_39 {dimension_numbers = #tpu.dot_dimension_numbers<[2], [2], [1], [1], [0, 0, 0, 1, 1, 1], [0], [0]>} : vector<8x8x8xf32>, vector<8x8x8xf32>, vector<8x8x8xf32> -> vector<8x8x8xf32>
    "tpu.trace_stop"() : () -> ()
    %cst_40 = arith.constant dense<0xFF800000> : vector<8x8xf32>
    %90 = vector.multi_reduction <maximumf>, %89, %cst_40 [2] : vector<8x8x8xf32> to vector<8x8xf32>
    %91 = vector.shape_cast %90 : vector<8x8xf32> to vector<8x8x1xf32>
    %92 = vector.broadcast %91 : vector<8x8x1xf32> to vector<8x8x8xf32>
    %93 = arith.subf %89, %92 : vector<8x8x8xf32>
    %94 = math.exp %93 : vector<8x8x8xf32>
    %cst_41 = arith.constant dense<0.000000e+00> : vector<8x8xf32>
    %95 = vector.multi_reduction <add>, %94, %cst_41 [2] : vector<8x8x8xf32> to vector<8x8xf32>
    %96 = vector.shape_cast %95 : vector<8x8xf32> to vector<8x8x1xf32>
    %97 = tpu.reciprocal %96 {approx = true} : vector<8x8x1xf32> -> vector<8x8x1xf32>
    %98 = vector.broadcast %97 : vector<8x8x1xf32> to vector<8x8x8xf32>
    %99 = arith.mulf %94, %98 : vector<8x8x8xf32>
    "tpu.trace_start"() <{level = 10 : i32, message = "bqk,bkd->bqd"}> : () -> ()
    %cst_42 = arith.constant dense<0.000000e+00> : vector<8x8x8xf32>
    %100 = tpu.matmul %99, %88, %cst_42 {dimension_numbers = #tpu.dot_dimension_numbers<[2], [1], [1], [2], [0, 0, 0, 1, 1, 2], [0], [0]>} : vector<8x8x8xf32>, vector<8x8x8xf32>, vector<8x8x8xf32> -> vector<8x8x8xf32>
    "tpu.trace_stop"() : () -> ()
    %101 = vector.extract_strided_slice %100 {offsets = [0, 0, 0], sizes = [2, 8, 8], strides = [1, 1, 1]} : vector<8x8x8xf32> to vector<2x8x8xf32>
    %102 = vector.extract_strided_slice %100 {offsets = [2, 0, 0], sizes = [2, 8, 8], strides = [1, 1, 1]} : vector<8x8x8xf32> to vector<2x8x8xf32>
    %103 = vector.extract_strided_slice %100 {offsets = [4, 0, 0], sizes = [2, 8, 8], strides = [1, 1, 1]} : vector<8x8x8xf32> to vector<2x8x8xf32>
    %104 = vector.extract_strided_slice %100 {offsets = [6, 0, 0], sizes = [2, 8, 8], strides = [1, 1, 1]} : vector<8x8x8xf32> to vector<2x8x8xf32>
    %105 = tpu.concatenate %101, %102, %103, %104 in 2 : vector<2x8x8xf32>, vector<2x8x8xf32>, vector<2x8x8xf32>, vector<2x8x8xf32> -> vector<2x8x32xf32>
    %106 = vector.shape_cast %105 : vector<2x8x32xf32> to vector<16x32xf32>
    %107 = arith.truncf %106 : vector<16x32xf32> to vector<16x32xbf16>
    %c0_43 = arith.constant 0 : index
    %c0_44 = arith.constant 0 : index
    %c0_45 = arith.constant 0 : index
    %c0_46 = arith.constant 0 : index
    %108 = vector.load %arg11[%c0_43, %c0_44, %c0_45, %c0_46] : memref<1x1x32x32xbf16, #tpu.memory_space<vmem>>, vector<1x1x32x32xbf16>
    %109 = vector.shape_cast %108 : vector<1x1x32x32xbf16> to vector<32x32xbf16>
    %cst_47 = arith.constant dense<0.000000e+00> : vector<16x32xf32>
    %110 = tpu.matmul %107, %109, %cst_47 {dimension_numbers = #tpu.dot_dimension_numbers<[1], [0], [0], [1], [0, 0, 1, 1], [], []>} : vector<16x32xbf16>, vector<32x32xbf16>, vector<16x32xf32> -> vector<16x32xf32>
    %c0_48 = arith.constant 0 : index
    %c0_49 = arith.constant 0 : index
    %c0_50 = arith.constant 0 : index
    %c0_51 = arith.constant 0 : index
    %111 = vector.load %arg12[%c0_48, %c0_49, %c0_50, %c0_51] : memref<1x1x1x32xf32, #tpu.memory_space<vmem>>, vector<1x1x1x32xf32>
    %112 = vector.shape_cast %111 : vector<1x1x1x32xf32> to vector<1x32xf32>
    %113 = vector.broadcast %112 : vector<1x32xf32> to vector<16x32xf32>
    %114 = arith.addf %110, %113 : vector<16x32xf32>
    %115 = arith.addf %3, %114 : vector<16x32xf32>
    %c0_52 = arith.constant 0 : index
    %c0_53 = arith.constant 0 : index
    %c0_54 = arith.constant 0 : index
    %c0_55 = arith.constant 0 : index
    %116 = vector.load %arg13[%c0_52, %c0_53, %c0_54, %c0_55] : memref<1x1x1x32xf32, #tpu.memory_space<vmem>>, vector<1x1x1x32xf32>
    %117 = vector.shape_cast %116 : vector<1x1x1x32xf32> to vector<1x32xf32>
    %c0_56 = arith.constant 0 : index
    %c0_57 = arith.constant 0 : index
    %c0_58 = arith.constant 0 : index
    %c0_59 = arith.constant 0 : index
    %118 = vector.load %arg14[%c0_56, %c0_57, %c0_58, %c0_59] : memref<1x1x1x32xf32, #tpu.memory_space<vmem>>, vector<1x1x1x32xf32>
    %119 = vector.shape_cast %118 : vector<1x1x1x32xf32> to vector<1x32xf32>
    %cst_60 = arith.constant dense<0.000000e+00> : vector<16xf32>
    %120 = vector.multi_reduction <add>, %115, %cst_60 [1] : vector<16x32xf32> to vector<16xf32>
    %121 = vector.shape_cast %120 : vector<16xf32> to vector<16x1xf32>
    %cst_61 = arith.constant 3.200000e+01 : f32
    %122 = vector.broadcast %cst_61 : f32 to vector<16x1xf32>
    %123 = arith.divf %121, %122 : vector<16x1xf32>
    %124 = vector.broadcast %123 : vector<16x1xf32> to vector<16x32xf32>
    %125 = arith.subf %115, %124 : vector<16x32xf32>
    %126 = arith.mulf %125, %125 : vector<16x32xf32>
    %cst_62 = arith.constant dense<0.000000e+00> : vector<16xf32>
    %127 = vector.multi_reduction <add>, %126, %cst_62 [1] : vector<16x32xf32> to vector<16xf32>
    %128 = vector.shape_cast %127 : vector<16xf32> to vector<16x1xf32>
    %cst_63 = arith.constant 3.200000e+01 : f32
    %129 = vector.broadcast %cst_63 : f32 to vector<16x1xf32>
    %130 = arith.divf %128, %129 : vector<16x1xf32>
    %131 = vector.broadcast %123 : vector<16x1xf32> to vector<16x32xf32>
    %132 = arith.subf %115, %131 : vector<16x32xf32>
    %cst_64 = arith.constant 9.99999974E-6 : f32
    %133 = vector.broadcast %cst_64 : f32 to vector<16x1xf32>
    %134 = arith.addf %130, %133 : vector<16x1xf32>
    %135 = math.rsqrt %134 : vector<16x1xf32>
    %136 = vector.broadcast %135 : vector<16x1xf32> to vector<16x32xf32>
    %137 = arith.mulf %132, %136 : vector<16x32xf32>
    %138 = vector.broadcast %117 : vector<1x32xf32> to vector<16x32xf32>
    %139 = arith.mulf %137, %138 : vector<16x32xf32>
    %140 = vector.broadcast %119 : vector<1x32xf32> to vector<16x32xf32>
    %141 = arith.addf %139, %140 : vector<16x32xf32>
    %142 = arith.truncf %141 : vector<16x32xf32> to vector<16x32xbf16>
    %c0_65 = arith.constant 0 : index
    %c0_66 = arith.constant 0 : index
    %c0_67 = arith.constant 0 : index
    %c0_68 = arith.constant 0 : index
    %143 = vector.load %arg15[%c0_65, %c0_66, %c0_67, %c0_68] : memref<1x1x32x128xbf16, #tpu.memory_space<vmem>>, vector<1x1x32x128xbf16>
    %144 = vector.shape_cast %143 : vector<1x1x32x128xbf16> to vector<32x128xbf16>
    %cst_69 = arith.constant dense<0.000000e+00> : vector<16x128xf32>
    %145 = tpu.matmul %142, %144, %cst_69 {dimension_numbers = #tpu.dot_dimension_numbers<[1], [0], [0], [1], [0, 0, 1, 1], [], []>} : vector<16x32xbf16>, vector<32x128xbf16>, vector<16x128xf32> -> vector<16x128xf32>
    %c0_70 = arith.constant 0 : index
    %c0_71 = arith.constant 0 : index
    %c0_72 = arith.constant 0 : index
    %c0_73 = arith.constant 0 : index
    %146 = vector.load %arg16[%c0_70, %c0_71, %c0_72, %c0_73] : memref<1x1x1x128xf32, #tpu.memory_space<vmem>>, vector<1x1x1x128xf32>
    %147 = vector.shape_cast %146 : vector<1x1x1x128xf32> to vector<1x128xf32>
    %148 = vector.broadcast %147 : vector<1x128xf32> to vector<16x128xf32>
    %149 = arith.addf %145, %148 : vector<16x128xf32>
    %cst_74 = arith.constant 0.000000e+00 : f32
    %150 = vector.broadcast %cst_74 : f32 to vector<16x128xf32>
    %151 = arith.maximumf %149, %150 : vector<16x128xf32>
    %152 = arith.truncf %151 : vector<16x128xf32> to vector<16x128xbf16>
    %c0_75 = arith.constant 0 : index
    %c0_76 = arith.constant 0 : index
    %c0_77 = arith.constant 0 : index
    %c0_78 = arith.constant 0 : index
    %153 = vector.load %arg17[%c0_75, %c0_76, %c0_77, %c0_78] : memref<1x1x128x32xbf16, #tpu.memory_space<vmem>>, vector<1x1x128x32xbf16>
    %154 = vector.shape_cast %153 : vector<1x1x128x32xbf16> to vector<128x32xbf16>
    %cst_79 = arith.constant dense<0.000000e+00> : vector<16x32xf32>
    %155 = tpu.matmul %152, %154, %cst_79 {dimension_numbers = #tpu.dot_dimension_numbers<[1], [0], [0], [1], [0, 0, 1, 1], [], []>} : vector<16x128xbf16>, vector<128x32xbf16>, vector<16x32xf32> -> vector<16x32xf32>
    %c0_80 = arith.constant 0 : index
    %c0_81 = arith.constant 0 : index
    %c0_82 = arith.constant 0 : index
    %c0_83 = arith.constant 0 : index
    %156 = vector.load %arg18[%c0_80, %c0_81, %c0_82, %c0_83] : memref<1x1x1x32xf32, #tpu.memory_space<vmem>>, vector<1x1x1x32xf32>
    %157 = vector.shape_cast %156 : vector<1x1x1x32xf32> to vector<1x32xf32>
    %158 = vector.broadcast %157 : vector<1x32xf32> to vector<16x32xf32>
    %159 = arith.addf %155, %158 : vector<16x32xf32>
    %160 = arith.addf %115, %159 : vector<16x32xf32>
    %c0_84 = arith.constant 0 : index
    %c0_85 = arith.constant 0 : index
    %161 = vector.load %arg22[%c0_84, %c0_85] : memref<16x32xf32, #tpu.memory_space<vmem>>, vector<16x32xf32>
    tpu.vector_store %arg22[%c0_84, %c0_85], %160 {strides = array<i32>} : memref<16x32xf32, #tpu.memory_space<vmem>>, vector<16x32xf32>,
    %c2_i32 = arith.constant 2 : i32
    %162 = arith.cmpi eq, %arg1, %c2_i32 : i32
    %163 = arith.extui %162 : i1 to i32
    %c0_i32_86 = arith.constant 0 : i32
    %164 = arith.cmpi ne, %163, %c0_i32_86 : i32
    scf.if %164 {
      %c0_87 = arith.constant 0 : index
      %c0_88 = arith.constant 0 : index
      %c0_89 = arith.constant 0 : index
      %165 = vector.load %arg19[%c0_87, %c0_88, %c0_89] : memref<1x1x32xf32, #tpu.memory_space<vmem>>, vector<1x1x32xf32>
      %166 = vector.shape_cast %165 : vector<1x1x32xf32> to vector<1x32xf32>
      %c0_90 = arith.constant 0 : index
      %c0_91 = arith.constant 0 : index
      %c0_92 = arith.constant 0 : index
      %167 = vector.load %arg20[%c0_90, %c0_91, %c0_92] : memref<1x1x32xf32, #tpu.memory_space<vmem>>, vector<1x1x32xf32>
      %168 = vector.shape_cast %167 : vector<1x1x32xf32> to vector<1x32xf32>
      %cst_93 = arith.constant dense<0.000000e+00> : vector<16xf32>
      %169 = vector.multi_reduction <add>, %160, %cst_93 [1] : vector<16x32xf32> to vector<16xf32>
      %170 = vector.shape_cast %169 : vector<16xf32> to vector<16x1xf32>
      %cst_94 = arith.constant 3.200000e+01 : f32
      %171 = vector.broadcast %cst_94 : f32 to vector<16x1xf32>
      %172 = arith.divf %170, %171 : vector<16x1xf32>
      %173 = vector.broadcast %172 : vector<16x1xf32> to vector<16x32xf32>
      %174 = arith.subf %160, %173 : vector<16x32xf32>
      %175 = arith.mulf %174, %174 : vector<16x32xf32>
      %cst_95 = arith.constant dense<0.000000e+00> : vector<16xf32>
      %176 = vector.multi_reduction <add>, %175, %cst_95 [1] : vector<16x32xf32> to vector<16xf32>
      %177 = vector.shape_cast %176 : vector<16xf32> to vector<16x1xf32>
      %cst_96 = arith.constant 3.200000e+01 : f32
      %178 = vector.broadcast %cst_96 : f32 to vector<16x1xf32>
      %179 = arith.divf %177, %178 : vector<16x1xf32>
      %180 = vector.broadcast %172 : vector<16x1xf32> to vector<16x32xf32>
      %181 = arith.subf %160, %180 : vector<16x32xf32>
      %cst_97 = arith.constant 9.99999974E-6 : f32
      %182 = vector.broadcast %cst_97 : f32 to vector<16x1xf32>
      %183 = arith.addf %179, %182 : vector<16x1xf32>
      %184 = math.rsqrt %183 : vector<16x1xf32>
      %185 = vector.broadcast %184 : vector<16x1xf32> to vector<16x32xf32>
      %186 = arith.mulf %181, %185 : vector<16x32xf32>
      %187 = vector.broadcast %166 : vector<1x32xf32> to vector<16x32xf32>
      %188 = arith.mulf %186, %187 : vector<16x32xf32>
      %189 = vector.broadcast %168 : vector<1x32xf32> to vector<16x32xf32>
      %190 = arith.addf %188, %189 : vector<16x32xf32>
      %191 = vector.shape_cast %190 : vector<16x32xf32> to vector<2x8x32xf32>
      %c0_98 = arith.constant 0 : index
      %c0_99 = arith.constant 0 : index
      %c0_100 = arith.constant 0 : index
      %c0_101 = arith.constant 0 : index
      %192 = vector.load %arg21[%c0_98, %c0_99, %c0_100, %c0_101] : memref<1x2x8x32xf32, #tpu.memory_space<vmem>>, vector<1x2x8x32xf32>
      %193 = vector.shape_cast %192 : vector<1x2x8x32xf32> to vector<2x8x32xf32>
      %194 = vector.shape_cast %191 : vector<2x8x32xf32> to vector<1x2x8x32xf32>
      tpu.vector_store %arg21[%c0_98, %c0_99, %c0_100, %c0_101], %194 {strides = array<i32>} : memref<1x2x8x32xf32, #tpu.memory_space<vmem>>, vector<1x2x8x32xf32>,
    } else {
    }
    return
  }
  func.func @transform_0(%arg0: i32, %arg1: i32) -> (i32, i32, i32, i32) {
    %c0_i32 = arith.constant 0 : i32
    %c0_i32_0 = arith.constant 0 : i32
    %c0_i32_1 = arith.constant 0 : i32
    %c0_i32_2 = arith.constant 0 : i32
    return %arg0, %c0_i32, %c0_i32_0, %c0_i32_1 : i32, i32, i32, i32
  }
  func.func @transform_1(%arg0: i32, %arg1: i32) -> (i32, i32, i32, i32) {
    %c0_i32 = arith.constant 0 : i32
    %c0_i32_0 = arith.constant 0 : i32
    %c0_i32_1 = arith.constant 0 : i32
    %c0_i32_2 = arith.constant 0 : i32
    return %arg0, %c0_i32, %c0_i32_0, %c0_i32_1 : i32, i32, i32, i32
  }
  func.func @transform_2(%arg0: i32, %arg1: i32) -> (i32, i32) {
    %c0_i32 = arith.constant 0 : i32
    %c0_i32_0 = arith.constant 0 : i32
    %c0_i32_1 = arith.constant 0 : i32
    return %c0_i32, %c0_i32_0 : i32, i32
  }
  func.func @transform_3(%arg0: i32, %arg1: i32) -> (i32, i32, i32, i32) {
    %c0_i32 = arith.constant 0 : i32
    %c0_i32_0 = arith.constant 0 : i32
    %c0_i32_1 = arith.constant 0 : i32
    return %arg0, %arg1, %c0_i32, %c0_i32_0 : i32, i32, i32, i32
  }
  func.func @transform_4(%arg0: i32, %arg1: i32) -> (i32, i32, i32, i32) {
    %c0_i32 = arith.constant 0 : i32
    %c0_i32_0 = arith.constant 0 : i32
    %c0_i32_1 = arith.constant 0 : i32
    return %arg0, %arg1, %c0_i32, %c0_i32_0 : i32, i32, i32, i32
  }
  func.func @transform_5(%arg0: i32, %arg1: i32) -> (i32, i32, i32, i32) {
    %c0_i32 = arith.constant 0 : i32
    %c0_i32_0 = arith.constant 0 : i32
    %c0_i32_1 = arith.constant 0 : i32
    return %arg0, %arg1, %c0_i32, %c0_i32_0 : i32, i32, i32, i32
  }
  func.func @transform_6(%arg0: i32, %arg1: i32) -> (i32, i32, i32, i32) {
    %c0_i32 = arith.constant 0 : i32
    %c0_i32_0 = arith.constant 0 : i32
    %c0_i32_1 = arith.constant 0 : i32
    return %arg0, %arg1, %c0_i32, %c0_i32_0 : i32, i32, i32, i32
  }
  func.func @transform_7(%arg0: i32, %arg1: i32) -> (i32, i32, i32, i32) {
    %c0_i32 = arith.constant 0 : i32
    %c0_i32_0 = arith.constant 0 : i32
    %c0_i32_1 = arith.constant 0 : i32
    return %arg0, %arg1, %c0_i32, %c0_i32_0 : i32, i32, i32, i32
  }
  func.func @transform_8(%arg0: i32, %arg1: i32) -> (i32, i32, i32, i32) {
    %c0_i32 = arith.constant 0 : i32
    %c0_i32_0 = arith.constant 0 : i32
    %c0_i32_1 = arith.constant 0 : i32
    return %arg0, %arg1, %c0_i32, %c0_i32_0 : i32, i32, i32, i32
  }
  func.func @transform_9(%arg0: i32, %arg1: i32) -> (i32, i32, i32, i32) {
    %c0_i32 = arith.constant 0 : i32
    %c0_i32_0 = arith.constant 0 : i32
    %c0_i32_1 = arith.constant 0 : i32
    return %arg0, %arg1, %c0_i32, %c0_i32_0 : i32, i32, i32, i32
  }
  func.func @transform_10(%arg0: i32, %arg1: i32) -> (i32, i32, i32, i32) {
    %c0_i32 = arith.constant 0 : i32
    %c0_i32_0 = arith.constant 0 : i32
    %c0_i32_1 = arith.constant 0 : i32
    return %arg0, %arg1, %c0_i32, %c0_i32_0 : i32, i32, i32, i32
  }
  func.func @transform_11(%arg0: i32, %arg1: i32) -> (i32, i32, i32, i32) {
    %c0_i32 = arith.constant 0 : i32
    %c0_i32_0 = arith.constant 0 : i32
    %c0_i32_1 = arith.constant 0 : i32
    return %arg0, %arg1, %c0_i32, %c0_i32_0 : i32, i32, i32, i32
  }
  func.func @transform_12(%arg0: i32, %arg1: i32) -> (i32, i32, i32, i32) {
    %c0_i32 = arith.constant 0 : i32
    %c0_i32_0 = arith.constant 0 : i32
    %c0_i32_1 = arith.constant 0 : i32
    return %arg0, %arg1, %c0_i32, %c0_i32_0 : i32, i32, i32, i32
  }
  func.func @transform_13(%arg0: i32, %arg1: i32) -> (i32, i32, i32, i32) {
    %c0_i32 = arith.constant 0 : i32
    %c0_i32_0 = arith.constant 0 : i32
    %c0_i32_1 = arith.constant 0 : i32
    return %arg0, %arg1, %c0_i32, %c0_i32_0 : i32, i32, i32, i32
  }
  func.func @transform_14(%arg0: i32, %arg1: i32) -> (i32, i32, i32, i32) {
    %c0_i32 = arith.constant 0 : i32
    %c0_i32_0 = arith.constant 0 : i32
    %c0_i32_1 = arith.constant 0 : i32
    return %arg0, %arg1, %c0_i32, %c0_i32_0 : i32, i32, i32, i32
  }
  func.func @transform_15(%arg0: i32, %arg1: i32) -> (i32, i32, i32, i32) {
    %c0_i32 = arith.constant 0 : i32
    %c0_i32_0 = arith.constant 0 : i32
    %c0_i32_1 = arith.constant 0 : i32
    return %arg0, %arg1, %c0_i32, %c0_i32_0 : i32, i32, i32, i32
  }
  func.func @transform_16(%arg0: i32, %arg1: i32) -> (i32, i32, i32, i32) {
    %c0_i32 = arith.constant 0 : i32
    %c0_i32_0 = arith.constant 0 : i32
    %c0_i32_1 = arith.constant 0 : i32
    return %arg0, %arg1, %c0_i32, %c0_i32_0 : i32, i32, i32, i32
  }
  func.func @transform_17(%arg0: i32, %arg1: i32) -> (i32, i32, i32) {
    %c0_i32 = arith.constant 0 : i32
    %c0_i32_0 = arith.constant 0 : i32
    %c0_i32_1 = arith.constant 0 : i32
    return %arg0, %c0_i32, %c0_i32_0 : i32, i32, i32
  }
  func.func @transform_18(%arg0: i32, %arg1: i32) -> (i32, i32, i32) {
    %c0_i32 = arith.constant 0 : i32
    %c0_i32_0 = arith.constant 0 : i32
    %c0_i32_1 = arith.constant 0 : i32
    return %arg0, %c0_i32, %c0_i32_0 : i32, i32, i32
  }
  func.func @transform_19(%arg0: i32, %arg1: i32) -> (i32, i32, i32, i32) {
    %c0_i32 = arith.constant 0 : i32
    %c0_i32_0 = arith.constant 0 : i32
    %c0_i32_1 = arith.constant 0 : i32
    %c0_i32_2 = arith.constant 0 : i32
    return %arg0, %c0_i32, %c0_i32_0, %c0_i32_1 : i32, i32, i32, i32
  }
}

module attributes {stable_mosaic.version = 11 : i64} {
  func.func @fused_encoder_kernel(%arg0: i32, %arg1: i32, %arg2: memref<1x2x8x64xf32, #tpu.memory_space<vmem>>, %arg3: memref<8x64xf32, #tpu.memory_space<vmem>>, %arg4: memref<1x1x1x64xf32, #tpu.memory_space<vmem>>, %arg5: memref<1x1x1x64xf32, #tpu.memory_space<vmem>>, %arg6: memref<1x1x64x64xbf16, #tpu.memory_space<vmem>>, %arg7: memref<1x1x1x64xf32, #tpu.memory_space<vmem>>, %arg8: memref<1x1x64x128xbf16, #tpu.memory_space<vmem>>, %arg9: memref<1x1x1x128xf32, #tpu.memory_space<vmem>>, %arg10: memref<1x1x64x64xbf16, #tpu.memory_space<vmem>>, %arg11: memref<1x1x1x64xf32, #tpu.memory_space<vmem>>, %arg12: memref<1x1x1x64xf32, #tpu.memory_space<vmem>>, %arg13: memref<1x1x1x64xf32, #tpu.memory_space<vmem>>, %arg14: memref<1x1x64x256xbf16, #tpu.memory_space<vmem>>, %arg15: memref<1x1x1x256xf32, #tpu.memory_space<vmem>>, %arg16: memref<1x1x256x64xbf16, #tpu.memory_space<vmem>>, %arg17: memref<1x1x1x64xf32, #tpu.memory_space<vmem>>, %arg18: memref<1x1x64xf32, #tpu.memory_space<vmem>>, %arg19: memref<1x1x64xf32, #tpu.memory_space<vmem>>, %arg20: memref<1x2x1x64xf32, #tpu.memory_space<vmem>>, %arg21: memref<16x64xf32, #tpu.memory_space<vmem>>) attributes {dimension_semantics = [#tpu.dimension_semantics<parallel>, #tpu.dimension_semantics<arbitrary>], iteration_bounds = array<i64: 3, 3>, scalar_prefetch = 0 : i64, scratch_operands = 1 : i64, tpu.core_type = #tpu.core_type<tc>, window_params = [{transform_indices = @transform_0, window_bounds = array<i64: 1, 2, 8, 64>}, {pipeline_mode = #tpu.pipeline_mode<synchronous>, transform_indices = @transform_1, window_bounds = array<i64: 8, 64>}, {transform_indices = @transform_2, window_bounds = array<i64: 1, 1, 1, 64>}, {transform_indices = @transform_3, window_bounds = array<i64: 1, 1, 1, 64>}, {transform_indices = @transform_4, window_bounds = array<i64: 1, 1, 64, 64>}, {transform_indices = @transform_5, window_bounds = array<i64: 1, 1, 1, 64>}, {transform_indices = @transform_6, window_bounds = array<i64: 1, 1, 64, 128>}, {transform_indices = @transform_7, window_bounds = array<i64: 1, 1, 1, 128>}, {transform_indices = @transform_8, window_bounds = array<i64: 1, 1, 64, 64>}, {transform_indices = @transform_9, window_bounds = array<i64: 1, 1, 1, 64>}, {transform_indices = @transform_10, window_bounds = array<i64: 1, 1, 1, 64>}, {transform_indices = @transform_11, window_bounds = array<i64: 1, 1, 1, 64>}, {transform_indices = @transform_12, window_bounds = array<i64: 1, 1, 64, 256>}, {transform_indices = @transform_13, window_bounds = array<i64: 1, 1, 1, 256>}, {transform_indices = @transform_14, window_bounds = array<i64: 1, 1, 256, 64>}, {transform_indices = @transform_15, window_bounds = array<i64: 1, 1, 1, 64>}, {transform_indices = @transform_16, window_bounds = array<i64: 1, 1, 64>}, {transform_indices = @transform_17, window_bounds = array<i64: 1, 1, 64>}, {transform_indices = @transform_18, window_bounds = array<i64: 1, 2, 1, 64>}]} {
    %c0_i32 = arith.constant 0 : i32
    %0 = arith.cmpi eq, %arg1, %c0_i32 : i32
    %1 = arith.extui %0 : i1 to i32
    %c0_i32_0 = arith.constant 0 : i32
    %2 = arith.cmpi ne, %1, %c0_i32_0 : i32
    scf.if %2 {
      %c0_80 = arith.constant 0 : index
      %c0_81 = arith.constant 0 : index
      %142 = vector.load %arg3[%c0_80, %c0_81] : memref<8x64xf32, #tpu.memory_space<vmem>>, vector<8x64xf32>
      %143 = vector.shape_cast %142 : vector<8x64xf32> to vector<1x8x64xf32>
      %c0_82 = arith.constant 0 : index
      %c0_83 = arith.constant 0 : index
      %c0_84 = arith.constant 0 : index
      %c0_85 = arith.constant 0 : index
      %144 = vector.load %arg2[%c0_82, %c0_83, %c0_84, %c0_85] : memref<1x2x8x64xf32, #tpu.memory_space<vmem>>, vector<1x2x8x64xf32>
      %145 = vector.shape_cast %144 : vector<1x2x8x64xf32> to vector<2x8x64xf32>
      %cst_86 = arith.constant 8.000000e+00 : f32
      %146 = vector.broadcast %cst_86 : f32 to vector<2x8x64xf32>
      %147 = arith.mulf %146, %145 : vector<2x8x64xf32>
      %148 = vector.broadcast %143 : vector<1x8x64xf32> to vector<2x8x64xf32>
      %149 = arith.addf %147, %148 : vector<2x8x64xf32>
      %150 = vector.shape_cast %149 : vector<2x8x64xf32> to vector<16x64xf32>
      %c0_87 = arith.constant 0 : index
      %c0_88 = arith.constant 0 : index
      %151 = vector.load %arg21[%c0_87, %c0_88] : memref<16x64xf32, #tpu.memory_space<vmem>>, vector<16x64xf32>
      tpu.vector_store %arg21[%c0_87, %c0_88], %150 {strides = array<i32>} : memref<16x64xf32, #tpu.memory_space<vmem>>, vector<16x64xf32>,
    } else {
    }
    %c0 = arith.constant 0 : index
    %c0_1 = arith.constant 0 : index
    %3 = vector.load %arg21[%c0, %c0_1] : memref<16x64xf32, #tpu.memory_space<vmem>>, vector<16x64xf32>
    %c0_2 = arith.constant 0 : index
    %c0_3 = arith.constant 0 : index
    %c0_4 = arith.constant 0 : index
    %c0_5 = arith.constant 0 : index
    %4 = vector.load %arg4[%c0_2, %c0_3, %c0_4, %c0_5] : memref<1x1x1x64xf32, #tpu.memory_space<vmem>>, vector<1x1x1x64xf32>
    %5 = vector.shape_cast %4 : vector<1x1x1x64xf32> to vector<1x64xf32>
    %c0_6 = arith.constant 0 : index
    %c0_7 = arith.constant 0 : index
    %c0_8 = arith.constant 0 : index
    %c0_9 = arith.constant 0 : index
    %6 = vector.load %arg5[%c0_6, %c0_7, %c0_8, %c0_9] : memref<1x1x1x64xf32, #tpu.memory_space<vmem>>, vector<1x1x1x64xf32>
    %7 = vector.shape_cast %6 : vector<1x1x1x64xf32> to vector<1x64xf32>
    %cst = arith.constant dense<0.000000e+00> : vector<16xf32>
    %8 = vector.multi_reduction <add>, %3, %cst [1] : vector<16x64xf32> to vector<16xf32>
    %9 = vector.shape_cast %8 : vector<16xf32> to vector<16x1xf32>
    %cst_10 = arith.constant 6.400000e+01 : f32
    %10 = vector.broadcast %cst_10 : f32 to vector<16x1xf32>
    %11 = arith.divf %9, %10 : vector<16x1xf32>
    %12 = vector.broadcast %11 : vector<16x1xf32> to vector<16x64xf32>
    %13 = arith.subf %3, %12 : vector<16x64xf32>
    %14 = arith.mulf %13, %13 : vector<16x64xf32>
    %cst_11 = arith.constant dense<0.000000e+00> : vector<16xf32>
    %15 = vector.multi_reduction <add>, %14, %cst_11 [1] : vector<16x64xf32> to vector<16xf32>
    %16 = vector.shape_cast %15 : vector<16xf32> to vector<16x1xf32>
    %cst_12 = arith.constant 6.400000e+01 : f32
    %17 = vector.broadcast %cst_12 : f32 to vector<16x1xf32>
    %18 = arith.divf %16, %17 : vector<16x1xf32>
    %19 = vector.broadcast %11 : vector<16x1xf32> to vector<16x64xf32>
    %20 = arith.subf %3, %19 : vector<16x64xf32>
    %cst_13 = arith.constant 9.99999974E-6 : f32
    %21 = vector.broadcast %cst_13 : f32 to vector<16x1xf32>
    %22 = arith.addf %18, %21 : vector<16x1xf32>
    %23 = math.rsqrt %22 : vector<16x1xf32>
    %24 = vector.broadcast %23 : vector<16x1xf32> to vector<16x64xf32>
    %25 = arith.mulf %20, %24 : vector<16x64xf32>
    %26 = vector.broadcast %5 : vector<1x64xf32> to vector<16x64xf32>
    %27 = arith.mulf %25, %26 : vector<16x64xf32>
    %28 = vector.broadcast %7 : vector<1x64xf32> to vector<16x64xf32>
    %29 = arith.addf %27, %28 : vector<16x64xf32>
    %30 = arith.truncf %29 : vector<16x64xf32> to vector<16x64xbf16>
    %c0_14 = arith.constant 0 : index
    %c0_15 = arith.constant 0 : index
    %c0_16 = arith.constant 0 : index
    %c0_17 = arith.constant 0 : index
    %31 = vector.load %arg6[%c0_14, %c0_15, %c0_16, %c0_17] : memref<1x1x64x64xbf16, #tpu.memory_space<vmem>>, vector<1x1x64x64xbf16>
    %32 = vector.shape_cast %31 : vector<1x1x64x64xbf16> to vector<64x64xbf16>
    %cst_18 = arith.constant dense<0.000000e+00> : vector<16x64xf32>
    %33 = tpu.matmul %30, %32, %cst_18 {dimension_numbers = #tpu.dot_dimension_numbers<[1], [0], [0], [1], [0, 0, 1, 1], [], []>} : vector<16x64xbf16>, vector<64x64xbf16>, vector<16x64xf32> -> vector<16x64xf32>
    %c0_19 = arith.constant 0 : index
    %c0_20 = arith.constant 0 : index
    %c0_21 = arith.constant 0 : index
    %c0_22 = arith.constant 0 : index
    %34 = vector.load %arg7[%c0_19, %c0_20, %c0_21, %c0_22] : memref<1x1x1x64xf32, #tpu.memory_space<vmem>>, vector<1x1x1x64xf32>
    %35 = vector.shape_cast %34 : vector<1x1x1x64xf32> to vector<1x64xf32>
    %36 = vector.broadcast %35 : vector<1x64xf32> to vector<16x64xf32>
    %37 = arith.addf %33, %36 : vector<16x64xf32>
    %38 = arith.truncf %29 : vector<16x64xf32> to vector<16x64xbf16>
    %c0_23 = arith.constant 0 : index
    %c0_24 = arith.constant 0 : index
    %c0_25 = arith.constant 0 : index
    %c0_26 = arith.constant 0 : index
    %39 = vector.load %arg8[%c0_23, %c0_24, %c0_25, %c0_26] : memref<1x1x64x128xbf16, #tpu.memory_space<vmem>>, vector<1x1x64x128xbf16>
    %40 = vector.shape_cast %39 : vector<1x1x64x128xbf16> to vector<64x128xbf16>
    %cst_27 = arith.constant dense<0.000000e+00> : vector<16x128xf32>
    %41 = tpu.matmul %38, %40, %cst_27 {dimension_numbers = #tpu.dot_dimension_numbers<[1], [0], [0], [1], [0, 0, 1, 1], [], []>} : vector<16x64xbf16>, vector<64x128xbf16>, vector<16x128xf32> -> vector<16x128xf32>
    %c0_28 = arith.constant 0 : index
    %c0_29 = arith.constant 0 : index
    %c0_30 = arith.constant 0 : index
    %c0_31 = arith.constant 0 : index
    %42 = vector.load %arg9[%c0_28, %c0_29, %c0_30, %c0_31] : memref<1x1x1x128xf32, #tpu.memory_space<vmem>>, vector<1x1x1x128xf32>
    %43 = vector.shape_cast %42 : vector<1x1x1x128xf32> to vector<1x128xf32>
    %44 = vector.broadcast %43 : vector<1x128xf32> to vector<16x128xf32>
    %45 = arith.addf %41, %44 : vector<16x128xf32>
    %46 = vector.shape_cast %37 : vector<16x64xf32> to vector<2x8x64xf32>
    %47 = vector.extract_strided_slice %45 {offsets = [0, 0], sizes = [16, 64], strides = [1, 1]} : vector<16x128xf32> to vector<16x64xf32>
    %48 = vector.shape_cast %47 : vector<16x64xf32> to vector<2x8x64xf32>
    %49 = vector.extract_strided_slice %45 {offsets = [0, 64], sizes = [16, 64], strides = [1, 1]} : vector<16x128xf32> to vector<16x64xf32>
    %50 = vector.shape_cast %49 : vector<16x64xf32> to vector<2x8x64xf32>
    %51 = vector.extract_strided_slice %46 {offsets = [0, 0, 0], sizes = [2, 8, 16], strides = [1, 1, 1]} : vector<2x8x64xf32> to vector<2x8x16xf32>
    %52 = vector.extract_strided_slice %46 {offsets = [0, 0, 16], sizes = [2, 8, 16], strides = [1, 1, 1]} : vector<2x8x64xf32> to vector<2x8x16xf32>
    %53 = vector.extract_strided_slice %46 {offsets = [0, 0, 32], sizes = [2, 8, 16], strides = [1, 1, 1]} : vector<2x8x64xf32> to vector<2x8x16xf32>
    %54 = vector.extract_strided_slice %46 {offsets = [0, 0, 48], sizes = [2, 8, 16], strides = [1, 1, 1]} : vector<2x8x64xf32> to vector<2x8x16xf32>
    %55 = tpu.concatenate %51, %52, %53, %54 in 0 : vector<2x8x16xf32>, vector<2x8x16xf32>, vector<2x8x16xf32>, vector<2x8x16xf32> -> vector<8x8x16xf32>
    %56 = vector.extract_strided_slice %48 {offsets = [0, 0, 0], sizes = [2, 8, 16], strides = [1, 1, 1]} : vector<2x8x64xf32> to vector<2x8x16xf32>
    %57 = vector.extract_strided_slice %48 {offsets = [0, 0, 16], sizes = [2, 8, 16], strides = [1, 1, 1]} : vector<2x8x64xf32> to vector<2x8x16xf32>
    %58 = vector.extract_strided_slice %48 {offsets = [0, 0, 32], sizes = [2, 8, 16], strides = [1, 1, 1]} : vector<2x8x64xf32> to vector<2x8x16xf32>
    %59 = vector.extract_strided_slice %48 {offsets = [0, 0, 48], sizes = [2, 8, 16], strides = [1, 1, 1]} : vector<2x8x64xf32> to vector<2x8x16xf32>
    %60 = tpu.concatenate %56, %57, %58, %59 in 0 : vector<2x8x16xf32>, vector<2x8x16xf32>, vector<2x8x16xf32>, vector<2x8x16xf32> -> vector<8x8x16xf32>
    %61 = vector.extract_strided_slice %50 {offsets = [0, 0, 0], sizes = [2, 8, 16], strides = [1, 1, 1]} : vector<2x8x64xf32> to vector<2x8x16xf32>
    %62 = vector.extract_strided_slice %50 {offsets = [0, 0, 16], sizes = [2, 8, 16], strides = [1, 1, 1]} : vector<2x8x64xf32> to vector<2x8x16xf32>
    %63 = vector.extract_strided_slice %50 {offsets = [0, 0, 32], sizes = [2, 8, 16], strides = [1, 1, 1]} : vector<2x8x64xf32> to vector<2x8x16xf32>
    %64 = vector.extract_strided_slice %50 {offsets = [0, 0, 48], sizes = [2, 8, 16], strides = [1, 1, 1]} : vector<2x8x64xf32> to vector<2x8x16xf32>
    %65 = tpu.concatenate %61, %62, %63, %64 in 0 : vector<2x8x16xf32>, vector<2x8x16xf32>, vector<2x8x16xf32>, vector<2x8x16xf32> -> vector<8x8x16xf32>
    "tpu.trace_start"() <{level = 10 : i32, message = "bqd,bkd->bqk"}> : () -> ()
    %cst_32 = arith.constant dense<0.000000e+00> : vector<8x8x8xf32>
    %66 = tpu.matmul %55, %60, %cst_32 {dimension_numbers = #tpu.dot_dimension_numbers<[2], [2], [1], [1], [0, 0, 0, 1, 1, 1], [0], [0]>} : vector<8x8x16xf32>, vector<8x8x16xf32>, vector<8x8x8xf32> -> vector<8x8x8xf32>
    "tpu.trace_stop"() : () -> ()
    %cst_33 = arith.constant dense<0xFF800000> : vector<8x8xf32>
    %67 = vector.multi_reduction <maximumf>, %66, %cst_33 [2] : vector<8x8x8xf32> to vector<8x8xf32>
    %68 = vector.shape_cast %67 : vector<8x8xf32> to vector<8x8x1xf32>
    %69 = vector.broadcast %68 : vector<8x8x1xf32> to vector<8x8x8xf32>
    %70 = arith.subf %66, %69 : vector<8x8x8xf32>
    %71 = math.exp %70 : vector<8x8x8xf32>
    %cst_34 = arith.constant dense<0.000000e+00> : vector<8x8xf32>
    %72 = vector.multi_reduction <add>, %71, %cst_34 [2] : vector<8x8x8xf32> to vector<8x8xf32>
    %73 = vector.shape_cast %72 : vector<8x8xf32> to vector<8x8x1xf32>
    %74 = tpu.reciprocal %73 {approx = true} : vector<8x8x1xf32> -> vector<8x8x1xf32>
    %75 = vector.broadcast %74 : vector<8x8x1xf32> to vector<8x8x8xf32>
    %76 = arith.mulf %71, %75 : vector<8x8x8xf32>
    "tpu.trace_start"() <{level = 10 : i32, message = "bqk,bkd->bqd"}> : () -> ()
    %cst_35 = arith.constant dense<0.000000e+00> : vector<8x8x16xf32>
    %77 = tpu.matmul %76, %65, %cst_35 {dimension_numbers = #tpu.dot_dimension_numbers<[2], [1], [1], [2], [0, 0, 0, 1, 1, 2], [0], [0]>} : vector<8x8x8xf32>, vector<8x8x16xf32>, vector<8x8x16xf32> -> vector<8x8x16xf32>
    "tpu.trace_stop"() : () -> ()
    %78 = vector.extract_strided_slice %77 {offsets = [0, 0, 0], sizes = [2, 8, 16], strides = [1, 1, 1]} : vector<8x8x16xf32> to vector<2x8x16xf32>
    %79 = vector.extract_strided_slice %77 {offsets = [2, 0, 0], sizes = [2, 8, 16], strides = [1, 1, 1]} : vector<8x8x16xf32> to vector<2x8x16xf32>
    %80 = vector.extract_strided_slice %77 {offsets = [4, 0, 0], sizes = [2, 8, 16], strides = [1, 1, 1]} : vector<8x8x16xf32> to vector<2x8x16xf32>
    %81 = vector.extract_strided_slice %77 {offsets = [6, 0, 0], sizes = [2, 8, 16], strides = [1, 1, 1]} : vector<8x8x16xf32> to vector<2x8x16xf32>
    %82 = tpu.concatenate %78, %79, %80, %81 in 2 : vector<2x8x16xf32>, vector<2x8x16xf32>, vector<2x8x16xf32>, vector<2x8x16xf32> -> vector<2x8x64xf32>
    %83 = vector.shape_cast %82 : vector<2x8x64xf32> to vector<16x64xf32>
    %84 = arith.truncf %83 : vector<16x64xf32> to vector<16x64xbf16>
    %c0_36 = arith.constant 0 : index
    %c0_37 = arith.constant 0 : index
    %c0_38 = arith.constant 0 : index
    %c0_39 = arith.constant 0 : index
    %85 = vector.load %arg10[%c0_36, %c0_37, %c0_38, %c0_39] : memref<1x1x64x64xbf16, #tpu.memory_space<vmem>>, vector<1x1x64x64xbf16>
    %86 = vector.shape_cast %85 : vector<1x1x64x64xbf16> to vector<64x64xbf16>
    %cst_40 = arith.constant dense<0.000000e+00> : vector<16x64xf32>
    %87 = tpu.matmul %84, %86, %cst_40 {dimension_numbers = #tpu.dot_dimension_numbers<[1], [0], [0], [1], [0, 0, 1, 1], [], []>} : vector<16x64xbf16>, vector<64x64xbf16>, vector<16x64xf32> -> vector<16x64xf32>
    %c0_41 = arith.constant 0 : index
    %c0_42 = arith.constant 0 : index
    %c0_43 = arith.constant 0 : index
    %c0_44 = arith.constant 0 : index
    %88 = vector.load %arg11[%c0_41, %c0_42, %c0_43, %c0_44] : memref<1x1x1x64xf32, #tpu.memory_space<vmem>>, vector<1x1x1x64xf32>
    %89 = vector.shape_cast %88 : vector<1x1x1x64xf32> to vector<1x64xf32>
    %90 = vector.broadcast %89 : vector<1x64xf32> to vector<16x64xf32>
    %91 = arith.addf %87, %90 : vector<16x64xf32>
    %92 = arith.addf %3, %91 : vector<16x64xf32>
    %c0_45 = arith.constant 0 : index
    %c0_46 = arith.constant 0 : index
    %c0_47 = arith.constant 0 : index
    %c0_48 = arith.constant 0 : index
    %93 = vector.load %arg12[%c0_45, %c0_46, %c0_47, %c0_48] : memref<1x1x1x64xf32, #tpu.memory_space<vmem>>, vector<1x1x1x64xf32>
    %94 = vector.shape_cast %93 : vector<1x1x1x64xf32> to vector<1x64xf32>
    %c0_49 = arith.constant 0 : index
    %c0_50 = arith.constant 0 : index
    %c0_51 = arith.constant 0 : index
    %c0_52 = arith.constant 0 : index
    %95 = vector.load %arg13[%c0_49, %c0_50, %c0_51, %c0_52] : memref<1x1x1x64xf32, #tpu.memory_space<vmem>>, vector<1x1x1x64xf32>
    %96 = vector.shape_cast %95 : vector<1x1x1x64xf32> to vector<1x64xf32>
    %cst_53 = arith.constant dense<0.000000e+00> : vector<16xf32>
    %97 = vector.multi_reduction <add>, %92, %cst_53 [1] : vector<16x64xf32> to vector<16xf32>
    %98 = vector.shape_cast %97 : vector<16xf32> to vector<16x1xf32>
    %cst_54 = arith.constant 6.400000e+01 : f32
    %99 = vector.broadcast %cst_54 : f32 to vector<16x1xf32>
    %100 = arith.divf %98, %99 : vector<16x1xf32>
    %101 = vector.broadcast %100 : vector<16x1xf32> to vector<16x64xf32>
    %102 = arith.subf %92, %101 : vector<16x64xf32>
    %103 = arith.mulf %102, %102 : vector<16x64xf32>
    %cst_55 = arith.constant dense<0.000000e+00> : vector<16xf32>
    %104 = vector.multi_reduction <add>, %103, %cst_55 [1] : vector<16x64xf32> to vector<16xf32>
    %105 = vector.shape_cast %104 : vector<16xf32> to vector<16x1xf32>
    %cst_56 = arith.constant 6.400000e+01 : f32
    %106 = vector.broadcast %cst_56 : f32 to vector<16x1xf32>
    %107 = arith.divf %105, %106 : vector<16x1xf32>
    %108 = vector.broadcast %100 : vector<16x1xf32> to vector<16x64xf32>
    %109 = arith.subf %92, %108 : vector<16x64xf32>
    %cst_57 = arith.constant 9.99999974E-6 : f32
    %110 = vector.broadcast %cst_57 : f32 to vector<16x1xf32>
    %111 = arith.addf %107, %110 : vector<16x1xf32>
    %112 = math.rsqrt %111 : vector<16x1xf32>
    %113 = vector.broadcast %112 : vector<16x1xf32> to vector<16x64xf32>
    %114 = arith.mulf %109, %113 : vector<16x64xf32>
    %115 = vector.broadcast %94 : vector<1x64xf32> to vector<16x64xf32>
    %116 = arith.mulf %114, %115 : vector<16x64xf32>
    %117 = vector.broadcast %96 : vector<1x64xf32> to vector<16x64xf32>
    %118 = arith.addf %116, %117 : vector<16x64xf32>
    %119 = arith.truncf %118 : vector<16x64xf32> to vector<16x64xbf16>
    %c0_58 = arith.constant 0 : index
    %c0_59 = arith.constant 0 : index
    %c0_60 = arith.constant 0 : index
    %c0_61 = arith.constant 0 : index
    %120 = vector.load %arg14[%c0_58, %c0_59, %c0_60, %c0_61] : memref<1x1x64x256xbf16, #tpu.memory_space<vmem>>, vector<1x1x64x256xbf16>
    %121 = vector.shape_cast %120 : vector<1x1x64x256xbf16> to vector<64x256xbf16>
    %cst_62 = arith.constant dense<0.000000e+00> : vector<16x256xf32>
    %122 = tpu.matmul %119, %121, %cst_62 {dimension_numbers = #tpu.dot_dimension_numbers<[1], [0], [0], [1], [0, 0, 1, 1], [], []>} : vector<16x64xbf16>, vector<64x256xbf16>, vector<16x256xf32> -> vector<16x256xf32>
    %c0_63 = arith.constant 0 : index
    %c0_64 = arith.constant 0 : index
    %c0_65 = arith.constant 0 : index
    %c0_66 = arith.constant 0 : index
    %123 = vector.load %arg15[%c0_63, %c0_64, %c0_65, %c0_66] : memref<1x1x1x256xf32, #tpu.memory_space<vmem>>, vector<1x1x1x256xf32>
    %124 = vector.shape_cast %123 : vector<1x1x1x256xf32> to vector<1x256xf32>
    %125 = vector.broadcast %124 : vector<1x256xf32> to vector<16x256xf32>
    %126 = arith.addf %122, %125 : vector<16x256xf32>
    %cst_67 = arith.constant 0.000000e+00 : f32
    %127 = vector.broadcast %cst_67 : f32 to vector<16x256xf32>
    %128 = arith.maximumf %126, %127 : vector<16x256xf32>
    %129 = arith.truncf %128 : vector<16x256xf32> to vector<16x256xbf16>
    %c0_68 = arith.constant 0 : index
    %c0_69 = arith.constant 0 : index
    %c0_70 = arith.constant 0 : index
    %c0_71 = arith.constant 0 : index
    %130 = vector.load %arg16[%c0_68, %c0_69, %c0_70, %c0_71] : memref<1x1x256x64xbf16, #tpu.memory_space<vmem>>, vector<1x1x256x64xbf16>
    %131 = vector.shape_cast %130 : vector<1x1x256x64xbf16> to vector<256x64xbf16>
    %cst_72 = arith.constant dense<0.000000e+00> : vector<16x64xf32>
    %132 = tpu.matmul %129, %131, %cst_72 {dimension_numbers = #tpu.dot_dimension_numbers<[1], [0], [0], [1], [0, 0, 1, 1], [], []>} : vector<16x256xbf16>, vector<256x64xbf16>, vector<16x64xf32> -> vector<16x64xf32>
    %c0_73 = arith.constant 0 : index
    %c0_74 = arith.constant 0 : index
    %c0_75 = arith.constant 0 : index
    %c0_76 = arith.constant 0 : index
    %133 = vector.load %arg17[%c0_73, %c0_74, %c0_75, %c0_76] : memref<1x1x1x64xf32, #tpu.memory_space<vmem>>, vector<1x1x1x64xf32>
    %134 = vector.shape_cast %133 : vector<1x1x1x64xf32> to vector<1x64xf32>
    %135 = vector.broadcast %134 : vector<1x64xf32> to vector<16x64xf32>
    %136 = arith.addf %132, %135 : vector<16x64xf32>
    %137 = arith.addf %92, %136 : vector<16x64xf32>
    %c0_77 = arith.constant 0 : index
    %c0_78 = arith.constant 0 : index
    %138 = vector.load %arg21[%c0_77, %c0_78] : memref<16x64xf32, #tpu.memory_space<vmem>>, vector<16x64xf32>
    tpu.vector_store %arg21[%c0_77, %c0_78], %137 {strides = array<i32>} : memref<16x64xf32, #tpu.memory_space<vmem>>, vector<16x64xf32>,
    %c2_i32 = arith.constant 2 : i32
    %139 = arith.cmpi eq, %arg1, %c2_i32 : i32
    %140 = arith.extui %139 : i1 to i32
    %c0_i32_79 = arith.constant 0 : i32
    %141 = arith.cmpi ne, %140, %c0_i32_79 : i32
    scf.if %141 {
      %142 = vector.shape_cast %137 : vector<16x64xf32> to vector<2x8x64xf32>
      %143 = vector.extract_strided_slice %142 {offsets = [0, 7, 0], sizes = [2, 1, 64], strides = [1, 1, 1]} : vector<2x8x64xf32> to vector<2x1x64xf32>
      %c0_80 = arith.constant 0 : index
      %c0_81 = arith.constant 0 : index
      %c0_82 = arith.constant 0 : index
      %144 = vector.load %arg18[%c0_80, %c0_81, %c0_82] : memref<1x1x64xf32, #tpu.memory_space<vmem>>, vector<1x1x64xf32>
      %145 = vector.shape_cast %144 : vector<1x1x64xf32> to vector<1x64xf32>
      %c0_83 = arith.constant 0 : index
      %c0_84 = arith.constant 0 : index
      %c0_85 = arith.constant 0 : index
      %146 = vector.load %arg19[%c0_83, %c0_84, %c0_85] : memref<1x1x64xf32, #tpu.memory_space<vmem>>, vector<1x1x64xf32>
      %147 = vector.shape_cast %146 : vector<1x1x64xf32> to vector<1x64xf32>
      %cst_86 = arith.constant dense<0.000000e+00> : vector<2x1xf32>
      %148 = vector.multi_reduction <add>, %143, %cst_86 [2] : vector<2x1x64xf32> to vector<2x1xf32>
      %149 = vector.shape_cast %148 : vector<2x1xf32> to vector<2x1x1xf32>
      %cst_87 = arith.constant 6.400000e+01 : f32
      %150 = vector.broadcast %cst_87 : f32 to vector<2x1x1xf32>
      %151 = arith.divf %149, %150 : vector<2x1x1xf32>
      %152 = vector.broadcast %151 : vector<2x1x1xf32> to vector<2x1x64xf32>
      %153 = arith.subf %143, %152 : vector<2x1x64xf32>
      %154 = arith.mulf %153, %153 : vector<2x1x64xf32>
      %cst_88 = arith.constant dense<0.000000e+00> : vector<2x1xf32>
      %155 = vector.multi_reduction <add>, %154, %cst_88 [2] : vector<2x1x64xf32> to vector<2x1xf32>
      %156 = vector.shape_cast %155 : vector<2x1xf32> to vector<2x1x1xf32>
      %cst_89 = arith.constant 6.400000e+01 : f32
      %157 = vector.broadcast %cst_89 : f32 to vector<2x1x1xf32>
      %158 = arith.divf %156, %157 : vector<2x1x1xf32>
      %159 = vector.broadcast %151 : vector<2x1x1xf32> to vector<2x1x64xf32>
      %160 = arith.subf %143, %159 : vector<2x1x64xf32>
      %cst_90 = arith.constant 9.99999974E-6 : f32
      %161 = vector.broadcast %cst_90 : f32 to vector<2x1x1xf32>
      %162 = arith.addf %158, %161 : vector<2x1x1xf32>
      %163 = math.rsqrt %162 : vector<2x1x1xf32>
      %164 = vector.broadcast %163 : vector<2x1x1xf32> to vector<2x1x64xf32>
      %165 = arith.mulf %160, %164 : vector<2x1x64xf32>
      %166 = vector.shape_cast %145 : vector<1x64xf32> to vector<1x1x64xf32>
      %167 = vector.broadcast %166 : vector<1x1x64xf32> to vector<2x1x64xf32>
      %168 = arith.mulf %165, %167 : vector<2x1x64xf32>
      %169 = vector.shape_cast %147 : vector<1x64xf32> to vector<1x1x64xf32>
      %170 = vector.broadcast %169 : vector<1x1x64xf32> to vector<2x1x64xf32>
      %171 = arith.addf %168, %170 : vector<2x1x64xf32>
      %c0_91 = arith.constant 0 : index
      %c0_92 = arith.constant 0 : index
      %c0_93 = arith.constant 0 : index
      %c0_94 = arith.constant 0 : index
      %172 = vector.load %arg20[%c0_91, %c0_92, %c0_93, %c0_94] : memref<1x2x1x64xf32, #tpu.memory_space<vmem>>, vector<1x2x1x64xf32>
      %173 = vector.shape_cast %172 : vector<1x2x1x64xf32> to vector<2x1x64xf32>
      %174 = vector.shape_cast %171 : vector<2x1x64xf32> to vector<1x2x1x64xf32>
      tpu.vector_store %arg20[%c0_91, %c0_92, %c0_93, %c0_94], %174 {strides = array<i32>} : memref<1x2x1x64xf32, #tpu.memory_space<vmem>>, vector<1x2x1x64xf32>,
    } else {
    }
    return
  }
  func.func @transform_0(%arg0: i32, %arg1: i32) -> (i32, i32, i32, i32) {
    %c0_i32 = arith.constant 0 : i32
    %c0_i32_0 = arith.constant 0 : i32
    %c0_i32_1 = arith.constant 0 : i32
    %c0_i32_2 = arith.constant 0 : i32
    return %arg0, %c0_i32, %c0_i32_0, %c0_i32_1 : i32, i32, i32, i32
  }
  func.func @transform_1(%arg0: i32, %arg1: i32) -> (i32, i32) {
    %c0_i32 = arith.constant 0 : i32
    %c0_i32_0 = arith.constant 0 : i32
    %c0_i32_1 = arith.constant 0 : i32
    return %c0_i32, %c0_i32_0 : i32, i32
  }
  func.func @transform_2(%arg0: i32, %arg1: i32) -> (i32, i32, i32, i32) {
    %c0_i32 = arith.constant 0 : i32
    %c0_i32_0 = arith.constant 0 : i32
    %c0_i32_1 = arith.constant 0 : i32
    return %arg0, %arg1, %c0_i32, %c0_i32_0 : i32, i32, i32, i32
  }
  func.func @transform_3(%arg0: i32, %arg1: i32) -> (i32, i32, i32, i32) {
    %c0_i32 = arith.constant 0 : i32
    %c0_i32_0 = arith.constant 0 : i32
    %c0_i32_1 = arith.constant 0 : i32
    return %arg0, %arg1, %c0_i32, %c0_i32_0 : i32, i32, i32, i32
  }
  func.func @transform_4(%arg0: i32, %arg1: i32) -> (i32, i32, i32, i32) {
    %c0_i32 = arith.constant 0 : i32
    %c0_i32_0 = arith.constant 0 : i32
    %c0_i32_1 = arith.constant 0 : i32
    return %arg0, %arg1, %c0_i32, %c0_i32_0 : i32, i32, i32, i32
  }
  func.func @transform_5(%arg0: i32, %arg1: i32) -> (i32, i32, i32, i32) {
    %c0_i32 = arith.constant 0 : i32
    %c0_i32_0 = arith.constant 0 : i32
    %c0_i32_1 = arith.constant 0 : i32
    return %arg0, %arg1, %c0_i32, %c0_i32_0 : i32, i32, i32, i32
  }
  func.func @transform_6(%arg0: i32, %arg1: i32) -> (i32, i32, i32, i32) {
    %c0_i32 = arith.constant 0 : i32
    %c0_i32_0 = arith.constant 0 : i32
    %c0_i32_1 = arith.constant 0 : i32
    return %arg0, %arg1, %c0_i32, %c0_i32_0 : i32, i32, i32, i32
  }
  func.func @transform_7(%arg0: i32, %arg1: i32) -> (i32, i32, i32, i32) {
    %c0_i32 = arith.constant 0 : i32
    %c0_i32_0 = arith.constant 0 : i32
    %c0_i32_1 = arith.constant 0 : i32
    return %arg0, %arg1, %c0_i32, %c0_i32_0 : i32, i32, i32, i32
  }
  func.func @transform_8(%arg0: i32, %arg1: i32) -> (i32, i32, i32, i32) {
    %c0_i32 = arith.constant 0 : i32
    %c0_i32_0 = arith.constant 0 : i32
    %c0_i32_1 = arith.constant 0 : i32
    return %arg0, %arg1, %c0_i32, %c0_i32_0 : i32, i32, i32, i32
  }
  func.func @transform_9(%arg0: i32, %arg1: i32) -> (i32, i32, i32, i32) {
    %c0_i32 = arith.constant 0 : i32
    %c0_i32_0 = arith.constant 0 : i32
    %c0_i32_1 = arith.constant 0 : i32
    return %arg0, %arg1, %c0_i32, %c0_i32_0 : i32, i32, i32, i32
  }
  func.func @transform_10(%arg0: i32, %arg1: i32) -> (i32, i32, i32, i32) {
    %c0_i32 = arith.constant 0 : i32
    %c0_i32_0 = arith.constant 0 : i32
    %c0_i32_1 = arith.constant 0 : i32
    return %arg0, %arg1, %c0_i32, %c0_i32_0 : i32, i32, i32, i32
  }
  func.func @transform_11(%arg0: i32, %arg1: i32) -> (i32, i32, i32, i32) {
    %c0_i32 = arith.constant 0 : i32
    %c0_i32_0 = arith.constant 0 : i32
    %c0_i32_1 = arith.constant 0 : i32
    return %arg0, %arg1, %c0_i32, %c0_i32_0 : i32, i32, i32, i32
  }
  func.func @transform_12(%arg0: i32, %arg1: i32) -> (i32, i32, i32, i32) {
    %c0_i32 = arith.constant 0 : i32
    %c0_i32_0 = arith.constant 0 : i32
    %c0_i32_1 = arith.constant 0 : i32
    return %arg0, %arg1, %c0_i32, %c0_i32_0 : i32, i32, i32, i32
  }
  func.func @transform_13(%arg0: i32, %arg1: i32) -> (i32, i32, i32, i32) {
    %c0_i32 = arith.constant 0 : i32
    %c0_i32_0 = arith.constant 0 : i32
    %c0_i32_1 = arith.constant 0 : i32
    return %arg0, %arg1, %c0_i32, %c0_i32_0 : i32, i32, i32, i32
  }
  func.func @transform_14(%arg0: i32, %arg1: i32) -> (i32, i32, i32, i32) {
    %c0_i32 = arith.constant 0 : i32
    %c0_i32_0 = arith.constant 0 : i32
    %c0_i32_1 = arith.constant 0 : i32
    return %arg0, %arg1, %c0_i32, %c0_i32_0 : i32, i32, i32, i32
  }
  func.func @transform_15(%arg0: i32, %arg1: i32) -> (i32, i32, i32, i32) {
    %c0_i32 = arith.constant 0 : i32
    %c0_i32_0 = arith.constant 0 : i32
    %c0_i32_1 = arith.constant 0 : i32
    return %arg0, %arg1, %c0_i32, %c0_i32_0 : i32, i32, i32, i32
  }
  func.func @transform_16(%arg0: i32, %arg1: i32) -> (i32, i32, i32) {
    %c0_i32 = arith.constant 0 : i32
    %c0_i32_0 = arith.constant 0 : i32
    %c0_i32_1 = arith.constant 0 : i32
    return %arg0, %c0_i32, %c0_i32_0 : i32, i32, i32
  }
  func.func @transform_17(%arg0: i32, %arg1: i32) -> (i32, i32, i32) {
    %c0_i32 = arith.constant 0 : i32
    %c0_i32_0 = arith.constant 0 : i32
    %c0_i32_1 = arith.constant 0 : i32
    return %arg0, %c0_i32, %c0_i32_0 : i32, i32, i32
  }
  func.func @transform_18(%arg0: i32, %arg1: i32) -> (i32, i32, i32, i32) {
    %c0_i32 = arith.constant 0 : i32
    %c0_i32_0 = arith.constant 0 : i32
    %c0_i32_1 = arith.constant 0 : i32
    %c0_i32_2 = arith.constant 0 : i32
    return %arg0, %c0_i32, %c0_i32_0, %c0_i32_1 : i32, i32, i32, i32
  }
}

</mosaic_0001>

<bundles_post_ra>
// kernel: acl_forward.2
= control target key start
LH: loop header
LB: loop body
LE: loop exit
PB: predicated region body
PF: predicated region fallthrough
CT: control target
= control target key end

     0   :  { %s3899_s0 = inlined_call_operand.vmem [shape: f32[6,2,8,32], index: 0, kind: input, shape index: {}]   ;;  %s3900_s1 = inlined_call_operand.vmem [shape: f32[6,2,8,32], index: 1, kind: input, shape index: {}]   ;;  %s3901_s2 = inlined_call_operand.vmem [shape: f32[8,32], index: 2, kind: input, shape index: {}]   ;;  %s3902_s3 = inlined_call_operand.vmem [shape: f32[6,3,1,32], index: 3, kind: input, shape index: {}]   ;;  %s3903_s4 = inlined_call_operand.vmem [shape: f32[6,3,1,32], index: 4, kind: input, shape index: {}]   ;;  %s3904_s5 = inlined_call_operand.vmem [shape: bf16[6,3,32,32], index: 5, kind: input, shape index: {}]   ;;  %s3905_s6 = inlined_call_operand.vmem [shape: f32[6,3,1,32], index: 6, kind: input, shape index: {}]   ;;  %s3906_s7 = inlined_call_operand.vmem [shape: bf16[6,3,32,64], index: 7, kind: input, shape index: {}]   ;;  %s3907_s8 = inlined_call_operand.vmem [shape: f32[6,3,1,64], index: 8, kind: input, shape index: {}]   ;;  %s3908_s9 = inlined_call_operand.vmem [shape: bf16[6,3,32,32], index: 9, kind: input, shape index: {}]   ;;  %s3909_s10 = inlined_call_operand.vmem [shape: f32[6,3,1,32], index: 10, kind: input, shape index: {}]   ;;  %s3910_s11 = inlined_call_operand.hbm [shape: f32[6,3,1,32], index: 11, kind: input, shape index: {}]   ;;  %s3911_s12 = inlined_call_operand.hbm [shape: f32[6,3,1,32], index: 12, kind: input, shape index: {}]   ;;  %s3912_s13 = inlined_call_operand.hbm [shape: bf16[6,3,32,128], index: 13, kind: input, shape index: {}]   ;;  %s3913_s14 = inlined_call_operand.hbm [shape: f32[6,3,1,128], index: 14, kind: input, shape index: {}]   ;;  %s3914_s15 = inlined_call_operand.vmem [shape: bf16[6,3,128,32], index: 15, kind: input, shape index: {}]   ;;  %s3915_s16 = inlined_call_operand.hbm [shape: f32[6,3,1,32], index: 16, kind: input, shape index: {}]   ;;  %s3916_s17 = inlined_call_operand.vmem [shape: f32[6,1,32], index: 17, kind: input, shape index: {}]   ;;  %s3917_s18 = inlined_call_operand.hbm [shape: f32[6,1,32], index: 18, kind: input, shape index: {}]   ;;  %s3918_s19 = inlined_call_operand.vmem [shape: f32[6,2,8,32], index: 19, kind: output, shape index: {}]  }
   0x1   :  { %3932 = sst [smem:[#allocation33_spill]] %s3899_s0 }
   0x2   :  { %3933 = sst [smem:[#allocation34_spill]] %s3900_s1 }
   0x3   :  { %3934 = sst [smem:[#allocation35_spill]] %s3901_s2 }
   0x4   :  { %3935 = sst [smem:[#allocation36_spill]] %s3902_s3 }
   0x5   :  { %3936 = sst [smem:[#allocation37_spill]] %s3903_s4 }
   0x6   :  { %3937 = sst [smem:[#allocation38_spill]] %s3904_s5 }
   0x7   :  { %3938 = sst [smem:[#allocation39_spill]] %s3905_s6 }
   0x8   :  { %3939 = sst [smem:[#allocation40_spill]] %s3906_s7 }
   0x9   :  { %3940 = sst [smem:[#allocation41_spill]] %s3907_s8 }
   0xa   :  { %3941 = sst [smem:[#allocation42_spill]] %s3908_s9 }
   0xb   :  { %3942 = sst [smem:[#allocation43_spill]] %s3909_s10 }
   0xc   :  { %3943 = sst [smem:[#allocation44_spill]] %s3910_s11 }
   0xd   :  { %3944 = sst [smem:[#allocation45_spill]] %s3911_s12 }
   0xe   :  { %3945 = sst [smem:[#allocation46_spill]] %s3912_s13 }
   0xf   :  { %3946 = sst [smem:[#allocation47_spill]] %s3913_s14 }
  0x10   :  { %3947 = sst [smem:[#allocation48_spill]] %s3914_s15 }
  0x11   :  { %3948 = sst [smem:[#allocation49_spill]] %s3915_s16 }
  0x12   :  { %3949 = sst [smem:[#allocation50_spill]] %s3916_s17 }
  0x13   :  { %3950 = sst [smem:[#allocation51_spill]] %s3917_s18 }
  0x14   :  { %3951 = sst [smem:[#allocation52_spill]] %s3918_s19 }
  0x15   :  { %24 = vsyncpa [#allocation5], 0 }
  0x16   :  { %26 = vsyncpa [#allocation5 + $0x1], 0 }
  0x17   :  { %27 = vsyncpa [#allocation7], 0 }
  0x18   :  { %29 = vsyncpa [#allocation7 + $0x1], 0 }
  0x19   :  { %30 = vsyncpa [#allocation10], 0 }
  0x1a   :  { %32 = vsyncpa [#allocation10 + $0x1], 0 }
  0x1b   :  { %33 = vsyncpa [#allocation13], 0 }
  0x1c   :  { %35 = vsyncpa [#allocation13 + $0x1], 0  ;;  %s3341_s0 = smov 0   ;;  %s3343_s30 = smov 0  }
  0x1d   :  { %s3345_s20 = smov 0   ;;  %s3347_s21 = smov 0  }
  0x1e   :  { %s3349_s1 = smov 0   ;;  %s3351_s22 = smov 0  }
  0x1f   :  { %s3353_s2 = smov 0   ;;  %s3355_s23 = smov 0  }
  0x20   :  { %s3357_s24 = smov 0   ;;  %s3359_s25 = smov 0  }
  0x21   :  { %s3361_s3 = smov 0  }
  0x22 LB: > { %3952 = sst [smem:[#allocation18_spill]] %s3193_s30  ;;  %s50_s26 = sadd.s32 1, %s3221_s24  ;;  %s3229_s3 = sphi %s3361_s3, %s41_s3   ;;  %s3225_s25 = sphi %s3359_s25, %s4020_s25   ;;  %s3221_s24 = sphi %s3357_s24, %s4019_s24   ;;  %s3217_s23 = sphi %s3355_s23, %s4018_s23   ;;  %s3213_s2 = sphi %s3353_s2, %s4017_s2   ;;  %s3209_s22 = sphi %s3351_s22, %s4016_s22   ;;  %s3205_s1 = sphi %s3349_s1, %s4015_s1   ;;  %s3201_s21 = sphi %s3347_s21, %s4014_s21   ;;  %s3197_s20 = sphi %s3345_s20, %s4013_s20   ;;  %s3193_s30 = sphi %s3343_s30, %s4012_s30   ;;  %s3189_s0 = sphi %s3341_s0, %s4011_s0  }
  0x23   : > { %3953 = sst [smem:[#allocation19_spill]] %s3197_s20  ;;  %s53_s27 = sadd.s32 1, %s3225_s25 }
  0x24   : > { %3954 = sst [smem:[#allocation20_spill]] %s3205_s1  ;;  %p51_p0 = scmp.ge.s32.totalorder %s50_s26, 3 }
  0x25   : > { %3955 = sst [smem:[#allocation21_spill]] %s3209_s22  ;;  %s359_s28 = sadd.s32 1, %s3209_s22 }
  0x26   : > { %3956 = sst [smem:[#allocation22_spill]] %s3213_s2  ;;  %p366_p1 = scmp.ne.s32.totalorder %s3209_s22, %s3205_s1 }
  0x27   : > { %3957 = sst [smem:[#allocation23_spill]] %s3217_s23  ;;  %p367_p2 = scmp.eq.s32.totalorder %s3229_s3, 0 }
  0x28   : > { %3958 = sst [smem:[#allocation24_spill]] %s3221_s24  ;;  %s4022_s26 = smov (%p51_p0, %s50_s26), 0 }
  0x29   : > { %3959 = sst [smem:[#allocation25_spill]] %s3225_s25  ;;  %s4024_s27 = smov (!%p51_p0, %s53_s27), %s3225_s25 }
  0x2a   : > { %3960 = sst [smem:[#allocation26_spill]] %s3229_s3  ;;  %s355_s29 = ssub.s32 %s3221_s24, %s4022_s26 }
  0x2b   : > { %3961 = sst [smem:[#allocation27_spill]] %s4022_s26  ;;  %p368_p3 = por %p367_p2, %p366_p1 }
  0x2c   : > { %p55_p4 = scmp.ge.s32.totalorder %s4024_s27, 6  ;;  %p2752_p5 = scmp.lt.s32.totalorder %s3229_s3, 18 }
  0x2d   : > { %s3411_s19 = sand.u32 1, %s3209_s22   ;;  %s2713_s15 = smul.u32 3, %s3225_s25 }
  0x2e   : > { %s4026_s27 = smov (%p55_p4, %s4024_s27), 0  ;;  %p3418_p6 = pnand %p2752_p5, %p368_p3 }
  0x2f   : > { %3962 = sst [smem:[#allocation28_spill]] %s4026_s27  ;;  %s3424_s26 = ssub.s32 %s3225_s25, %s4026_s27 }
  0x30   : > { %s738_s9 = sand.u32 1, %s3229_s3   ;;  %s356_s7 = sor.u32 %s355_s29, %s3424_s26 }
  0x31   : > { %s3429_s5 = sadd.s32 %s3221_s24, %s2713_s15  ;;  %p357_p7 = scmp.eq.s32.totalorder %s356_s7, 0 }
  0x32   : > { %s3965_s12 = sld [smem:[#allocation45_spill]]  ;;  %s741_s2 = scalar_lea.vmem [#allocation6], %s3411_s19 }
  0x33   : > { %s3432_s10 = scalar_select %p357_p7, %s3209_s22, %s359_s28  }
  0x34   : > { %s750_s23 = sshll.u32 %s741_s2, 4  ;;  %p2582_p8 = scmp.ge.s32.totalorder %s3229_s3, 1  ;;  %s751_s23 = int_to_ptr.vmem [resolvable:$true] %s750_s23 }
  0x35   : > { %3964 = sst [smem:[#allocation29_spill]] %s3432_s10  ;;  %s3440_s15 = scalar_lea.sflag [#allocation7], %s738_s9 }
  0x36   : > { %p852_p9 = scmp.lt.s32.totalorder %s3229_s3, 19  ;;  %s3966_s14 = sld [smem:[#allocation47_spill]] }
  0x37   : > { %s784_s2 = scalar_lea.vmem [#allocation9], %s3411_s19  ;;  %s3968_s11 = sld [smem:[#allocation44_spill]] }
  0x38   : > { %s746_s4 = scalar_lea.hbm %s3965_s12, %s3429_s5  ;;  %p3450_p10 = pnand %p2582_p8, %p852_p9 }
  0x39   : > { %s748_s27 = sshll.u32 %s746_s4, 4  ;;  %s793_s29 = sshll.u32 %s784_s2, 4  ;;  %s749_s27 = int_to_ptr.hbm [resolvable:$true] %s748_s27  ;;  %s794_s29 = int_to_ptr.vmem [resolvable:$true] %s793_s29 }
  0x3a   : > { %2739 = dma.hbm_to_vmem [thread:$0]  (!%p3418_p6), %s749_s27, 16, %s751_s23, %s3440_s15  }
  0x3b   : > { %s3455_s23 = scalar_lea.sflag [#allocation10], %s738_s9  ;;  %s2579_s9 = sshll.u32 %s3411_s19, 4 }
  0x3c   : > { %s789_s6 = scalar_lea.hbm %s3966_s14, %s3429_s5  ;;  %s722_s14 = scalar_lea.vmem [#allocation4], %s3411_s19 }
  0x3d   : > { %s791_s4 = sshll.u32 %s789_s6, 4  ;;  %s727_s28 = scalar_lea.hbm %s3968_s11, %s3429_s5  ;;  %s792_s4 = int_to_ptr.hbm [resolvable:$true] %s791_s4 }
  0x3e   : > { %2745 = dma.hbm_to_vmem [thread:$0]  (!%p3418_p6), %s792_s4, 16, %s794_s29, %s3455_s23  }
  0x3f   : > { %s729_s12 = sshll.u32 %s727_s28, 4  ;;  %s731_s10 = sshll.u32 %s722_s14, 4  ;;  %s730_s12 = int_to_ptr.hbm [resolvable:$true] %s729_s12  ;;  %s732_s10 = int_to_ptr.vmem [resolvable:$true] %s731_s10 }
  0x40   : > { %s720_s6 = scalar_lea.sflag [#allocation5], %s3411_s19  ;;  %s2580_s2 = sshll.u32 %s3221_s24, 2 }
  0x41   : > { %2736 = dma.hbm_to_vmem [thread:$0]  (!%p3418_p6), %s730_s12, 16, %s732_s10, %s720_s6  }
  0x42   : > { %s2715_s22 = smul.u32 12, %s3225_s25  ;;  %s761_s4 = scalar_lea.vmem [#allocation8], %s2579_s9 }
  0x43   : > { %s771_s29 = sshll.u32 %s761_s4, 4  ;;  %s3969_s13 = sld [smem:[#allocation46_spill]]  ;;  %s772_s29 = int_to_ptr.vmem [resolvable:$true] %s771_s29 }
  0x44   : > { %s766_s27 = sadd.s32 %s2715_s22, %s2580_s2  ;;  %s3970_s16 = sld [smem:[#allocation49_spill]] }
  0x45   : > { %s2581_s14 = sshll.u32 %s766_s27, 2  ;;  %s3231_s2 = smov 64  }
  0x46   : > { %s3232_s4 = smov 4   ;;  %s815_s27 = scalar_lea.vmem [#allocation11], %s3411_s19 }
  0x47   : > { %p372_p11 = scmp.ne.s32.totalorder %s3205_s1, %s3201_s21  ;;  %p549_p13 = scmp.eq.s32.totalorder %s3424_s26, 0 }
  0x48   : > { %s551_s11 = sadd.s32 1, %s3197_s20  ;;  %p558_p1 = scmp.ne.s32.totalorder %s3197_s20, %s3193_s30 }
  0x49   : > { %s768_s10 = scalar_lea.hbm %s3969_s13, %s2581_s14  ;;  %s824_s14 = sshll.u32 %s815_s27, 4  ;;  %s825_s14 = int_to_ptr.vmem [resolvable:$true] %s824_s14 }
  0x4a   : > { %s769_s12 = sshll.u32 %s768_s10, 4  ;;  %s820_s9 = scalar_lea.hbm %s3970_s16, %s3429_s5  ;;  %s770_s12 = int_to_ptr.hbm [resolvable:$true] %s769_s12 }
  0x4b   : > { %s822_s22 = sshll.u32 %s820_s9, 4  ;;  %s2575_s5 = sadd.s32 4294967295, %s3229_s3   ;;  %s823_s22 = int_to_ptr.hbm [resolvable:$true] %s822_s22 }
  0x4c   : > { %2742 = dma.hbm_to_vmem [thread:$0]  (!%p3418_p6), %s770_s12, 256, %s772_s29, %s3440_s15, %s3231_s2, %s3231_s2, %s3232_s4  }
  0x4d   : > { %2748 = dma.hbm_to_vmem [thread:$0]  (!%p3418_p6), %s823_s22, 16, %s825_s14, %s3455_s23  }
  0x4e   : > { %p373_p12 = scmp.eq.s32.totalorder %s2575_s5, 0  ;;  %p560_p3 = por %p558_p1, %p367_p2 }
  0x4f   : > { %s3497_s15 = scalar_select %p549_p13, %s3197_s20, %s551_s11  }
  0x50   : > { %p3490_p0 = por %p373_p12, %p372_p11  ;;  %p564_p4 = scmp.ne.s32.totalorder %s3193_s30, %s3189_s0 }
  0x51   : > { %3972 = sst [smem:[#allocation30_spill]] %s3497_s15  ;;  %s837_s19 = sand.u32 1, %s3197_s20  }
  0x52   : > { %s3973_s18 = sld [smem:[#allocation51_spill]]  ;;  %p3508_p6 = por %p564_p4, %p373_p12 }
  0x53   : > { %s840_s28 = scalar_lea.vmem [#allocation12], %s837_s19  ;;  %p2749_p7 = pnand %p2752_p5, %p560_p3 }
  0x54   : > { %s847_s10 = sshll.u32 %s840_s28, 4  ;;  %s838_s12 = scalar_lea.sflag [#allocation13], %s837_s19  ;;  %s848_s10 = int_to_ptr.vmem [resolvable:$true] %s847_s10 }
  0x56   : > { %856 = sbr.rel (%p3450_p10) target bundleno = 2353 (0x931), region = 96 }
  0x58   : > { %s843_s23 = scalar_lea.hbm %s3973_s18, %s3225_s25 }
  0x59   : > { %s845_s26 = sshll.u32 %s843_s23, 4  ;;  %s846_s26 = int_to_ptr.hbm [resolvable:$true] %s845_s26 }
  0x5a   : > { %2751 = dma.hbm_to_vmem [thread:$0]  (!%p2749_p7), %s846_s26, 16, %s848_s10, %s838_s12  }
  0x5b   : > { %s3517_s0 = sand.u32 1, %s3205_s1  }
  0x5c   : > { %3975 = sst [smem:[#allocation31_spill]] %s3517_s0  ;;  %s859_s6 = scalar_lea.sflag [#allocation5], %s3517_s0 }
  0x5d   : > { %3172 = dma.done.wait (%p3490_p0), %s859_s6, 16  }
  0x5e   : > { %3174 = vsyncadd (%p3490_p0), %s859_s6, 4294967280  ;;  %s867_s22 = sand.u32 1, %s2575_s5  }
  0x5f   : > { %s868_s2 = scalar_lea.sflag [#allocation7], %s867_s22 }
  0x60   : > { %3176 = dma.done.wait (%p3490_p0), %s868_s2, 272  }
  0x61   : > { %3178 = vsyncadd (%p3490_p0), %s868_s2, 4294967024  ;;  %s2583_s8 = sshll.u32 %s3517_s0, 4  ;;  %s887_s14 = scalar_lea.sflag [#allocation10], %s867_s22 }
  0x62   : > { %s3531_s27 = scalar_lea.vmem [#allocation8], %s2583_s8 }
  0x63   : > { %3180 = dma.done.wait (%p3490_p0), %s887_s14, 32  }
  0x64   : > { %3182 = vsyncadd (%p3490_p0), %s887_s14, 4294967264  ;;  %s904_s5 = sand.u32 1, %s3193_s30  }
  0x65   : > { %s905_s29 = scalar_lea.sflag [#allocation13], %s904_s5  ;;  %s3540_s17 = scalar_lea.vmem [#allocation12], %s904_s5 }
  0x66   : > { %3976 = sst [smem:[#allocation32_spill]] %s3540_s17 }
  0x67   : > { %3184 = dma.done.wait (%p3508_p6), %s905_s29, 16  }
  0x68   : > { %3186 = vsyncadd (%p3508_p6), %s905_s29, 4294967280  ;;  %s3977_s23 = sld [smem:[#allocation23_spill]] }
  0x69   : > { %s3978_s26 = sld [smem:[#allocation22_spill]] }
  0x6a   : > { %s3979_s22 = sld [smem:[#allocation33_spill]] }
  0x6b   : > { %s3980_s14 = sld [smem:[#allocation34_spill]] }
  0x6c   : > { %s3986_s12 = sld [smem:[#allocation38_spill]] }
  0x6d   : > { %s3987_s8 = sld [smem:[#allocation40_spill]] }
  0x6e   : > { %p1067_p2 = scmp.lt.s32.totalorder %s3977_s23, 5  ;;  %s3988_s25 = sld [smem:[#allocation42_spill]] }
  0x6f   : > { %p1079_p5 = scmp.lt.s32.totalorder %s3978_s26, 2  ;;  %s3990_s16 = sld [smem:[#allocation48_spill]] }
  0x70   : > { %s4028_s23 = smov (!%p1067_p2, %s3977_s23), 5  ;;  %s3991_s2 = sld [smem:[#allocation52_spill]] }
  0x71   : > { %s1080_s7 = scalar_select %p1079_p5, %s3978_s26, 2 }
  0x72   : > { %s2694_s28 = sshll.u32 %s4028_s23, 4  ;;  %s2718_s10 = smul.u32 3, %s4028_s23 }
  0x73   : > { %s1071_s21 = scalar_lea.vmem %s3979_s22, %s2694_s28  ;;  %s1076_s5 = scalar_lea.vmem %s3980_s14, %s2694_s28 }
  0x74   : > { %s3560_s29 = sadd.s32 %s2718_s10, %s1080_s7  ;;  %s2588_s19 = sshll.u32 %s1080_s7, 2 }
  0x75   : > { %s2719_s18 = smul.u32 12, %s4028_s23  ;;  %s3983_s10 = sld [smem:[#allocation39_spill]] }
  0x76   : > { %s2594_s11 = sshll.u32 %s1080_s7, 4  ;;  %s2720_s13 = smul.u32 48, %s4028_s23 }
  0x77   : > { %s1097_s4 = sadd.s32 %s2719_s18, %s2588_s19  ;;  %s3989_s19 = sld [smem:[#allocation50_spill]] }
  0x78   : > { %s2589_s9 = sshll.u32 %s1097_s4, 2  ;;  %s1145_s30 = sadd.s32 %s2720_s13, %s2594_s11 }
  0x79   : > { %s3587_s6 = scalar_lea.vmem %s3986_s12, %s2589_s9  ;;  %s3597_s15 = scalar_lea.vmem %s3988_s25, %s2589_s9 }
  0x7a   : > { %s2595_s18 = sshll.u32 %s1145_s30, 2  ;;  %p2598_p8 = scmp.ne.s32.totalorder %s3978_s26, 0 }
  0x7b   : > { %s1106_s14 = scalar_lea.vmem %s3983_s10, %s3560_s29  ;;  %s3592_s10 = scalar_lea.vmem %s3987_s8, %s2589_s9 }
  0x7c   : > { %s3606_s12 = scalar_lea.vmem %s3990_s16, %s2595_s18  ;;  %s3611_s8 = scalar_lea.vmem %s3991_s2, %s2694_s28 }
  0x7d   : > { %s1150_s7 = scalar_lea.vmem %s3989_s19, %s4028_s23  ;;  %1160 = sbr.rel (%p2598_p8) target bundleno = 139 (0x8b), region = 124 }
  0x7e   : > { %s3992_s11 = sld [smem:[#allocation35_spill]] (!%p2598_p8) }
  0x82   : > { %v1162_v1 = vld [vmem:[%s1071_s21] sm:$0xff]  ;;  %v1163_v2 = vld [vmem:[%s1071_s21 + $0x8] sm:$0xff]  ;;  %vm1168_vm0 = vcmask 261120  }
  0x83   : > { %v1164_v3 = vmul.f32 5.656854, %v1162_v1  ;;  %v1165_v4 = vmul.f32 5.656854, %v1163_v2  ;;  %v1171_v5 = vld [vmem:[%s1076_s5] sm:$0xff]  ;;  %v1172_v6 = vld [vmem:[%s1076_s5 + $0x8] sm:$0xff] }
  0x84   : > { %v1161_v0 = vld [vmem:[%s3992_s11] sm:$0xff]  ;;  %v1173_v7 = vmul.f32 5.656854, %v1171_v5  ;;  %v1174_v8 = vmul.f32 5.656854, %v1172_v6 }
  0x85   : > { %v1166_v9 = vadd.f32 %v1164_v3, %v1161_v0  ;;  %v1167_v10 = vadd.f32 %v1165_v4, %v1161_v0 }
  0x86   : > { %v1175_v11 = vadd.f32 %v1173_v7, %v1161_v0  ;;  %v1176_v12 = vadd.f32 %v1174_v8, %v1161_v0 }
  0x87   : > { %1169 = vst.msk [vmem:[#allocation2] sm:$0xff] %vm1168_vm0, %v1166_v9 }
  0x88   : > { %1170 = vst.msk [vmem:[#allocation2 + $0x8] sm:$0xff] %vm1168_vm0, %v1167_v10 }
  0x89   : > { %1177 = vst.msk [vmem:[#allocation3] sm:$0xff] %vm1168_vm0, %v1175_v11 }
  0x8a   : > { %1178 = vst.msk [vmem:[#allocation3 + $0x8] sm:$0xff] %vm1168_vm0, %v1176_v12 }
  0x8b PF: > { %vm1183_vm1 = vcmask 261120   ;;  %v3233_v21 = vmov 32.0   ;;  %v2698_v48 = vld [vmem:[%s3587_s6 + $0x8] sm:$0xff]  ;;  %v2697_v52 = vld [vmem:[%s3587_s6] sm:$0xff]  ;;  %s3993_s28 = sld [smem:[#allocation36_spill]]  ;;  %s3234_s18 = smov 120  }
  0x8c   : > { %2895 = vrcp.f32 %v3233_v21  ;;  %1325 = vmatpush.bf16.msra.mxu1 %v2698_v48  ;;  %v2700_v58 = vld [vmem:[%s3592_s10 + $0x8] sm:$0xff]  ;;  %v2699_v61 = vld [vmem:[%s3592_s10] sm:$0xff]  ;;  %s3995_s10 = sld [smem:[#allocation37_spill]]  ;;  %s3235_s20 = smov 112   ;;  %vm1399_vm15 = vcmask 64512   ;;  %vm1914_vm0 = vcmask 130048  }
  0x8d   : > { %s3998_s4 = sld [smem:[#allocation41_spill]]  ;;  %s3237_s16 = smov 96  }
  0x8e   : > { %v3617_v14 = vld [vmem:[#allocation2] sm:$0xff]  ;;  %s3238_s22 = smov 16   ;;  %s3239_s2 = smov 8  }
  0x8f   : > { %v1184_v16 = vsel %vm1183_vm1, %v3617_v14, 0.0  ;;  %v3622_v18 = vld [vmem:[#allocation2 + $0x8] sm:$0xff]  ;;  %s3240_s9 = smov 24   ;;  %s4000_s11 = sld [smem:[#allocation43_spill]] }
  0x90   : > { %v1245_v13 = vld [vmem:[#allocation3] sm:$0xff]  ;;  %1185 = vadd.xlane.f32.xlu0 %v1184_v16  ;;  %v1187_v20 = vsel %vm1183_vm1, %v3622_v18, 0.0  ;;  %1326 = vmatpush.bf16.msra.mxu1 %v2697_v52 }
  0x91   : > { %v1247_v15 = vsel %vm1183_vm1, %v1245_v13, 0.0  ;;  %v1246_v17 = vld [vmem:[#allocation3 + $0x8] sm:$0xff]  ;;  %s3994_s21 = scalar_lea.vmem %s3993_s28, %s3560_s29 }
  0x92   : > { %1248 = vadd.xlane.f32.xlu1 %v1247_v15  ;;  %v1250_v19 = vsel %vm1183_vm1, %v1246_v17, 0.0  ;;  %v2896_v22 = vpop.eup %2895  ;;  %s3996_s24 = scalar_lea.vmem %s3995_s10, %s3560_s29 }
  0x93   : > { %v1191_v23 = vmul.f32 32.0, %v2896_v22  ;;  %vm1195_vm2 = vweird.f32 %v2896_v22  ;;  %s3999_s0 = scalar_lea.vmem %s3998_s4, %s3560_s29 }
  0x94   : > { %1363 = vmatpush.bf16.msrb.mxu1 %v2700_v58 }
  0x95   : > { %v1192_v24 = vsub.f32 1.0, %v1191_v23  ;;  %s4001_s17 = scalar_lea.vmem %s4000_s11, %s3560_s29  ;;  %s4002_s29 = sld [smem:[#allocation31_spill]] }
  0x97   : > { %v1193_v25 = vmul.f32 %v2896_v22, %v1192_v24 }
  0x98   : > { %1188 = vadd.xlane.f32.xlu0 %v1187_v20  ;;  %1364 = vmatpush.bf16.msrb.mxu1 %v2699_v61 }
  0x99   : > { %v1194_v26 = vadd.f32 %v2896_v22, %v1193_v25 }
  0x9a   : > { %1251 = vadd.xlane.f32.xlu1 %v1250_v19 }
  0x9b   : > { %v3627_v27 = vsel %vm1195_vm2, %v2896_v22, %v1194_v26  ;;  %v2886_v22 = vld [vmem:[%s3994_s21] ss:$0 sm:$0xff]  ;;  %vm1917_vm2 = vcmask 195584   ;;  %s4004_s26 = scalar_lea.vmem [#allocation6], %s4002_s29  ;;  %s4005_s28 = scalar_lea.vmem [#allocation9], %s4002_s29 }
  0x9c   : > { %s4006_s21 = scalar_lea.vmem [#allocation11], %s4002_s29 }
 0x103   : > { %v1186_v29 = vpop.xlane.xlu0 %1185 }
 0x104   : > { %v1197_v31 = vmul.f32 %v3627_v27, %v1186_v29 }
 0x105   : > { %v1249_v28 = vpop.xlane.xlu1 %1248 }
 0x106   : > { %v1253_v30 = vmul.f32 %v1249_v28, %v3627_v27  ;;  %v3634_v33 = vsub.f32 %v3617_v14, %v1197_v31 }
 0x108   : > { %v3631_v32 = vsub.f32 %v1245_v13, %v1253_v30  ;;  %v1201_v35 = vmul.f32 %v3634_v33, %v3634_v33  ;;  %v2887_v30 = vld [vmem:[%s3996_s24] ss:$0 sm:$0xff] }
 0x10a   : > { %v1257_v34 = vmul.f32 %v3631_v32, %v3631_v32  ;;  %v1203_v37 = vsel %vm1183_vm1, %v1201_v35, 0.0 }
 0x10b   : > { %1204 = vadd.xlane.f32.xlu2 %v1203_v37  ;;  %v1189_v39 = vpop.xlane.xlu0 %1188 }
 0x10c   : > { %v1259_v36 = vsel %vm1183_vm1, %v1257_v34, 0.0  ;;  %v1198_v41 = vmul.f32 %v3627_v27, %v1189_v39 }
 0x10d   : > { %v1252_v38 = vpop.xlane.xlu1 %1251  ;;  %1260 = vadd.xlane.f32.xlu0 %v1259_v36 }
 0x10e   : > { %v1254_v40 = vmul.f32 %v1252_v38, %v3627_v27  ;;  %v3647_v43 = vsub.f32 %v3622_v18, %v1198_v41 }
 0x110   : > { %v3644_v42 = vsub.f32 %v1246_v17, %v1254_v40  ;;  %v1202_v45 = vmul.f32 %v3647_v43, %v3647_v43 }
 0x112   : > { %v1258_v44 = vmul.f32 %v3644_v42, %v3644_v42  ;;  %v1206_v47 = vsel %vm1183_vm1, %v1202_v45, 0.0 }
 0x113   : > { %1207 = vadd.xlane.f32.xlu2 %v1206_v47 }
 0x114   : > { %v1262_v46 = vsel %vm1183_vm1, %v1258_v44, 0.0 }
 0x115   : > { %1263 = vadd.xlane.f32.xlu1 %v1262_v46 }
 0x17e   : > { %v1205_v49 = vpop.xlane.xlu2 %1204 }
 0x17f   : > { %v1209_v50 = vmul.f32 %v1205_v49, %v3627_v27  ;;  %v2888_v49 = vld [vmem:[%s1106_s14] ss:$0 sm:$0xff]  ;;  %s3236_s14 = smov 104  }
 0x180   : > { %v1261_v51 = vpop.xlane.xlu0 %1260 }
 0x181   : > { %v1211_v53 = vadd.f32 1e-05, %v1209_v50  ;;  %v1265_v54 = vmul.f32 %v1261_v51, %v3627_v27 }
 0x183   : > { %2897 = vrsqrt.f32 %v1211_v53  ;;  %v1267_v55 = vadd.f32 1e-05, %v1265_v54  ;;  %vm1219_vm4 = vweird.f32 %v1211_v53 }
 0x185   : > { %2899 = vrsqrt.f32 %v1267_v55  ;;  %vm1275_vm11 = vweird.f32 %v1267_v55 }
 0x186   : > { %v1208_v57 = vpop.xlane.xlu2 %1207 }
 0x187   : > { %v1210_v60 = vmul.f32 %v1208_v57, %v3627_v27 }
 0x188   : > { %v1264_v56 = vpop.xlane.xlu1 %1263 }
 0x189   : > { %v1266_v59 = vmul.f32 %v1264_v56, %v3627_v27  ;;  %v2898_v62 = vpop.eup %2897  ;;  %v1212_v0 = vadd.f32 1e-05, %v1210_v60 }
 0x18a   : > { %v1214_v1 = vmul.f32 %v2898_v62, %v1211_v53  ;;  %vm1220_vm3 = vweird.f32 %v2898_v62 }
 0x18b   : > { %v1268_v63 = vadd.f32 1e-05, %v1266_v59  ;;  %v2900_v4 = vpop.eup %2899  ;;  %vm1221_vm5 = vmor %vm1219_vm4, %vm1220_vm3  ;;  %vm1229_vm7 = vweird.f32 %v1212_v0 }
 0x18c   : > { %v1215_v2 = vmul.f32 %v2898_v62, %v1214_v1  ;;  %v1270_v10 = vmul.f32 %v2900_v4, %v1267_v55  ;;  %vm1276_vm12 = vweird.f32 %v2900_v4 }
 0x18d   : > { %2901 = vrsqrt.f32 %v1268_v63  ;;  %vm1285_vm9 = vweird.f32 %v1268_v63  ;;  %vm1277_vm14 = vmor %vm1275_vm11, %vm1276_vm12 }
 0x18e   : > { %2903 = vrsqrt.f32 %v1212_v0  ;;  %v1216_v3 = vmul.f32 0.5, %v1215_v2  ;;  %v1271_v16 = vmul.f32 %v2900_v4, %v1270_v10 }
 0x190   : > { %v1217_v5 = vsub.f32 1.5, %v1216_v3  ;;  %v1272_v23 = vmul.f32 0.5, %v1271_v16 }
 0x192   : > { %v1218_v9 = vmul.f32 %v2898_v62, %v1217_v5  ;;  %v1273_v31 = vsub.f32 1.5, %v1272_v23 }
 0x193   : > { %v2902_v6 = vpop.eup %2901 }
 0x194   : > { %v2904_v7 = vpop.eup %2903  ;;  %v1280_v8 = vmul.f32 %v2902_v6, %v1268_v63  ;;  %v1222_v15 = vsel %vm1221_vm5, %v2898_v62, %v1218_v9  ;;  %vm1286_vm10 = vweird.f32 %v2902_v6  ;;  %v1274_v37 = vmul.f32 %v2900_v4, %v1273_v31 }
 0x195   : > { %v1224_v11 = vmul.f32 %v2904_v7, %v1212_v0  ;;  %vm1230_vm6 = vweird.f32 %v2904_v7  ;;  %v1233_v21 = vmul.f32 %v1222_v15, %v3634_v33  ;;  %vm1287_vm13 = vmor %vm1285_vm9, %vm1286_vm10 }
 0x196   : > { %v1281_v12 = vmul.f32 %v2902_v6, %v1280_v8  ;;  %vm1231_vm8 = vmor %vm1229_vm7, %vm1230_vm6  ;;  %v1278_v40 = vsel %vm1277_vm14, %v2900_v4, %v1274_v37 }
 0x197   : > { %v1225_v13 = vmul.f32 %v2904_v7, %v1224_v11  ;;  %v1238_v29 = vmul.f32 %v2886_v22, %v1233_v21 }
 0x198   : > { %v1282_v19 = vmul.f32 0.5, %v1281_v12 }
 0x199   : > { %v1226_v17 = vmul.f32 0.5, %v1225_v13  ;;  %v1243_v35 = vadd.f32 %v2887_v30, %v1238_v29 }
 0x19a   : > { %v1283_v25 = vsub.f32 1.5, %v1282_v19 }
 0x19b   : > { %v1227_v20 = vsub.f32 1.5, %v1226_v17 }
 0x19c   : > { %v1284_v34 = vmul.f32 %v2902_v6, %v1283_v25 }
 0x19d   : > { %v1228_v24 = vmul.f32 %v2904_v7, %v1227_v20 }
 0x19e   : > { %v1288_v39 = vsel %vm1287_vm13, %v2902_v6, %v1284_v34 }
 0x19f   : > { %v1232_v26 = vsel %vm1231_vm8, %v2904_v7, %v1228_v24  ;;  %v1290_v41 = vmul.f32 %v1288_v39, %v3644_v42 }
 0x1a0   : > { %v1234_v28 = vmul.f32 %v1232_v26, %v3647_v43  ;;  %v1289_v43 = vmul.f32 %v1278_v40, %v3631_v32  ;;  %v2889_v32 = vld [vmem:[%s3999_s0] ss:$0 sm:$0xff] }
 0x1a1   : > { %v1292_v44 = vmul.f32 %v2886_v22, %v1290_v41 }
 0x1a2   : > { %v1239_v33 = vmul.f32 %v2886_v22, %v1234_v28  ;;  %v1291_v45 = vmul.f32 %v2886_v22, %v1289_v43 }
 0x1a3   : > { %v1294_v46 = vadd.f32 %v2887_v30, %v1292_v44 }
 0x1a4   : > { %v1244_v36 = vadd.f32 %v2887_v30, %v1239_v33  ;;  %v1293_v47 = vadd.f32 %v2887_v30, %v1291_v45 }
 0x1a6   : > { %v1295_v38 = vpack.c.bf16 %v1244_v36, %v1243_v35  ;;  %v1333_v48 = vpack.c.bf16 %v1294_v46, %v1293_v47 }
 0x1a8   : > { %2607 = vmatmul.msk.bf16.vlgmr.msra.gmra.mxu1 %vm1183_vm1, %v1295_v38 }
 0x1b8   : > { %2616 = vmatmul.msk.bf16.vlgmr.msrb.gmra.mxu1 %vm1183_vm1, %v1333_v48 }
 0x225   : > { %v1328_v50 = vpop.f32.mrf.mxu1 }
 0x226   : > { %v1329_v51 = vadd.f32 %v2888_v49, %v1328_v50 }
 0x228   : > { %1373 = vrot.lane.b32.xlu1 %v1329_v51, %s3234_s18 }
 0x22d   : > { %v1330_v42 = vpop.f32.mrf.mxu1 }
 0x22e   : > { %v1331_v52 = vadd.f32 %v2888_v49, %v1330_v42 }
 0x230   : > { %1375 = vrot.lane.b32.xlu2 %v1331_v52, %s3234_s18  ;;  %1377 = vrot.lane.b32.xlu1 %v1329_v51, %s3235_s20 }
 0x235   : > { %v1366_v53 = vpop.f32.mrf.mxu1 }
 0x236   : > { %v3689_v54 = vadd.f32 %v2889_v32, %v1366_v53 }
 0x238   : > { %1387 = vrot.lane.b32.xlu2 %v3689_v54, %s3234_s18  ;;  %2617 = vmatpush.xpose.msk.msra.mxu2 %vm1399_vm15, %v3689_v54 }
 0x23b   : > { %2618 = vmatmul.msk.f32.vlgmr.msra.gmra.mxu2 %vm1399_vm15, %v1329_v51 }
 0x23d   : > { %v1368_v55 = vpop.f32.mrf.mxu1 }
 0x23e   : > { %v3695_v56 = vadd.f32 %v2889_v32, %v1368_v55 }
 0x240   : > { %1397 = vrot.lane.b32.xlu1 %v3695_v56, %s3236_s14  ;;  %1389 = vrot.lane.b32.xlu0 %v3695_v56, %s3234_s18  ;;  %v2851_v57 = vpack.i.bf16 %v3695_v56, %v3689_v54 }
 0x241   : > { %2619 = vmatpush.xpose.msk.msra.mxu3 %vm1399_vm15, %v3695_v56  ;;  %1393 = vrot.lane.b32.xlu2 %v3695_v56, %s3235_s20 }
 0x244   : > { %2620 = vmatmul.msk.f32.vlgmr.msra.gmra.mxu3 %vm1399_vm15, %v1331_v52 }
 0x248   : > { %1391 = vrot.lane.b32.xlu0 %v3689_v54, %s3235_s20 }
 0x249   : > { %1395 = vrot.lane.b32.xlu2 %v3689_v54, %s3236_s14 }
 0x250   : > { %1379 = vrot.lane.b32.xlu0 %v1331_v52, %s3235_s20 }
 0x251   : > { %1383 = vrot.lane.b32.xlu2 %v1331_v52, %s3236_s14 }
 0x258   : > { %1381 = vrot.lane.b32.xlu0 %v1329_v51, %s3236_s14 }
 0x28a   : > { %v1376_v58 = vpop.permute.xlu2 %1375 }
 0x292   : > { %v3707_v59 = vpop.permute.xlu2 %1387 }
 0x293   : > { %2621 = vmatpush.xpose.msk.msrb.mxu2 %vm1399_vm15, %v3707_v59 }
 0x29a   : > { %v1374_v60 = vpop.permute.xlu1 %1373 }
 0x29b   : > { %v3711_v61 = vpop.permute.xlu2 %1393  ;;  %2622 = vmatmul.msk.f32.vlgmr.msrb.gmra.mxu2 %vm1399_vm15, %v1374_v60 }
 0x2a2   : > { %v1378_v63 = vpop.permute.xlu1 %1377 }
 0x2a3   : > { %v3714_v62 = vpop.permute.xlu2 %1395 }
 0x2a4   : > { %2629 = vmatpush.xpose.msk.msra.mxu0 %vm1399_vm15, %v3714_v62 }
 0x2ab   : > { %v1384_v3 = vpop.permute.xlu2 %1383 }
 0x2b2   : > { %v3718_v0 = vpop.permute.xlu1 %1397  ;;  %v3720_v1 = vpop.permute.xlu0 %1389 }
 0x2b3   : > { %v2856_v2 = vpack.i.bf16 %v3720_v1, %v3707_v59  ;;  %2623 = vmatpush.xpose.msk.msrb.mxu3 %vm1399_vm15, %v3720_v1  ;;  %2631 = vmatpush.xpose.msk.msra.mxu1 %vm1399_vm15, %v3718_v0 }
 0x2b6   : > { %2624 = vmatmul.msk.f32.vlgmr.msrb.gmra.mxu3 %vm1399_vm15, %v1376_v58  ;;  %2632 = vmatmul.msk.f32.vlgmr.msra.gmra.mxu1 %vm1399_vm15, %v1384_v3 }
 0x2b7   : > { %2627 = vmatpush.xpose.msk.msra.mxu3 %vm1399_vm15, %v3711_v61 }
 0x2ba   : > { %v3732_v4 = vpop.permute.xlu0 %1391 }
 0x2bb   : > { %v2861_v5 = vpack.i.bf16 %v3711_v61, %v3732_v4  ;;  %2625 = vmatpush.xpose.msk.msra.mxu2 %vm1399_vm15, %v3732_v4 }
 0x2be   : > { %v1421_v6 = vpop.f32.mrf.mxu2  ;;  %2626 = vmatmul.msk.f32.vlgmr.msra.gmra.mxu2 %vm1399_vm15, %v1378_v63 }
 0x2bf   : > { %v1592_v7 = vsel %vm1399_vm15, %v1421_v6, -inf }
 0x2c0   : > { %1593 = vmax.xlane.f32.xlu1 %v1592_v7 }
 0x2c2   : > { %v1380_v8 = vpop.permute.xlu0 %1379 }
 0x2c3   : > { %2628 = vmatmul.msk.f32.vlgmr.msra.gmra.mxu3 %vm1399_vm15, %v1380_v8 }
 0x2c7   : > { %v1445_v9 = vpop.f32.mrf.mxu3 }
 0x2c8   : > { %v1595_v10 = vsel %vm1399_vm15, %v1445_v9, -inf }
 0x2c9   : > { %1596 = vmax.xlane.f32.xlu0 %v1595_v10 }
 0x2ca   : > { %v1382_v11 = vpop.permute.xlu0 %1381 }
 0x2cb   : > { %2630 = vmatmul.msk.f32.vlgmr.msra.gmra.mxu0 %vm1399_vm15, %v1382_v11 }
 0x31e   : > { %v1469_v12 = vpop.f32.mrf.mxu2 }
 0x31f   : > { %v1598_v13 = vsel %vm1399_vm15, %v1469_v12, -inf }
 0x320   : > { %1599 = vmax.xlane.f32.xlu2 %v1598_v13 }
 0x333   : > { %v1589_v15 = vpop.f32.mrf.mxu1  ;;  %v1594_v16 = vpop.xlane.xlu1 %1593 }
 0x334   : > { %v1616_v17 = vsub.f32 %v1421_v6, %v1594_v16  ;;  %v1613_v19 = vsel %vm1399_vm15, %v1589_v15, -inf }
 0x335   : > { %1614 = vmax.xlane.f32.xlu0 %v1613_v19 }
 0x336   : > { %v1624_v20 = vmul.f32 1.442695, %v1616_v17 }
 0x338   : > { %2905 = vpow2.f32 %v1624_v20 }
 0x339   : > { %v3745_v22 = vpop.f32.mrf.mxu3 }
 0x33a   : > { %v1601_v35 = vsel %vm1399_vm15, %v3745_v22, -inf }
 0x33c   : > { %v1597_v26 = vpop.xlane.xlu0 %1596 }
 0x33d   : > { %v1617_v30 = vsub.f32 %v1445_v9, %v1597_v26 }
 0x33e   : > { %v2906_v21 = vpop.eup %2905 }
 0x33f   : > { %v1640_v23 = vsel %vm1399_vm15, %v2906_v21, 0.0  ;;  %v1626_v34 = vmul.f32 1.442695, %v1617_v30 }
 0x340   : > { %1641 = vadd.xlane.f32.xlu2 %v1640_v23 }
 0x341   : > { %v1517_v24 = vpop.f32.mrf.mxu2  ;;  %2907 = vpow2.f32 %v1626_v34 }
 0x342   : > { %v1604_v25 = vsel %vm1399_vm15, %v1517_v24, -inf }
 0x343   : > { %1605 = vmax.xlane.f32.xlu0 %v1604_v25 }
 0x346   : > { %v1541_v28 = vpop.f32.mrf.mxu3 }
 0x347   : > { %v1607_v29 = vsel %vm1399_vm15, %v1541_v28, -inf  ;;  %v2908_v36 = vpop.eup %2907 }
 0x348   : > { %v1565_v31 = vpop.f32.mrf.mxu0  ;;  %1608 = vmax.xlane.f32.xlu2 %v1607_v29  ;;  %v1643_v37 = vsel %vm1399_vm15, %v2908_v36, 0.0 }
 0x349   : > { %v1610_v33 = vsel %vm1399_vm15, %v1565_v31, -inf }
 0x34a   : > { %1611 = vmax.xlane.f32.xlu1 %v1610_v33 }
 0x352   : > { %1602 = vmax.xlane.f32.xlu1 %v1601_v35 }
 0x35a   : > { %1644 = vadd.xlane.f32.xlu1 %v1643_v37 }
 0x360   : > { %2852 = vrot.lane.b32.xlu2 %v2851_v57, %s3237_s16 }
 0x393   : > { %v1600_v38 = vpop.xlane.xlu2 %1599 }
 0x394   : > { %v1618_v39 = vsub.f32 %v1469_v12, %v1600_v38 }
 0x396   : > { %v1628_v40 = vmul.f32 1.442695, %v1618_v39 }
 0x398   : > { %2909 = vpow2.f32 %v1628_v40 }
 0x39e   : > { %v3758_v41 = vpop.eup %2909 }
 0x39f   : > { %v1646_v43 = vsel %vm1399_vm15, %v3758_v41, 0.0 }
 0x3a0   : > { %1647 = vadd.xlane.f32.xlu0 %v1646_v43 }
 0x3a8   : > { %v1615_v44 = vpop.xlane.xlu0 %1614 }
 0x3a9   : > { %v1623_v45 = vsub.f32 %v1589_v15, %v1615_v44 }
 0x3ab   : > { %v1638_v46 = vmul.f32 1.442695, %v1623_v45 }
 0x3ad   : > { %2911 = vpow2.f32 %v1638_v46 }
 0x3b3   : > { %v3762_v47 = vpop.eup %2911  ;;  %v1642_v48 = vpop.xlane.xlu2 %1641 }
 0x3b4   : > { %v1661_v49 = vsel %vm1399_vm15, %v3762_v47, 0.0  ;;  %2913 = vrcp.f32 %v1642_v48 }
 0x3b5   : > { %1662 = vadd.xlane.f32.xlu0 %v1661_v49 }
 0x3b6   : > { %v1606_v42 = vpop.xlane.xlu0 %1605 }
 0x3b7   : > { %v1620_v54 = vsub.f32 %v1517_v24, %v1606_v42 }
 0x3b9   : > { %v1632_v58 = vmul.f32 1.442695, %v1620_v54  ;;  %v2702_v54 = vld [vmem:[%s3597_s15 + $0x8] sm:$0xff] }
 0x3ba   : > { %v2914_v56 = vpop.eup %2913 }
 0x3bb   : > { %v1609_v50 = vpop.xlane.xlu2 %1608  ;;  %v1672_v3 = vmul.f32 %v2914_v56, %v2906_v21 }
 0x3bc   : > { %v1621_v51 = vsub.f32 %v1541_v28, %v1609_v50 }
 0x3bd   : > { %v1612_v52 = vpop.xlane.xlu1 %1611 }
 0x3be   : > { %v1634_v32 = vmul.f32 1.442695, %v1621_v51  ;;  %v1622_v53 = vsub.f32 %v1565_v31, %v1612_v52 }
 0x3c0   : > { %2915 = vpow2.f32 %v1634_v32  ;;  %v1636_v55 = vmul.f32 1.442695, %v1622_v53 }
 0x3c2   : > { %2917 = vpow2.f32 %v1636_v55  ;;  %v2701_v55 = vld [vmem:[%s3597_s15] sm:$0xff] }
 0x3c3   : > { %v2853_v57 = vpop.permute.xlu2 %2852  ;;  %2919 = vpow2.f32 %v1632_v58 }
 0x3c4   : > { %v2855_v60 = vunpack.i.h.bf16 %v2853_v57  ;;  %v2854_v63 = vunpack.i.l.bf16 %v2853_v57 }
 0x3c5   : > { %v1603_v6 = vpop.xlane.xlu1 %1602 }
 0x3c6   : > { %v2916_v7 = vpop.eup %2915  ;;  %v1619_v8 = vsub.f32 %v3745_v22, %v1603_v6  ;;  %1701 = vmatpush.msrb.mxu2 %v2854_v63  ;;  %1727 = vmatpush.msrb.mxu3 %v2855_v60  ;;  %v2866_v22 = vpack.i.bf16 %v3718_v0, %v3714_v62 }
 0x3c7   : > { %2633 = vmatmul.msk.f32.vlgmr.msrb.gmra.mxu2 %vm1399_vm15, %v1672_v3  ;;  %v1655_v9 = vsel %vm1399_vm15, %v2916_v7, 0.0 }
 0x3c8   : > { %v3769_v10 = vpop.eup %2917  ;;  %v1630_v11 = vmul.f32 1.442695, %v1619_v8  ;;  %1656 = vadd.xlane.f32.xlu0 %v1655_v9 }
 0x3c9   : > { %v1658_v12 = vsel %vm1399_vm15, %v3769_v10, 0.0  ;;  %v2920_v15 = vpop.eup %2919 }
 0x3ca   : > { %2921 = vpow2.f32 %v1630_v11  ;;  %1659 = vadd.xlane.f32.xlu1 %v1658_v12  ;;  %v1652_v19 = vsel %vm1399_vm15, %v2920_v15, 0.0 }
 0x3cd   : > { %v1645_v13 = vpop.xlane.xlu1 %1644 }
 0x3ce   : > { %2923 = vrcp.f32 %v1645_v13 }
 0x3d0   : > { %v2922_v16 = vpop.eup %2921 }
 0x3d1   : > { %v1649_v17 = vsel %vm1399_vm15, %v2922_v16, 0.0 }
 0x3d2   : > { %1650 = vadd.xlane.f32.xlu2 %v1649_v17  ;;  %1653 = vadd.xlane.f32.xlu1 %v1652_v19  ;;  %v2890_v17 = vld [vmem:[%s4001_s17] ss:$0 sm:$0xff] }
 0x3d4   : > { %v2924_v20 = vpop.eup %2923 }
 0x3d5   : > { %v1673_v21 = vmul.f32 %v2924_v20, %v2908_v36 }
 0x3d7   : > { %2634 = vmatmul.msk.f32.vlgmr.msrb.gmra.mxu3 %vm1399_vm15, %v1673_v21 }
 0x3dc   : > { %2862 = vrot.lane.b32.xlu0 %v2861_v5, %s3237_s16 }
 0x3ea   : > { %2867 = vrot.lane.b32.xlu2 %v2866_v22, %s3237_s16 }
 0x3eb   : > { %2857 = vrot.lane.b32.xlu1 %v2856_v2, %s3237_s16 }
 0x413   : > { %v1648_v23 = vpop.xlane.xlu0 %1647 }
 0x428   : > { %v1663_v24 = vpop.xlane.xlu0 %1662 }
 0x43b   : > { %v1657_v26 = vpop.xlane.xlu0 %1656 }
 0x43c   : > { %2925 = vrcp.f32 %v1657_v26 }
 0x43d   : > { %v1660_v25 = vpop.xlane.xlu1 %1659 }
 0x442   : > { %v2926_v29 = vpop.eup %2925 }
 0x443   : > { %v1677_v62 = vmul.f32 %v2926_v29, %v2916_v7 }
 0x445   : > { %v1654_v28 = vpop.xlane.xlu1 %1653  ;;  %v1651_v59 = vpop.xlane.xlu2 %1650 }
 0x446   : > { %2927 = vrcp.f32 %v1654_v28 }
 0x447   : > { %2929 = vrcp.f32 %v1648_v23 }
 0x448   : > { %2931 = vrcp.f32 %v1651_v59  ;;  %v2704_v59 = vld [vmem:[%s3531_s27 + $0x8] sm:$0xff] }
 0x449   : > { %2933 = vrcp.f32 %v1663_v24 }
 0x44a   : > { %2935 = vrcp.f32 %v1660_v25 }
 0x44c   : > { %v2928_v61 = vpop.eup %2927 }
 0x44d   : > { %v1676_v0 = vmul.f32 %v2928_v61, %v2920_v15  ;;  %v2930_v1 = vpop.eup %2929  ;;  %v2868_v31 = vpop.permute.xlu2 %2867 }
 0x44e   : > { %v2863_v4 = vpop.permute.xlu0 %2862  ;;  %v2932_v2 = vpop.eup %2931  ;;  %v1674_v37 = vmul.f32 %v2930_v1, %v3758_v41  ;;  %v2870_v38 = vunpack.i.h.bf16 %v2868_v31  ;;  %v2869_v39 = vunpack.i.l.bf16 %v2868_v31 }
 0x44f   : > { %v2865_v5 = vunpack.i.h.bf16 %v2863_v4  ;;  %v2864_v30 = vunpack.i.l.bf16 %v2863_v4  ;;  %v1675_v36 = vmul.f32 %v2932_v2, %v2922_v16  ;;  %v2934_v40 = vpop.eup %2933  ;;  %v1703_v41 = vpop.f32.mrf.mxu2 }
 0x450   : > { %v2936_v43 = vpop.eup %2935  ;;  %v1679_v44 = vmul.f32 %v2934_v40, %v3762_v47 }
 0x451   : > { %1805 = vmatpush.msra.mxu2 %v2864_v30  ;;  %1831 = vmatpush.msra.mxu3 %v2865_v5  ;;  %v1678_v45 = vmul.f32 %v2936_v43, %v3769_v10  ;;  %v2710_v43 = vld [vmem:[%s3606_s12 + $0x28] sm:$0xff] }
 0x452   : > { %2637 = vmatmul.msk.f32.vlgmr.msra.gmra.mxu2 %vm1399_vm15, %v1676_v0  ;;  %2638 = vmatmul.msk.f32.vlgmr.msra.gmra.mxu3 %vm1399_vm15, %v1677_v62 }
 0x453   : > { %1950 = vmatpush.bf16.msrb.mxu2 %v2702_v54  ;;  %2046 = vmatpush.bf16.msrb.mxu3 %v2704_v59 }
 0x457   : > { %1951 = vmatpush.bf16.msrb.mxu2 %v2701_v55 }
 0x45a   : > { %v1729_v46 = vpop.f32.mrf.mxu3 }
 0x45d   : > { %v2858_v33 = vpop.permute.xlu1 %2857 }
 0x45e   : > { %v2860_v34 = vunpack.i.h.bf16 %v2858_v33  ;;  %v2859_v35 = vunpack.i.l.bf16 %v2858_v33  ;;  %v2703_v33 = vld [vmem:[%s3531_s27] sm:$0xff]  ;;  %s4003_s27 = scalar_lea.vmem [#allocation4], %s4002_s29 }
 0x45f   : > { %2047 = vmatpush.bf16.msrb.mxu3 %v2703_v33 }
 0x460   : > { %1753 = vmatpush.msrb.mxu0 %v2859_v35  ;;  %1779 = vmatpush.msrb.mxu1 %v2860_v34  ;;  %v2712_v34 = vld [vmem:[%s3606_s12 + $0x38] sm:$0xff] }
 0x461   : > { %2635 = vmatmul.msk.f32.vlgmr.msrb.gmra.mxu0 %vm1399_vm15, %v1674_v37  ;;  %2636 = vmatmul.msk.f32.vlgmr.msrb.gmra.mxu1 %vm1399_vm15, %v1675_v36  ;;  %v2711_v37 = vld [vmem:[%s3606_s12 + $0x30] sm:$0xff] }
 0x462   : > { %1857 = vmatpush.msra.mxu0 %v2869_v39  ;;  %1883 = vmatpush.msra.mxu1 %v2870_v38 }
 0x464   : > { %2125 = vmatpush.bf16.msrb.mxu0 %v2712_v34 }
 0x468   : > { %2126 = vmatpush.bf16.msrb.mxu0 %v2711_v37 }
 0x469   : > { %2639 = vmatmul.msk.f32.vlgmr.msra.gmra.mxu0 %vm1399_vm15, %v1678_v45  ;;  %2640 = vmatmul.msk.f32.vlgmr.msra.gmra.mxu1 %vm1399_vm15, %v1679_v44 }
 0x46c   : > { %2127 = vmatpush.bf16.msrb.mxu0 %v2710_v43 }
 0x4d5   : > { %v1807_v48 = vpop.f32.mrf.mxu2  ;;  %v1833_v49 = vpop.f32.mrf.mxu3 }
 0x4d6   : > { %v2876_v50 = vpack.i.bf16 %v1833_v49, %v1807_v48 }
 0x4d8   : > { %2877 = vrot.lane.b32.xlu0 %v2876_v50, %s3238_s22 }
 0x4de   : > { %v1755_v51 = vpop.f32.mrf.mxu0  ;;  %v1781_v42 = vpop.f32.mrf.mxu1 }
 0x4df   : > { %v2871_v52 = vpack.i.bf16 %v1781_v42, %v1755_v51 }
 0x4e1   : > { %2872 = vrot.lane.b32.xlu2 %v2871_v52, %s3239_s2 }
 0x4e6   : > { %v1859_v47 = vpop.f32.mrf.mxu0  ;;  %v1885_v32 = vpop.f32.mrf.mxu1 }
 0x4e7   : > { %v2881_v53 = vpack.i.bf16 %v1885_v32, %v1859_v47  ;;  %v2891_v32 = vld [vmem:[%s4003_s27] ss:$0 sm:$0xff] }
 0x4e9   : > { %2882 = vrot.lane.b32.xlu1 %v2881_v53, %s3240_s9 }
 0x53b   : > { %v2873_v56 = vpop.permute.xlu2 %2872 }
 0x53c   : > { %v2875_v58 = vunpack.i.h.bf16 %v2873_v56  ;;  %v2874_v60 = vunpack.i.l.bf16 %v2873_v56  ;;  %v2892_v56 = vld [vmem:[%s4004_s26] ss:$0 sm:$0xff] }
 0x53e   : > { %v1913_v7 = vsel %vm1399_vm15, %v1729_v46, %v2875_v58  ;;  %v1912_v8 = vsel %vm1399_vm15, %v1703_v41, %v2874_v60  ;;  %v2709_v41 = vld [vmem:[%s3606_s12 + $0x20] sm:$0xff] }
 0x53f   : > { %2128 = vmatpush.bf16.msrb.mxu0 %v2709_v41 }
 0x54a   : > { %v2878_v57 = vpop.permute.xlu0 %2877 }
 0x54b   : > { %v2880_v63 = vunpack.i.h.bf16 %v2878_v57  ;;  %v2879_v3 = vunpack.i.l.bf16 %v2878_v57 }
 0x54d   : > { %v1916_v11 = vsel %vm1914_vm0, %v1913_v7, %v2880_v63  ;;  %v1915_v12 = vsel %vm1914_vm0, %v1912_v8, %v2879_v3  ;;  %v2708_v7 = vld [vmem:[%s3606_s12 + $0x18] sm:$0xff]  ;;  %v2707_v8 = vld [vmem:[%s3606_s12 + $0x10] sm:$0xff] }
 0x54e   : > { %2129 = vmatpush.bf16.msrb.mxu0 %v2708_v7 }
 0x552   : > { %2130 = vmatpush.bf16.msrb.mxu0 %v2707_v8 }
 0x55b   : > { %v2883_v6 = vpop.permute.xlu1 %2882 }
 0x55c   : > { %v2885_v9 = vunpack.i.h.bf16 %v2883_v6  ;;  %v2884_v10 = vunpack.i.l.bf16 %v2883_v6 }
 0x55e   : > { %v1918_v13 = vsel %vm1917_vm2, %v1915_v12, %v2884_v10  ;;  %v1919_v15 = vsel %vm1917_vm2, %v1916_v11, %v2885_v9  ;;  %v2706_v9 = vld [vmem:[%s3606_s12 + $0x8] sm:$0xff]  ;;  %v2705_v10 = vld [vmem:[%s3606_s12] sm:$0xff]  ;;  %s4007_s12 = sld [smem:[#allocation22_spill]] }
 0x55f   : > { %v1920_v16 = vpack.c.bf16 %v1919_v15, %v1918_v13  ;;  %2131 = vmatpush.bf16.msrb.mxu0 %v2706_v9  ;;  %v2893_v12 = vld [vmem:[%s4005_s28] ss:$0 sm:$0xff] }
 0x561   : > { %2649 = vmatmul.msk.bf16.vlgmr.msrb.gmra.mxu2 %vm1183_vm1, %v1920_v16 }
 0x563   : > { %2132 = vmatpush.bf16.msrb.mxu0 %v2705_v10 }
 0x564   : > { %p2691_p9 = scmp.ne.s32.totalorder %s4007_s12, 2 }
 0x565   : > { %s4008_s5 = sld [smem:[#allocation32_spill]] (!%p2691_p9) }
 0x5e4   : > { %v1953_v19 = vpop.f32.mrf.mxu2 }
 0x5e5   : > { %v1954_v20 = vadd.f32 %v2890_v17, %v1953_v19 }
 0x5e7   : > { %v3807_v21 = vadd.f32 %v1954_v20, %v3617_v14 }
 0x5e9   : > { %v1962_v22 = vsel %vm1183_vm1, %v3807_v21, 0.0 }
 0x5ea   : > { %1963 = vadd.xlane.f32.xlu2 %v1962_v22  ;;  %v2894_v22 = vld [vmem:[%s4006_s21] ss:$0 sm:$0xff] }
 0x5ec   : > { %v1955_v23 = vpop.f32.mrf.mxu2 }
 0x5ed   : > { %v1956_v24 = vadd.f32 %v2890_v17, %v1955_v23 }
 0x5ef   : > { %v3812_v25 = vadd.f32 %v1956_v24, %v3622_v18 }
 0x5f1   : > { %v1965_v26 = vsel %vm1183_vm1, %v3812_v25, 0.0 }
 0x5f2   : > { %1966 = vadd.xlane.f32.xlu0 %v1965_v26 }
 0x65d   : > { %v1964_v28 = vpop.xlane.xlu2 %1963 }
 0x65e   : > { %v1968_v29 = vmul.f32 %v1964_v28, %v3627_v27 }
 0x660   : > { %v1970_v14 = vsub.f32 %v3807_v21, %v1968_v29 }
 0x662   : > { %v1972_v61 = vmul.f32 %v1970_v14, %v1970_v14 }
 0x664   : > { %v1974_v4 = vsel %vm1183_vm1, %v1972_v61, 0.0 }
 0x665   : > { %v1967_v5 = vpop.xlane.xlu0 %1966  ;;  %1975 = vadd.xlane.f32.xlu1 %v1974_v4 }
 0x666   : > { %v1969_v30 = vmul.f32 %v1967_v5, %v3627_v27 }
 0x668   : > { %v1971_v18 = vsub.f32 %v3812_v25, %v1969_v30 }
 0x66a   : > { %v1973_v62 = vmul.f32 %v1971_v18, %v1971_v18 }
 0x66c   : > { %v1977_v0 = vsel %vm1183_vm1, %v1973_v62, 0.0 }
 0x66d   : > { %1978 = vadd.xlane.f32.xlu2 %v1977_v0 }
 0x6d8   : > { %v1976_v1 = vpop.xlane.xlu1 %1975 }
 0x6d9   : > { %v1980_v2 = vmul.f32 %v1976_v1, %v3627_v27 }
 0x6db   : > { %v1982_v31 = vadd.f32 1e-05, %v1980_v2 }
 0x6dd   : > { %2937 = vrsqrt.f32 %v1982_v31  ;;  %vm1990_vm4 = vweird.f32 %v1982_v31 }
 0x6e0   : > { %v1979_v35 = vpop.xlane.xlu2 %1978 }
 0x6e1   : > { %v1981_v36 = vmul.f32 %v1979_v35, %v3627_v27 }
 0x6e3   : > { %v2938_v38 = vpop.eup %2937  ;;  %v1983_v39 = vadd.f32 1e-05, %v1981_v36 }
 0x6e4   : > { %v1985_v40 = vmul.f32 %v2938_v38, %v1982_v31  ;;  %vm1991_vm3 = vweird.f32 %v2938_v38 }
 0x6e5   : > { %2939 = vrsqrt.f32 %v1983_v39  ;;  %vm1992_vm5 = vmor %vm1990_vm4, %vm1991_vm3  ;;  %vm2000_vm7 = vweird.f32 %v1983_v39 }
 0x6e6   : > { %v1986_v44 = vmul.f32 %v2938_v38, %v1985_v40 }
 0x6e8   : > { %v1987_v45 = vmul.f32 0.5, %v1986_v44 }
 0x6ea   : > { %v1988_v46 = vsub.f32 1.5, %v1987_v45 }
 0x6eb   : > { %v2940_v48 = vpop.eup %2939 }
 0x6ec   : > { %v1989_v49 = vmul.f32 %v2938_v38, %v1988_v46  ;;  %v1995_v50 = vmul.f32 %v2940_v48, %v1983_v39  ;;  %vm2001_vm6 = vweird.f32 %v2940_v48 }
 0x6ed   : > { %vm2002_vm8 = vmor %vm2000_vm7, %vm2001_vm6 }
 0x6ee   : > { %v1996_v51 = vmul.f32 %v2940_v48, %v1995_v50  ;;  %v1993_v42 = vsel %vm1992_vm5, %v2938_v38, %v1989_v49 }
 0x6ef   : > { %v2004_v53 = vmul.f32 %v1993_v42, %v1970_v14 }
 0x6f0   : > { %v1997_v52 = vmul.f32 0.5, %v1996_v51 }
 0x6f1   : > { %v2009_v57 = vmul.f32 %v2891_v32, %v2004_v53 }
 0x6f2   : > { %v1998_v47 = vsub.f32 1.5, %v1997_v52 }
 0x6f3   : > { %v2014_v63 = vadd.f32 %v2892_v56, %v2009_v57 }
 0x6f4   : > { %v1999_v54 = vmul.f32 %v2940_v48, %v1998_v47 }
 0x6f6   : > { %v2003_v55 = vsel %vm2002_vm8, %v2940_v48, %v1999_v54 }
 0x6f7   : > { %v2005_v58 = vmul.f32 %v2003_v55, %v1971_v18 }
 0x6f9   : > { %v2010_v60 = vmul.f32 %v2891_v32, %v2005_v58 }
 0x6fb   : > { %v2015_v3 = vadd.f32 %v2892_v56, %v2010_v60 }
 0x6fd   : > { %v2016_v6 = vpack.c.bf16 %v2015_v3, %v2014_v63 }
 0x6ff   : > { %2658 = vmatmul.msk.bf16.vlgmr.msrb.gmra.mxu3 %vm1183_vm1, %v2016_v6 }
 0x782   : > { %v2049_v11 = vpop.f32.mrf.mxu3 }
 0x783   : > { %v2050_v13 = vadd.f32 %v2893_v12, %v2049_v11 }
 0x785   : > { %v2054_v17 = vmax.f32 %v2050_v13, 0.0 }
 0x78a   : > { %v2051_v15 = vpop.f32.mrf.mxu3 }
 0x78b   : > { %v2052_v16 = vadd.f32 %v2893_v12, %v2051_v15 }
 0x78d   : > { %v2055_v19 = vmax.f32 %v2052_v16, 0.0 }
 0x78f   : > { %v2056_v20 = vpack.c.bf16 %v2055_v19, %v2054_v17 }
 0x791   : > { %2133 = vmatmul.bf16.vlgmr.msrb.gmra.mxu0 %v2056_v20 }
 0x80e   : > { %v2134_v23 = vpop.f32.mrf.mxu0 }
 0x80f   : > { %v2135_v24 = vadd.f32 %v2894_v22, %v2134_v23 }
 0x811   : > { %v2139_v26 = vadd.f32 %v2135_v24, %v3807_v21 }
 0x813   : > { %2141 = vst.msk [vmem:[#allocation2] sm:$0xff] %vm1183_vm1, %v2139_v26 }
 0x816   : > { %v2136_v28 = vpop.f32.mrf.mxu0 }
 0x817   : > { %v2137_v29 = vadd.f32 %v2894_v22, %v2136_v28  ;;  %2146 = sbr.rel (%p2691_p9) target bundleno = 2353 (0x931), region = 128 }
 0x819   : > { %v2140_v14 = vadd.f32 %v2137_v29, %v3812_v25 }
 0x81b   : > { %2142 = vst.msk [vmem:[#allocation2 + $0x8] sm:$0xff] %vm1183_vm1, %v2140_v14 }
 0x81c   : > { %v2149_v61 = vsel %vm1183_vm1, %v2139_v26, 0.0  ;;  %v2152_v4 = vsel %vm1183_vm1, %v2140_v14, 0.0  ;;  %v2942_v51 = vld [vmem:[%s4008_s5] ss:$0 sm:$0xff] }
 0x81d   : > { %2150 = vadd.xlane.f32.xlu0 %v2149_v61 }
 0x825   : > { %2153 = vadd.xlane.f32.xlu0 %v2152_v4 }
 0x890   : > { %v2151_v5 = vpop.xlane.xlu0 %2150 }
 0x891   : > { %v2155_v21 = vmul.f32 %v2151_v5, %v3627_v27 }
 0x893   : > { %v2157_v30 = vsub.f32 %v2139_v26, %v2155_v21 }
 0x895   : > { %v2159_v18 = vmul.f32 %v2157_v30, %v2157_v30 }
 0x897   : > { %v2161_v62 = vsel %vm1183_vm1, %v2159_v18, 0.0 }
 0x898   : > { %2162 = vadd.xlane.f32.xlu1 %v2161_v62  ;;  %v2154_v25 = vpop.xlane.xlu0 %2153 }
 0x899   : > { %v2156_v0 = vmul.f32 %v2154_v25, %v3627_v27 }
 0x89b   : > { %v2158_v59 = vsub.f32 %v2140_v14, %v2156_v0 }
 0x89d   : > { %v2160_v1 = vmul.f32 %v2158_v59, %v2158_v59 }
 0x89f   : > { %v2164_v2 = vsel %vm1183_vm1, %v2160_v1, 0.0 }
 0x8a0   : > { %2165 = vadd.xlane.f32.xlu1 %v2164_v2 }
 0x90b   : > { %v2163_v31 = vpop.xlane.xlu1 %2162 }
 0x90c   : > { %v2167_v33 = vmul.f32 %v2163_v31, %v3627_v27 }
 0x90e   : > { %v2169_v34 = vadd.f32 1e-05, %v2167_v33 }
 0x910   : > { %2943 = vrsqrt.f32 %v2169_v34  ;;  %vm2177_vm10 = vweird.f32 %v2169_v34 }
 0x913   : > { %v2166_v35 = vpop.xlane.xlu1 %2165 }
 0x914   : > { %v2168_v36 = vmul.f32 %v2166_v35, %v3627_v27  ;;  %v2941_v27 = vld [vmem:[%s1150_s7] ss:$0 sm:$0xff] }
 0x916   : > { %v2944_v37 = vpop.eup %2943  ;;  %v2170_v38 = vadd.f32 1e-05, %v2168_v36 }
 0x917   : > { %v2172_v39 = vmul.f32 %v2944_v37, %v2169_v34  ;;  %vm2178_vm9 = vweird.f32 %v2944_v37 }
 0x918   : > { %2945 = vrsqrt.f32 %v2170_v38  ;;  %vm2179_vm11 = vmor %vm2177_vm10, %vm2178_vm9  ;;  %vm2187_vm13 = vweird.f32 %v2170_v38 }
 0x919   : > { %v2173_v40 = vmul.f32 %v2944_v37, %v2172_v39 }
 0x91b   : > { %v2174_v43 = vmul.f32 0.5, %v2173_v40 }
 0x91d   : > { %v2175_v44 = vsub.f32 1.5, %v2174_v43 }
 0x91e   : > { %v2946_v45 = vpop.eup %2945 }
 0x91f   : > { %v2176_v41 = vmul.f32 %v2944_v37, %v2175_v44  ;;  %v2182_v46 = vmul.f32 %v2946_v45, %v2170_v38  ;;  %vm2188_vm12 = vweird.f32 %v2946_v45 }
 0x920   : > { %vm2189_vm14 = vmor %vm2187_vm13, %vm2188_vm12 }
 0x921   : > { %v2180_v48 = vsel %vm2179_vm11, %v2944_v37, %v2176_v41  ;;  %v2183_v49 = vmul.f32 %v2946_v45, %v2182_v46 }
 0x922   : > { %v2191_v50 = vmul.f32 %v2180_v48, %v2157_v30 }
 0x923   : > { %v2184_v42 = vmul.f32 0.5, %v2183_v49 }
 0x924   : > { %v2196_v52 = vmul.f32 %v2941_v27, %v2191_v50 }
 0x925   : > { %v2185_v47 = vsub.f32 1.5, %v2184_v42 }
 0x926   : > { %v2201_v32 = vadd.f32 %v2942_v51, %v2196_v52 }
 0x927   : > { %v2186_v53 = vmul.f32 %v2946_v45, %v2185_v47 }
 0x928   : > { %2203 = vst.msk [vmem:[%s3611_s8] sm:$0xff] %vm1183_vm1, %v2201_v32 }
 0x929   : > { %v2190_v54 = vsel %vm2189_vm14, %v2946_v45, %v2186_v53 }
 0x92a   : > { %v2192_v55 = vmul.f32 %v2190_v54, %v2158_v59 }
 0x92c   : > { %v2197_v56 = vmul.f32 %v2941_v27, %v2192_v55 }
 0x92e   : > { %v2202_v57 = vadd.f32 %v2942_v51, %v2197_v56 }
 0x930   : > { %2204 = vst.msk [vmem:[%s3611_s8 + $0x8] sm:$0xff] %vm1183_vm1, %v2202_v57 }
 0x931 PF: > { %s4010_s23 = sld [smem:[#allocation26_spill]] }
 0x932   : > { %s4011_s0 = sld [smem:[#allocation18_spill]] }
 0x933   : > { %s4012_s30 = sld [smem:[#allocation19_spill]] }
 0x934   : > { %s4013_s20 = sld [smem:[#allocation30_spill]] }
 0x935   : > { %s4014_s21 = sld [smem:[#allocation20_spill]] }
 0x936   : > { %s4015_s1 = sld [smem:[#allocation21_spill]] }
 0x937   : > { %s41_s3 = sadd.s32 1, %s4010_s23   ;;  %s4016_s22 = sld [smem:[#allocation29_spill]] }
 0x938   : > { %p38_p10 = scmp.ge.s32.totalorder %s41_s3, 20   ;;  %s4017_s2 = sld [smem:[#allocation24_spill]] }
 0x939   : > { %s4018_s23 = sld [smem:[#allocation25_spill]] }
 0x93a   : > { %s4019_s24 = sld [smem:[#allocation27_spill]]  ;;  %40 = sbr.rel (!%p38_p10) target bundleno = 34 (0x22), region = 241 }
 0x93b   : > { %s4020_s25 = sld [smem:[#allocation28_spill]] }
 0x93f   :  { %2226 = vsyncpa [#allocation5], 1 }
 0x940   :  { %2228 = vsyncpa [#allocation5 + $0x1], 1 }
 0x941   :  { %2229 = vsyncpa [#allocation7], 1 }
 0x942   :  { %2231 = vsyncpa [#allocation7 + $0x1], 1 }
 0x943   :  { %2232 = vsyncpa [#allocation10], 1 }
 0x944   :  { %2234 = vsyncpa [#allocation10 + $0x1], 1 }
 0x945   :  { %2235 = vsyncpa [#allocation13], 1 }
 0x946   :  { %2237 = vsyncpa [#allocation13 + $0x1], 1 }

// kernel: acl_forward.3
= control target key start
LH: loop header
LB: loop body
LE: loop exit
PB: predicated region body
PF: predicated region fallthrough
CT: control target
= control target key end

     0   :  { %s3050_s27 = smov 0   ;;  %s3052_s28 = smov 0   ;;  %s3470_s0 = inlined_call_operand.vmem [shape: f32[3,2,8,64], index: 0, kind: input, shape index: {}]   ;;  %s3471_s1 = inlined_call_operand.vmem [shape: f32[8,64], index: 1, kind: input, shape index: {}]   ;;  %s3472_s2 = inlined_call_operand.vmem [shape: f32[3,3,1,64], index: 2, kind: input, shape index: {}]   ;;  %s3473_s3 = inlined_call_operand.vmem [shape: f32[3,3,1,64], index: 3, kind: input, shape index: {}]   ;;  %s3474_s4 = inlined_call_operand.vmem [shape: bf16[3,3,64,64], index: 4, kind: input, shape index: {}]   ;;  %s3475_s5 = inlined_call_operand.vmem [shape: f32[3,3,1,64], index: 5, kind: input, shape index: {}]   ;;  %s3476_s6 = inlined_call_operand.vmem [shape: bf16[3,3,64,128], index: 6, kind: input, shape index: {}]   ;;  %s3477_s7 = inlined_call_operand.vmem [shape: f32[3,3,1,128], index: 7, kind: input, shape index: {}]   ;;  %s3478_s8 = inlined_call_operand.vmem [shape: bf16[3,3,64,64], index: 8, kind: input, shape index: {}]   ;;  %s3479_s9 = inlined_call_operand.vmem [shape: f32[3,3,1,64], index: 9, kind: input, shape index: {}]   ;;  %s3480_s10 = inlined_call_operand.vmem [shape: f32[3,3,1,64], index: 10, kind: input, shape index: {}]   ;;  %s3481_s11 = inlined_call_operand.vmem [shape: f32[3,3,1,64], index: 11, kind: input, shape index: {}]   ;;  %s3482_s12 = inlined_call_operand.vmem [shape: bf16[3,3,64,256], index: 12, kind: input, shape index: {}]   ;;  %s3483_s13 = inlined_call_operand.vmem [shape: f32[3,3,1,256], index: 13, kind: input, shape index: {}]   ;;  %s3484_s14 = inlined_call_operand.vmem [shape: bf16[3,3,256,64], index: 14, kind: input, shape index: {}]   ;;  %s3485_s15 = inlined_call_operand.vmem [shape: f32[3,3,1,64], index: 15, kind: input, shape index: {}]   ;;  %s3486_s16 = inlined_call_operand.vmem [shape: f32[3,1,64], index: 16, kind: input, shape index: {}]   ;;  %s3487_s17 = inlined_call_operand.vmem [shape: f32[3,1,64], index: 17, kind: input, shape index: {}]   ;;  %s3488_s18 = inlined_call_operand.vmem [shape: f32[3,2,1,64], index: 18, kind: output, shape index: {}]  }
   0x1   :  { %3496 = sst [smem:[#allocation12_spill]] %s3470_s0  ;;  %s3054_s29 = smov 0  }
   0x2   :  { %3497 = sst [smem:[#allocation13_spill]] %s3471_s1  ;;  %s3056_s30 = smov 0  }
   0x3   :  { %3498 = sst [smem:[#allocation14_spill]] %s3472_s2  ;;  %s3058_s0 = smov 0  }
   0x4   :  { %3499 = sst [smem:[#allocation15_spill]] %s3474_s4 }
   0x5   :  { %3500 = sst [smem:[#allocation16_spill]] %s3476_s6 }
   0x6   :  { %3501 = sst [smem:[#allocation17_spill]] %s3478_s8 }
   0x7   :  { %3502 = sst [smem:[#allocation18_spill]] %s3479_s9 }
   0x8   :  { %3503 = sst [smem:[#allocation19_spill]] %s3480_s10 }
   0x9   :  { %3504 = sst [smem:[#allocation20_spill]] %s3481_s11 }
   0xa   :  { %3505 = sst [smem:[#allocation21_spill]] %s3482_s12 }
   0xb   :  { %3506 = sst [smem:[#allocation22_spill]] %s3483_s13 }
   0xc   :  { %3507 = sst [smem:[#allocation23_spill]] %s3484_s14 }
   0xd   :  { %3508 = sst [smem:[#allocation24_spill]] %s3485_s15 }
   0xe   :  { %3509 = sst [smem:[#allocation25_spill]] %s3486_s16 }
   0xf   :  { %3510 = sst [smem:[#allocation26_spill]] %s3487_s17 }
  0x10   :  { %3511 = sst [smem:[#allocation27_spill]] %s3488_s18 }
  0x11 LB: > { %3512 = sst [smem:[#allocation3_spill]] %s2929_s27  ;;  %s37_s19 = sadd.s32 1, %s2937_s29  ;;  %s2945_s0 = sphi %s3058_s0, %s28_s0   ;;  %s2941_s30 = sphi %s3056_s30, %s3562_s30   ;;  %s2937_s29 = sphi %s3054_s29, %s3561_s29   ;;  %s2933_s28 = sphi %s3052_s28, %s3560_s28   ;;  %s2929_s27 = sphi %s3050_s27, %s3559_s27  }
  0x12   : > { %3513 = sst [smem:[#allocation4_spill]] %s2937_s29  ;;  %s40_s1 = sadd.s32 1, %s2941_s30 }
  0x13   : > { %3514 = sst [smem:[#allocation5_spill]] %s2941_s30  ;;  %p38_p0 = scmp.ge.s32.totalorder %s37_s19, 3 }
  0x14   : > { %3515 = sst [smem:[#allocation6_spill]] %s2945_s0  ;;  %p2534_p1 = scmp.ge.s32.totalorder %s2945_s0, 1 }
  0x15   : > { %p747_p2 = scmp.lt.s32.totalorder %s2945_s0, 10  ;;  %s3564_s19 = smov (%p38_p0, %s37_s19), 0 }
  0x16   : > { %3516 = sst [smem:[#allocation7_spill]] %s3564_s19  ;;  %s3566_s1 = smov (!%p38_p0, %s40_s1), %s2941_s30 }
  0x17   : > { %p748_p3 = pnand %p2534_p1, %p747_p2  ;;  %p42_p4 = scmp.ge.s32.totalorder %s3566_s1, 3 }
  0x19   : > { %s3568_s1 = smov (%p42_p4, %s3566_s1), 0  ;;  %751 = sbr.rel (%p748_p3) target bundleno = 2281 (0x8e9), region = 92 }
  0x1a   : > { %3517 = sst [smem:[#allocation8_spill]] %s3568_s1 }
  0x1e   : > { %p915_p5 = scmp.lt.s32.totalorder %s2933_s28, 2  ;;  %p922_p6 = scmp.lt.s32.totalorder %s2929_s27, 2 }
  0x1f   : > { %s3518_s24 = sld [smem:[#allocation12_spill]] }
  0x20   : > { %s3570_s28 = smov (!%p915_p5, %s2933_s28), 2  ;;  %s3521_s4 = sld [smem:[#allocation15_spill]] }
  0x21   : > { %s3086_s20 = scalar_select %p922_p6, %s2929_s27, 2 }
  0x22   : > { %s2726_s21 = sshll.u32 %s3570_s28, 4  ;;  %s2763_s22 = smul.u32 3, %s3570_s28 }
  0x23   : > { %s2537_s26 = sshll.u32 %s3086_s20, 3  ;;  %s2764_s19 = smul.u32 24, %s3570_s28 }
  0x24   : > { %s3097_s1 = sadd.s32 %s2763_s22, %s3086_s20  ;;  %s3522_s6 = sld [smem:[#allocation16_spill]] }
  0x25   : > { %s3093_s25 = scalar_lea.vmem %s3518_s24, %s2726_s21  ;;  %s940_s22 = sadd.s32 %s2764_s19, %s2537_s26 }
  0x26   : > { %3519 = sst [smem:[#allocation9_spill]] %s3093_s25  ;;  %s2538_s18 = sshll.u32 %s940_s22, 2 }
  0x27   : > { %s3119_s29 = scalar_lea.vmem %s3521_s4, %s2538_s18  ;;  %s3523_s8 = sld [smem:[#allocation17_spill]] }
  0x28   : > { %s2543_s15 = sshll.u32 %s3086_s20, 4  ;;  %s2765_s19 = smul.u32 48, %s3570_s28 }
  0x29   : > { %s2545_s26 = sshll.u32 %s3086_s20, 1  ;;  %s2546_s24 = sshll.u32 %s3086_s20, 5 }
  0x2a   : > { %s3124_s2 = scalar_lea.vmem %s3522_s6, %s2538_s18  ;;  %s1002_s14 = sadd.s32 %s2765_s19, %s2543_s15 }
  0x2b   : > { %s2544_s21 = sshll.u32 %s1002_s14, 2  ;;  %s3528_s4 = sld [smem:[#allocation21_spill]] }
  0x2c   : > { %s2767_s0 = smul.u32 96, %s3570_s28  ;;  %s3531_s11 = sld [smem:[#allocation24_spill]] }
  0x2d   : > { %s3129_s27 = scalar_lea.vmem %s3523_s8, %s2538_s18  ;;  %s2766_s18 = smul.u32 6, %s3570_s28 }
  0x2e   : > { %3524 = sst [smem:[#allocation10_spill]] %s3129_s27  ;;  %s1019_s16 = sadd.s32 %s2767_s0, %s2546_s24 }
  0x2f   : > { %s3148_s25 = sadd.s32 %s2766_s18, %s2545_s26  ;;  %s3532_s14 = sld [smem:[#allocation25_spill]] }
  0x30   : > { %s3533_s9 = sld [smem:[#allocation26_spill]] }
  0x31   : > { %s3153_s12 = scalar_lea.vmem %s3528_s4, %s2544_s21  ;;  %s2548_s4 = sshll.u32 %s3570_s28, 1 }
  0x32   : > { %3529 = sst [smem:[#allocation11_spill]] %s3153_s12  ;;  %s1028_s10 = scalar_lea.vmem %s3531_s11, %s3097_s1 }
  0x33   : > { %s2547_s21 = sshll.u32 %s1019_s16, 2  ;;  %s3534_s23 = sld [smem:[#allocation27_spill]] }
  0x34   : > { %s3535_s6 = sld [smem:[#allocation23_spill]] }
  0x35   : > { %s1031_s19 = scalar_lea.vmem %s3532_s14, %s3570_s28  ;;  %s3536_s11 = sld [smem:[#allocation3_spill]] }
  0x36   : > { %s1034_s17 = scalar_lea.vmem %s3533_s9, %s3570_s28 }
  0x39   : > { %s3176_s13 = scalar_lea.vmem %s3534_s23, %s2548_s4 }
  0x3a   : > { %s3181_s8 = scalar_lea.vmem %s3535_s6, %s2547_s21 }
  0x3b   : > { %p2549_p7 = scmp.ne.s32.totalorder %s3536_s11, 0 }
  0x3c   : > { %s3537_s14 = sld [smem:[#allocation13_spill]] (!%p2549_p7) }
  0x3d   : > { %1043 = sbr.rel (%p2549_p7) target bundleno = 74 (0x4a), region = 96  ;;  %s3538_s9 = sld [smem:[#allocation9_spill]] (!%p2549_p7) }
  0x42   : > { %v1044_v0 = vld [vmem:[%s3537_s14] sm:$0xff]  ;;  %vm1051_vm0 = vcmask 523264  }
  0x43   : > { %v1045_v1 = vld [vmem:[%s3538_s9] sm:$0xff]  ;;  %v1046_v2 = vld [vmem:[%s3538_s9 + $0x8] sm:$0xff] }
  0x44   : > { %v1047_v3 = vmul.f32 8.0, %v1045_v1  ;;  %v1048_v4 = vmul.f32 8.0, %v1046_v2 }
  0x46   : > { %v1049_v5 = vadd.f32 %v1047_v3, %v1044_v0  ;;  %v1050_v6 = vadd.f32 %v1048_v4, %v1044_v0 }
  0x48   : > { %1052 = vst.msk [vmem:[#allocation2] sm:$0xff] %vm1051_vm0, %v1049_v5 }
  0x49   : > { %1053 = vst.msk [vmem:[#allocation2 + $0x8] sm:$0xff] %vm1051_vm0, %v1050_v6 }
  0x4a PF: > { %vm1058_vm1 = vcmask 523264   ;;  %v2947_v11 = vmov 64.0   ;;  %v2730_v28 = vld [vmem:[%s3119_s29 + $0x18] sm:$0xff]  ;;  %v2729_v29 = vld [vmem:[%s3119_s29 + $0x10] sm:$0xff]  ;;  %v2728_v30 = vld [vmem:[%s3119_s29 + $0x8] sm:$0xff]  ;;  %s3539_s27 = sld [smem:[#allocation14_spill]]  ;;  %s3541_s30 = scalar_lea.vmem %s3473_s3, %s3097_s1 }
  0x4b   : > { %2859 = vrcp.f32 %v2947_v11  ;;  %1164 = vmatpush.bf16.msra.mxu1 %v2730_v28  ;;  %v2727_v32 = vld [vmem:[%s3119_s29] sm:$0xff]  ;;  %v2734_v35 = vld [vmem:[%s3124_s2 + $0x18] sm:$0xff]  ;;  %v2733_v37 = vld [vmem:[%s3124_s2 + $0x10] sm:$0xff]  ;;  %s3542_s16 = scalar_lea.vmem %s3475_s5, %s3097_s1  ;;  %s2948_s4 = smov 96   ;;  %vm1252_vm9 = vcmask 130048   ;;  %vm1445_vm10 = vcmask 64512  }
  0x4c   : > { %v2732_v42 = vld [vmem:[%s3124_s2 + $0x8] sm:$0xff]  ;;  %v2731_v45 = vld [vmem:[%s3124_s2] sm:$0xff]  ;;  %s2949_s21 = smov 112   ;;  %s3543_s6 = scalar_lea.vmem %s3477_s7, %s3097_s1  ;;  %vm1768_vm11 = vcmask 261120   ;;  %vm1771_vm12 = vcmask 392192  }
  0x4d   : > { %v2852_v60 = vld [vmem:[%s3541_s30] ss:$0 sm:$0xff]  ;;  %s2950_s11 = smov 80   ;;  %s2951_s15 = smov 64  }
  0x4e   : > { %v2853_v1 = vld [vmem:[%s3542_s16] ss:$0 sm:$0xff]  ;;  %s3544_s20 = sld [smem:[#allocation10_spill]]  ;;  %s2952_s14 = smov 16  }
  0x4f   : > { %v3189_v7 = vld [vmem:[#allocation2] sm:$0xff]  ;;  %1165 = vmatpush.bf16.msra.mxu1 %v2729_v29  ;;  %s2953_s9 = smov 32   ;;  %s2954_s24 = smov 48  }
  0x50   : > { %v1059_v8 = vsel %vm1058_vm1, %v3189_v7, 0.0  ;;  %v3193_v9 = vld [vmem:[#allocation2 + $0x8] sm:$0xff]  ;;  %s3540_s2 = scalar_lea.vmem %s3539_s27, %s3097_s1  ;;  %v2854_v6 = vld [vmem:[%s3543_s6] ss:$0 sm:$0xff]  ;;  %s3547_s12 = sld [smem:[#allocation11_spill]] }
  0x51   : > { %1060 = vadd.xlane.f32.xlu0 %v1059_v8  ;;  %v1062_v10 = vsel %vm1058_vm1, %v3193_v9, 0.0  ;;  %v2860_v12 = vpop.eup %2859  ;;  %v2851_v55 = vld [vmem:[%s3540_s2] ss:$0 sm:$0xff]  ;;  %s3545_s2 = sld [smem:[#allocation18_spill]] }
  0x52   : > { %v1066_v13 = vmul.f32 64.0, %v2860_v12  ;;  %vm1070_vm2 = vweird.f32 %v2860_v12  ;;  %s3548_s18 = sld [smem:[#allocation19_spill]] }
  0x53   : > { %1166 = vmatpush.bf16.msra.mxu1 %v2728_v30  ;;  %s3550_s23 = sld [smem:[#allocation20_spill]] }
  0x54   : > { %v1067_v14 = vsub.f32 1.0, %v1066_v13 }
  0x56   : > { %v1068_v15 = vmul.f32 %v2860_v12, %v1067_v14 }
  0x57   : > { %1167 = vmatpush.bf16.msra.mxu1 %v2727_v32  ;;  %s3546_s0 = scalar_lea.vmem %s3545_s2, %s3097_s1 }
  0x58   : > { %v1069_v16 = vadd.f32 %v2860_v12, %v1068_v15  ;;  %s3549_s16 = scalar_lea.vmem %s3548_s18, %s3097_s1 }
  0x59   : > { %1063 = vadd.xlane.f32.xlu0 %v1062_v10  ;;  %s3551_s22 = scalar_lea.vmem %s3550_s23, %s3097_s1 }
  0x5a   : > { %v3197_v17 = vsel %vm1070_vm2, %v2860_v12, %v1069_v16 }
  0x5b   : > { %1214 = vmatpush.bf16.msrb.mxu1 %v2734_v35 }
  0x5f   : > { %1215 = vmatpush.bf16.msrb.mxu1 %v2733_v37 }
  0x63   : > { %1216 = vmatpush.bf16.msrb.mxu1 %v2732_v42 }
  0x67   : > { %1217 = vmatpush.bf16.msrb.mxu1 %v2731_v45 }
  0xc4   : > { %v1061_v18 = vpop.xlane.xlu0 %1060 }
  0xc5   : > { %v1072_v19 = vmul.f32 %v3197_v17, %v1061_v18 }
  0xc7   : > { %v1074_v20 = vsub.f32 %v3189_v7, %v1072_v19 }
  0xc9   : > { %v1076_v21 = vmul.f32 %v1074_v20, %v1074_v20 }
  0xcb   : > { %v1078_v22 = vsel %vm1058_vm1, %v1076_v21, 0.0 }
  0xcc   : > { %1079 = vadd.xlane.f32.xlu1 %v1078_v22  ;;  %v1064_v23 = vpop.xlane.xlu0 %1063 }
  0xcd   : > { %v1073_v24 = vmul.f32 %v3197_v17, %v1064_v23 }
  0xcf   : > { %v1075_v25 = vsub.f32 %v3193_v9, %v1073_v24 }
  0xd1   : > { %v1077_v26 = vmul.f32 %v1075_v25, %v1075_v25 }
  0xd3   : > { %v1081_v27 = vsel %vm1058_vm1, %v1077_v26, 0.0 }
  0xd4   : > { %1082 = vadd.xlane.f32.xlu1 %v1081_v27 }
 0x13f   : > { %v1080_v31 = vpop.xlane.xlu1 %1079 }
 0x140   : > { %v1084_v33 = vmul.f32 %v1080_v31, %v3197_v17 }
 0x142   : > { %v1086_v34 = vadd.f32 1e-05, %v1084_v33 }
 0x144   : > { %2861 = vrsqrt.f32 %v1086_v34  ;;  %vm1094_vm4 = vweird.f32 %v1086_v34 }
 0x147   : > { %v1083_v36 = vpop.xlane.xlu1 %1082 }
 0x148   : > { %v1085_v38 = vmul.f32 %v1083_v36, %v3197_v17 }
 0x14a   : > { %v2862_v39 = vpop.eup %2861  ;;  %v1087_v40 = vadd.f32 1e-05, %v1085_v38 }
 0x14b   : > { %v1089_v41 = vmul.f32 %v2862_v39, %v1086_v34  ;;  %vm1095_vm3 = vweird.f32 %v2862_v39 }
 0x14c   : > { %2863 = vrsqrt.f32 %v1087_v40  ;;  %vm1096_vm5 = vmor %vm1094_vm4, %vm1095_vm3  ;;  %vm1104_vm7 = vweird.f32 %v1087_v40 }
 0x14d   : > { %v1090_v43 = vmul.f32 %v2862_v39, %v1089_v41 }
 0x14f   : > { %v1091_v44 = vmul.f32 0.5, %v1090_v43 }
 0x151   : > { %v1092_v46 = vsub.f32 1.5, %v1091_v44 }
 0x152   : > { %v2864_v47 = vpop.eup %2863 }
 0x153   : > { %v1093_v48 = vmul.f32 %v2862_v39, %v1092_v46  ;;  %v1099_v49 = vmul.f32 %v2864_v47, %v1087_v40  ;;  %vm1105_vm6 = vweird.f32 %v2864_v47 }
 0x154   : > { %vm1106_vm8 = vmor %vm1104_vm7, %vm1105_vm6 }
 0x155   : > { %v1100_v50 = vmul.f32 %v2864_v47, %v1099_v49  ;;  %v1097_v51 = vsel %vm1096_vm5, %v2862_v39, %v1093_v48 }
 0x156   : > { %v1108_v54 = vmul.f32 %v1097_v51, %v1074_v20 }
 0x157   : > { %v1101_v52 = vmul.f32 0.5, %v1100_v50 }
 0x158   : > { %v1113_v59 = vmul.f32 %v2851_v55, %v1108_v54 }
 0x159   : > { %v1102_v53 = vsub.f32 1.5, %v1101_v52 }
 0x15a   : > { %v1118_v62 = vadd.f32 %v2852_v60, %v1113_v59 }
 0x15b   : > { %v1103_v56 = vmul.f32 %v2864_v47, %v1102_v53 }
 0x15d   : > { %v1107_v57 = vsel %vm1106_vm8, %v2864_v47, %v1103_v56 }
 0x15e   : > { %v1109_v58 = vmul.f32 %v1107_v57, %v1075_v25 }
 0x160   : > { %v1114_v61 = vmul.f32 %v2851_v55, %v1109_v58 }
 0x162   : > { %v1119_v63 = vadd.f32 %v2852_v60, %v1114_v61 }
 0x164   : > { %v1120_v0 = vpack.c.bf16 %v1119_v63, %v1118_v62 }
 0x166   : > { %2566 = vmatmul.msk.bf16.vlgmr.msra.gmra.mxu1 %vm1058_vm1, %v1120_v0 }
 0x176   : > { %2583 = vmatmul.msk.bf16.vlgmr.msrb.gmra.mxu1 %vm1058_vm1, %v1120_v0 }
 0x1e3   : > { %v1169_v2 = vpop.f32.mrf.mxu1 }
 0x1e4   : > { %v1170_v3 = vadd.f32 %v2853_v1, %v1169_v2 }
 0x1e6   : > { %1230 = vrot.lane.b32.xlu2 %v1170_v3, %s2948_s4  ;;  %1226 = vrot.lane.b32.xlu0 %v1170_v3, %s2949_s21 }
 0x1eb   : > { %v1171_v4 = vpop.f32.mrf.mxu1 }
 0x1ec   : > { %v1172_v5 = vadd.f32 %v2853_v1, %v1171_v4 }
 0x1ee   : > { %1228 = vrot.lane.b32.xlu1 %v1172_v5, %s2949_s21  ;;  %1232 = vrot.lane.b32.xlu0 %v1172_v5, %s2948_s4 }
 0x1f3   : > { %v1219_v8 = vpop.f32.mrf.mxu1 }
 0x1f4   : > { %v3237_v10 = vadd.f32 %v2854_v6, %v1219_v8 }
 0x1f6   : > { %2584 = vmatpush.xpose.msk.msra.mxu2 %vm1252_vm9, %v3237_v10  ;;  %1240 = vrot.lane.b32.xlu2 %v3237_v10, %s2949_s21 }
 0x1f7   : > { %1234 = vrot.lane.b32.xlu0 %v1170_v3, %s2950_s11 }
 0x1f9   : > { %2585 = vmatmul.msk.f32.vlgmr.msra.gmra.mxu2 %vm1252_vm9, %v1170_v3 }
 0x1fb   : > { %v1221_v11 = vpop.f32.mrf.mxu1 }
 0x1fc   : > { %v3243_v12 = vadd.f32 %v2854_v6, %v1221_v11 }
 0x1fe   : > { %2586 = vmatpush.xpose.msk.msra.mxu0 %vm1252_vm9, %v3243_v12  ;;  %1250 = vrot.lane.b32.xlu1 %v3243_v12, %s2950_s11 }
 0x1ff   : > { %1244 = vrot.lane.b32.xlu2 %v3237_v10, %s2948_s4 }
 0x201   : > { %2587 = vmatmul.msk.f32.vlgmr.msra.gmra.mxu0 %vm1252_vm9, %v1172_v5 }
 0x207   : > { %1242 = vrot.lane.b32.xlu2 %v3243_v12, %s2949_s21 }
 0x20f   : > { %1246 = vrot.lane.b32.xlu2 %v3243_v12, %s2948_s4 }
 0x217   : > { %1248 = vrot.lane.b32.xlu2 %v3237_v10, %s2950_s11 }
 0x21f   : > { %1236 = vrot.lane.b32.xlu2 %v1172_v5, %s2950_s11 }
 0x240   : > { %v1231_v13 = vpop.permute.xlu2 %1230 }
 0x250   : > { %v3253_v14 = vpop.permute.xlu2 %1240 }
 0x251   : > { %2588 = vmatpush.xpose.msk.msrb.mxu2 %vm1252_vm9, %v3253_v14  ;;  %v2816_v54 = vpack.i.bf16 %v3253_v14, %v3243_v12 }
 0x258   : > { %v1227_v15 = vpop.permute.xlu0 %1226 }
 0x259   : > { %v3257_v16 = vpop.permute.xlu2 %1244  ;;  %2589 = vmatmul.msk.f32.vlgmr.msrb.gmra.mxu2 %vm1252_vm9, %v1227_v15 }
 0x25a   : > { %2592 = vmatpush.xpose.msk.msra.mxu2 %vm1252_vm9, %v3257_v16 }
 0x260   : > { %v1229_v19 = vpop.permute.xlu1 %1228  ;;  %v1233_v21 = vpop.permute.xlu0 %1232 }
 0x261   : > { %v1243_v18 = vpop.permute.xlu2 %1242  ;;  %2593 = vmatmul.msk.f32.vlgmr.msra.gmra.mxu2 %vm1252_vm9, %v1231_v13 }
 0x262   : > { %2590 = vmatpush.xpose.msk.msra.mxu3 %vm1252_vm9, %v1243_v18  ;;  %v2821_v53 = vpack.i.bf16 %v3237_v10, %v1243_v18 }
 0x265   : > { %2591 = vmatmul.msk.f32.vlgmr.msra.gmra.mxu3 %vm1252_vm9, %v1229_v19 }
 0x269   : > { %v3265_v20 = vpop.permute.xlu2 %1246  ;;  %v1235_v25 = vpop.permute.xlu0 %1234 }
 0x26a   : > { %v2831_v22 = vpack.i.bf16 %v3265_v20, %v3257_v16  ;;  %2594 = vmatpush.xpose.msk.msrb.mxu3 %vm1252_vm9, %v3265_v20 }
 0x26d   : > { %2595 = vmatmul.msk.f32.vlgmr.msrb.gmra.mxu3 %vm1252_vm9, %v1233_v21 }
 0x270   : > { %v3272_v23 = vpop.permute.xlu1 %1250 }
 0x271   : > { %v3274_v24 = vpop.permute.xlu2 %1248  ;;  %2598 = vmatpush.xpose.msk.msra.mxu3 %vm1252_vm9, %v3272_v23 }
 0x272   : > { %2596 = vmatpush.xpose.msk.msrb.mxu2 %vm1252_vm9, %v3274_v24 }
 0x275   : > { %2597 = vmatmul.msk.f32.vlgmr.msrb.gmra.mxu2 %vm1252_vm9, %v1235_v25 }
 0x279   : > { %v1237_v26 = vpop.permute.xlu2 %1236 }
 0x27a   : > { %2599 = vmatmul.msk.f32.vlgmr.msra.gmra.mxu3 %vm1252_vm9, %v1237_v26 }
 0x27c   : > { %v1274_v27 = vpop.f32.mrf.mxu2 }
 0x27d   : > { %v1446_v28 = vsel %vm1445_vm10, %v1274_v27, -inf }
 0x27e   : > { %1447 = vmax.xlane.f32.xlu1 %v1446_v28  ;;  %v1298_v29 = vpop.f32.mrf.mxu0 }
 0x27f   : > { %v1449_v30 = vsel %vm1445_vm10, %v1298_v29, -inf }
 0x286   : > { %1450 = vmax.xlane.f32.xlu1 %v1449_v30 }
 0x2dc   : > { %v1322_v31 = vpop.f32.mrf.mxu2 }
 0x2dd   : > { %v1452_v32 = vsel %vm1445_vm10, %v1322_v31, -inf }
 0x2de   : > { %1453 = vmax.xlane.f32.xlu0 %v1452_v32 }
 0x2e4   : > { %v1370_v33 = vpop.f32.mrf.mxu2 }
 0x2e5   : > { %v1458_v34 = vsel %vm1445_vm10, %v1370_v33, -inf }
 0x2e6   : > { %1459 = vmax.xlane.f32.xlu1 %v1458_v34 }
 0x2e8   : > { %v1346_v35 = vpop.f32.mrf.mxu3 }
 0x2e9   : > { %v1455_v36 = vsel %vm1445_vm10, %v1346_v35, -inf }
 0x2ea   : > { %1456 = vmax.xlane.f32.xlu2 %v1455_v36 }
 0x2f0   : > { %v1394_v47 = vpop.f32.mrf.mxu3 }
 0x2f1   : > { %v1448_v37 = vpop.xlane.xlu1 %1447  ;;  %v1461_v48 = vsel %vm1445_vm10, %v1394_v47, -inf }
 0x2f2   : > { %v1470_v38 = vsub.f32 %v1274_v27, %v1448_v37 }
 0x2f4   : > { %v1478_v39 = vmul.f32 1.442695, %v1470_v38 }
 0x2f6   : > { %2865 = vpow2.f32 %v1478_v39 }
 0x2f8   : > { %v1418_v40 = vpop.f32.mrf.mxu2 }
 0x2f9   : > { %v1451_v41 = vpop.xlane.xlu1 %1450  ;;  %v1464_v42 = vsel %vm1445_vm10, %v1418_v40, -inf }
 0x2fa   : > { %v1471_v43 = vsub.f32 %v1298_v29, %v1451_v41  ;;  %1465 = vmax.xlane.f32.xlu0 %v1464_v42  ;;  %v2826_v41 = vpack.i.bf16 %v3272_v23, %v3274_v24 }
 0x2fc   : > { %v3288_v44 = vpop.eup %2865  ;;  %v1480_v45 = vmul.f32 1.442695, %v1471_v43 }
 0x2fd   : > { %v1494_v46 = vsel %vm1445_vm10, %v3288_v44, 0.0  ;;  %v1442_v51 = vpop.f32.mrf.mxu3 }
 0x2fe   : > { %2867 = vpow2.f32 %v1480_v45  ;;  %1495 = vadd.xlane.f32.xlu1 %v1494_v46  ;;  %v1467_v52 = vsel %vm1445_vm10, %v1442_v51, -inf }
 0x302   : > { %1462 = vmax.xlane.f32.xlu0 %v1461_v48 }
 0x304   : > { %v3293_v49 = vpop.eup %2867 }
 0x305   : > { %v1497_v50 = vsel %vm1445_vm10, %v3293_v49, 0.0 }
 0x306   : > { %1498 = vadd.xlane.f32.xlu2 %v1497_v50 }
 0x30e   : > { %1468 = vmax.xlane.f32.xlu2 %v1467_v52 }
 0x316   : > { %2822 = vrot.lane.b32.xlu0 %v2821_v53, %s2951_s15 }
 0x326   : > { %2817 = vrot.lane.b32.xlu2 %v2816_v54, %s2951_s15 }
 0x351   : > { %v1454_v55 = vpop.xlane.xlu0 %1453 }
 0x352   : > { %v1472_v56 = vsub.f32 %v1322_v31, %v1454_v55 }
 0x354   : > { %v1482_v57 = vmul.f32 1.442695, %v1472_v56 }
 0x356   : > { %2869 = vpow2.f32 %v1482_v57 }
 0x359   : > { %v1460_v58 = vpop.xlane.xlu1 %1459 }
 0x35a   : > { %v1474_v59 = vsub.f32 %v1370_v33, %v1460_v58 }
 0x35c   : > { %v2870_v60 = vpop.eup %2869  ;;  %v1486_v61 = vmul.f32 1.442695, %v1474_v59 }
 0x35d   : > { %v1457_v62 = vpop.xlane.xlu2 %1456  ;;  %v1500_v63 = vsel %vm1445_vm10, %v2870_v60, 0.0 }
 0x35e   : > { %2871 = vpow2.f32 %v1486_v61  ;;  %v1473_v0 = vsub.f32 %v1346_v35, %v1457_v62  ;;  %1501 = vadd.xlane.f32.xlu1 %v1500_v63 }
 0x360   : > { %v1484_v1 = vmul.f32 1.442695, %v1473_v0 }
 0x362   : > { %2873 = vpow2.f32 %v1484_v1 }
 0x364   : > { %v3304_v2 = vpop.eup %2871 }
 0x365   : > { %v1506_v3 = vsel %vm1445_vm10, %v3304_v2, 0.0 }
 0x366   : > { %1507 = vadd.xlane.f32.xlu1 %v1506_v3 }
 0x368   : > { %v2874_v4 = vpop.eup %2873 }
 0x369   : > { %v1503_v5 = vsel %vm1445_vm10, %v2874_v4, 0.0 }
 0x36a   : > { %1504 = vadd.xlane.f32.xlu0 %v1503_v5 }
 0x36d   : > { %v1466_v6 = vpop.xlane.xlu0 %1465 }
 0x36e   : > { %v1476_v8 = vsub.f32 %v1418_v40, %v1466_v6 }
 0x370   : > { %v1490_v10 = vmul.f32 1.442695, %v1476_v8 }
 0x371   : > { %v1496_v19 = vpop.xlane.xlu1 %1495 }
 0x372   : > { %2875 = vpow2.f32 %v1490_v10  ;;  %v2738_v10 = vld [vmem:[%s3544_s20 + $0x18] sm:$0xff] }
 0x375   : > { %v1463_v11 = vpop.xlane.xlu0 %1462 }
 0x376   : > { %v1475_v12 = vsub.f32 %v1394_v47, %v1463_v11  ;;  %v2737_v11 = vld [vmem:[%s3544_s20 + $0x10] sm:$0xff] }
 0x378   : > { %v3309_v13 = vpop.eup %2875  ;;  %v1488_v14 = vmul.f32 1.442695, %v1475_v12  ;;  %v2736_v12 = vld [vmem:[%s3544_s20 + $0x8] sm:$0xff] }
 0x379   : > { %v1499_v15 = vpop.xlane.xlu2 %1498  ;;  %v1512_v18 = vsel %vm1445_vm10, %v3309_v13, 0.0 }
 0x37a   : > { %2877 = vpow2.f32 %v1488_v14  ;;  %1513 = vadd.xlane.f32.xlu0 %v1512_v18 }
 0x37b   : > { %2879 = vrcp.f32 %v1496_v19 }
 0x37c   : > { %2881 = vrcp.f32 %v1499_v15 }
 0x380   : > { %v2878_v21 = vpop.eup %2877 }
 0x381   : > { %v1469_v25 = vpop.xlane.xlu2 %1468  ;;  %v1509_v26 = vsel %vm1445_vm10, %v2878_v21, 0.0  ;;  %v2880_v29 = vpop.eup %2879 }
 0x382   : > { %v1477_v27 = vsub.f32 %v1442_v51, %v1469_v25  ;;  %1510 = vadd.xlane.f32.xlu2 %v1509_v26  ;;  %v2882_v30 = vpop.eup %2881  ;;  %v1526_v37 = vmul.f32 %v2880_v29, %v3288_v44 }
 0x383   : > { %v1527_v38 = vmul.f32 %v2882_v30, %v3293_v49 }
 0x384   : > { %v1492_v28 = vmul.f32 1.442695, %v1477_v27 }
 0x386   : > { %2883 = vpow2.f32 %v1492_v28 }
 0x388   : > { %v2823_v31 = vpop.permute.xlu0 %2822 }
 0x389   : > { %v2824_v32 = vunpack.i.l.bf16 %v2823_v31  ;;  %v2818_v33 = vpop.permute.xlu2 %2817  ;;  %v2825_v34 = vunpack.i.h.bf16 %v2823_v31 }
 0x38a   : > { %v2820_v35 = vunpack.i.h.bf16 %v2818_v33  ;;  %v2819_v36 = vunpack.i.l.bf16 %v2818_v33 }
 0x38b   : > { %1555 = vmatpush.msrb.mxu0 %v2825_v34  ;;  %1633 = vmatpush.msrb.mxu3 %v2824_v32 }
 0x38c   : > { %v2884_v39 = vpop.eup %2883  ;;  %2600 = vmatmul.msk.f32.vlgmr.msrb.gmra.mxu0 %vm1445_vm10, %v1526_v37  ;;  %1581 = vmatpush.msra.mxu2 %v2819_v36  ;;  %v2855_v36 = vld [vmem:[%s3546_s0] ss:$0 sm:$0xff] }
 0x38d   : > { %2601 = vmatmul.msk.f32.vlgmr.msra.gmra.mxu2 %vm1445_vm10, %v1527_v38  ;;  %v1515_v40 = vsel %vm1445_vm10, %v2884_v39, 0.0 }
 0x38e   : > { %1607 = vmatpush.msrb.mxu2 %v2820_v35  ;;  %2832 = vrot.lane.b32.xlu0 %v2831_v22, %s2951_s15 }
 0x38f   : > { %1516 = vadd.xlane.f32.xlu1 %v1515_v40 }
 0x3a8   : > { %2827 = vrot.lane.b32.xlu1 %v2826_v41, %s2951_s15  ;;  %s3552_s15 = sld [smem:[#allocation22_spill]] }
 0x3d1   : > { %v1502_v42 = vpop.xlane.xlu1 %1501 }
 0x3d2   : > { %2885 = vrcp.f32 %v1502_v42 }
 0x3d8   : > { %v2886_v43 = vpop.eup %2885 }
 0x3d9   : > { %v1528_v44 = vmul.f32 %v2886_v43, %v2870_v60  ;;  %v1508_v16 = vpop.xlane.xlu1 %1507 }
 0x3db   : > { %2602 = vmatmul.msk.f32.vlgmr.msrb.gmra.mxu2 %vm1445_vm10, %v1528_v44 }
 0x3dd   : > { %v1505_v45 = vpop.xlane.xlu0 %1504 }
 0x3de   : > { %2887 = vrcp.f32 %v1505_v45 }
 0x3df   : > { %2889 = vrcp.f32 %v1508_v16 }
 0x3e4   : > { %v2888_v46 = vpop.eup %2887 }
 0x3e5   : > { %v1529_v47 = vmul.f32 %v2888_v46, %v2874_v4  ;;  %v2890_v23 = vpop.eup %2889 }
 0x3e6   : > { %v1530_v51 = vmul.f32 %v2890_v23, %v3304_v2 }
 0x3e7   : > { %2603 = vmatmul.msk.f32.vlgmr.msrb.gmra.mxu3 %vm1445_vm10, %v1529_v47 }
 0x3ed   : > { %v1514_v22 = vpop.xlane.xlu0 %1513 }
 0x3f5   : > { %v1511_v20 = vpop.xlane.xlu2 %1510 }
 0x3f6   : > { %2891 = vrcp.f32 %v1511_v20 }
 0x3f7   : > { %2893 = vrcp.f32 %v1514_v22 }
 0x3fc   : > { %v2892_v24 = vpop.eup %2891 }
 0x3fd   : > { %v1531_v52 = vmul.f32 %v2892_v24, %v2878_v21  ;;  %v2894_v54 = vpop.eup %2893 }
 0x3fe   : > { %v1532_v59 = vmul.f32 %v2894_v54, %v3309_v13  ;;  %v2735_v13 = vld [vmem:[%s3544_s20] sm:$0xff]  ;;  %s3553_s20 = scalar_lea.vmem %s3552_s15, %s3148_s25 }
 0x3ff   : > { %v2643_v54 = vld [vmem:[%s3547_s12 + $0x20] sm:$0xf] }
 0x400   : > { %v2833_v48 = vpop.permute.xlu0 %2832 }
 0x401   : > { %v2835_v49 = vunpack.i.h.bf16 %v2833_v48  ;;  %v2834_v50 = vunpack.i.l.bf16 %v2833_v48  ;;  %v2651_v48 = vld [vmem:[%s3547_s12 + $0x30] sm:$0xf] }
 0x402   : > { %v1517_v53 = vpop.xlane.xlu1 %1516 }
 0x403   : > { %1659 = vmatpush.msra.mxu0 %v2834_v50  ;;  %1685 = vmatpush.msra.mxu1 %v2835_v49  ;;  %2895 = vrcp.f32 %v1517_v53  ;;  %v2746_v49 = vld [vmem:[%s3547_s12 + $0x34] sm:$0xf0]  ;;  %v2745_v50 = vld [vmem:[%s3547_s12 + $0x34] sm:$0xf] }
 0x404   : > { %2604 = vmatmul.msk.f32.vlgmr.msra.gmra.mxu0 %vm1445_vm10, %v1530_v51  ;;  %2605 = vmatmul.msk.f32.vlgmr.msra.gmra.mxu1 %vm1445_vm10, %v1531_v52  ;;  %v2652_v51 = vor.u32 %v2746_v49, %v2651_v48  ;;  %v2653_v52 = vld [vmem:[%s3547_s12 + $0x38] sm:$0xf0]  ;;  %v2759_v49 = vld [vmem:[%s3181_s8 + $0x60] sm:$0xff] }
 0x405   : > { %1818 = vmatpush.bf16.msrb.mxu0 %v2738_v10  ;;  %v2656_v53 = vor.u32 %v2745_v50, %v2653_v52  ;;  %v2629_v10 = vld [vmem:[%s3547_s12 + $0x8] sm:$0xf0]  ;;  %v2750_v48 = vld [vmem:[%s3181_s8 + $0x18] sm:$0xff]  ;;  %v2749_v50 = vld [vmem:[%s3181_s8 + $0x10] sm:$0xff] }
 0x406   : > { %1948 = vmatpush.bf16.msrb.mxu1 %v2652_v51  ;;  %v2748_v51 = vld [vmem:[%s3181_s8 + $0x8] sm:$0xff]  ;;  %v2757_v52 = vld [vmem:[%s3181_s8 + $0x50] sm:$0xff] }
 0x409   : > { %v2896_v55 = vpop.eup %2895  ;;  %v1557_v1 = vpop.f32.mrf.mxu0  ;;  %1819 = vmatpush.bf16.msrb.mxu0 %v2737_v11 }
 0x40a   : > { %v1533_v60 = vmul.f32 %v2896_v55, %v2884_v39  ;;  %v2744_v55 = vld [vmem:[%s3547_s12 + $0x24] sm:$0xf0] }
 0x40d   : > { %1820 = vmatpush.bf16.msrb.mxu0 %v2736_v12 }
 0x410   : > { %v1583_v61 = vpop.f32.mrf.mxu2 }
 0x411   : > { %1821 = vmatpush.bf16.msrb.mxu0 %v2735_v13  ;;  %v2754_v13 = vld [vmem:[%s3181_s8 + $0x38] sm:$0xff] }
 0x41a   : > { %v2828_v56 = vpop.permute.xlu1 %2827 }
 0x41b   : > { %v2830_v57 = vunpack.i.h.bf16 %v2828_v56  ;;  %v2829_v58 = vunpack.i.l.bf16 %v2828_v56  ;;  %v2743_v56 = vld [vmem:[%s3547_s12 + $0x24] sm:$0xf] }
 0x41d   : > { %1711 = vmatpush.msra.mxu2 %v2829_v58  ;;  %1737 = vmatpush.msra.mxu3 %v2830_v57  ;;  %v2644_v57 = vor.u32 %v2744_v55, %v2643_v54  ;;  %v2645_v58 = vld [vmem:[%s3547_s12 + $0x28] sm:$0xf0]  ;;  %v2755_v55 = vld [vmem:[%s3181_s8 + $0x40] sm:$0xff] }
 0x41e   : > { %2606 = vmatmul.msk.f32.vlgmr.msra.gmra.mxu2 %vm1445_vm10, %v1532_v59  ;;  %2607 = vmatmul.msk.f32.vlgmr.msra.gmra.mxu3 %vm1445_vm10, %v1533_v60  ;;  %v2648_v59 = vor.u32 %v2743_v56, %v2645_v58  ;;  %v2635_v60 = vld [vmem:[%s3547_s12 + $0x10] sm:$0xf]  ;;  %v2756_v54 = vld [vmem:[%s3181_s8 + $0x48] sm:$0xff]  ;;  %v1895_v56 = vld [vmem:[%s3553_s20] sm:$0x3] }
 0x41f   : > { %1962 = vmatpush.bf16.msrb.mxu2 %v2656_v53  ;;  %1949 = vmatpush.bf16.msrb.mxu1 %v2644_v57  ;;  %v2747_v53 = vld [vmem:[%s3181_s8] sm:$0xff]  ;;  %v1897_v58 = vperm.slane %v1895_v56, 0 }
 0x420   : > { %2110 = vmatpush.bf16.msrb.mxu3 %v2754_v13 }
 0x423   : > { %1963 = vmatpush.bf16.msrb.mxu2 %v2648_v59 }
 0x45e   : > { %v1609_v62 = vpop.f32.mrf.mxu2 }
 0x46a   : > { %v1635_v63 = vpop.f32.mrf.mxu3 }
 0x46b   : > { %v2836_v0 = vpack.i.bf16 %v1635_v63, %v1609_v62  ;;  %v2741_v62 = vld [vmem:[%s3547_s12 + $0x14] sm:$0xf] }
 0x46d   : > { %2837 = vrot.lane.b32.xlu0 %v2836_v0, %s2952_s14  ;;  %v2637_v0 = vld [vmem:[%s3547_s12 + $0x18] sm:$0xf0] }
 0x481   : > { %v1661_v2 = vpop.f32.mrf.mxu0  ;;  %v1687_v3 = vpop.f32.mrf.mxu1 }
 0x482   : > { %v2841_v4 = vpack.i.bf16 %v1687_v3, %v1661_v2 }
 0x484   : > { %2842 = vrot.lane.b32.xlu0 %v2841_v4, %s2953_s9  ;;  %v2627_v4 = vld [vmem:[%s3547_s12] sm:$0xf]  ;;  %s3555_s9 = sld [smem:[#allocation3_spill]] }
 0x48a   : > { %p2723_p8 = scmp.ne.s32.totalorder %s3555_s9, 2 }
 0x4a1   : > { %v1713_v5 = vpop.f32.mrf.mxu2  ;;  %v1739_v6 = vpop.f32.mrf.mxu3 }
 0x4a2   : > { %v2846_v8 = vpack.i.bf16 %v1739_v6, %v1713_v5  ;;  %v2740_v5 = vld [vmem:[%s3547_s12 + $0x4] sm:$0xf0]  ;;  %v2739_v6 = vld [vmem:[%s3547_s12 + $0x4] sm:$0xf] }
 0x4a3   : > { %v2632_v12 = vor.u32 %v2739_v6, %v2629_v10 }
 0x4a4   : > { %2847 = vrot.lane.b32.xlu1 %v2846_v8, %s2954_s24  ;;  %v2628_v8 = vor.u32 %v2740_v5, %v2627_v4 }
 0x4df   : > { %v2838_v14 = vpop.permute.xlu0 %2837 }
 0x4e0   : > { %v2840_v18 = vunpack.i.h.bf16 %v2838_v14  ;;  %v2839_v19 = vunpack.i.l.bf16 %v2838_v14  ;;  %v2762_v14 = vld [vmem:[%s3181_s8 + $0x78] sm:$0xff] }
 0x4e1   : > { %2124 = vmatpush.bf16.msra.mxu0 %v2762_v14 }
 0x4e2   : > { %v1767_v27 = vsel %vm1252_vm9, %v1583_v61, %v2840_v18  ;;  %v1766_v28 = vsel %vm1252_vm9, %v1557_v1, %v2839_v19  ;;  %v2742_v61 = vld [vmem:[%s3547_s12 + $0x14] sm:$0xf0]  ;;  %v2640_v1 = vor.u32 %v2741_v62, %v2637_v0  ;;  %v2753_v19 = vld [vmem:[%s3181_s8 + $0x30] sm:$0xff]  ;;  %v1898_v62 = vperm.slane %v1895_v56, 1 }
 0x4e3   : > { %v2636_v63 = vor.u32 %v2742_v61, %v2635_v60  ;;  %2111 = vmatpush.bf16.msrb.mxu3 %v2753_v19 }
 0x4e4   : > { %1964 = vmatpush.bf16.msrb.mxu2 %v2640_v1 }
 0x4e5   : > { %1950 = vmatpush.bf16.msrb.mxu1 %v2636_v63 }
 0x4e8   : > { %1965 = vmatpush.bf16.msrb.mxu2 %v2632_v12 }
 0x4e9   : > { %1951 = vmatpush.bf16.msrb.mxu1 %v2628_v8 }
 0x4f6   : > { %v2843_v15 = vpop.permute.xlu0 %2842 }
 0x4f7   : > { %v2845_v21 = vunpack.i.h.bf16 %v2843_v15  ;;  %v2844_v25 = vunpack.i.l.bf16 %v2843_v15 }
 0x4f9   : > { %v1769_v31 = vsel %vm1768_vm11, %v1766_v28, %v2844_v25  ;;  %v1770_v32 = vsel %vm1768_vm11, %v1767_v27, %v2845_v21  ;;  %v2761_v21 = vld [vmem:[%s3181_s8 + $0x70] sm:$0xff]  ;;  %v2752_v28 = vld [vmem:[%s3181_s8 + $0x28] sm:$0xff] }
 0x4fa   : > { %2125 = vmatpush.bf16.msra.mxu0 %v2761_v21  ;;  %2112 = vmatpush.bf16.msrb.mxu3 %v2752_v28 }
 0x516   : > { %v2848_v26 = vpop.permute.xlu1 %2847 }
 0x517   : > { %v2850_v29 = vunpack.i.h.bf16 %v2848_v26  ;;  %v2849_v30 = vunpack.i.l.bf16 %v2848_v26 }
 0x519   : > { %v1773_v33 = vsel %vm1771_vm12, %v1770_v32, %v2850_v29  ;;  %v1772_v34 = vsel %vm1771_vm12, %v1769_v31, %v2849_v30  ;;  %v2760_v29 = vld [vmem:[%s3181_s8 + $0x68] sm:$0xff]  ;;  %v2751_v32 = vld [vmem:[%s3181_s8 + $0x20] sm:$0xff] }
 0x51a   : > { %v1774_v35 = vpack.c.bf16 %v1773_v33, %v1772_v34  ;;  %2126 = vmatpush.bf16.msra.mxu0 %v2760_v29  ;;  %2113 = vmatpush.bf16.msrb.mxu3 %v2751_v32 }
 0x51c   : > { %2624 = vmatmul.msk.bf16.vlgmr.msrb.gmra.mxu0 %vm1058_vm1, %v1774_v35 }
 0x51e   : > { %2114 = vmatpush.bf16.msrb.mxu3 %v2750_v48  ;;  %2127 = vmatpush.bf16.msra.mxu0 %v2759_v49 }
 0x522   : > { %2115 = vmatpush.bf16.msrb.mxu3 %v2749_v50 }
 0x526   : > { %2116 = vmatpush.bf16.msrb.mxu3 %v2748_v51 }
 0x52a   : > { %2117 = vmatpush.bf16.msrb.mxu3 %v2747_v53 }
 0x599   : > { %v1823_v37 = vpop.f32.mrf.mxu0 }
 0x59a   : > { %v1824_v38 = vadd.f32 %v2855_v36, %v1823_v37 }
 0x59c   : > { %v3347_v39 = vadd.f32 %v1824_v38, %v3189_v7 }
 0x59e   : > { %v1832_v40 = vsel %vm1058_vm1, %v3347_v39, 0.0 }
 0x59f   : > { %1833 = vadd.xlane.f32.xlu0 %v1832_v40 }
 0x5a1   : > { %v1825_v41 = vpop.f32.mrf.mxu0 }
 0x5a2   : > { %v1826_v42 = vadd.f32 %v2855_v36, %v1825_v41 }
 0x5a4   : > { %v3352_v43 = vadd.f32 %v1826_v42, %v3193_v9  ;;  %v2856_v42 = vld [vmem:[%s3549_s16] ss:$0 sm:$0xff] }
 0x5a6   : > { %v1835_v44 = vsel %vm1058_vm1, %v3352_v43, 0.0 }
 0x5a7   : > { %1836 = vadd.xlane.f32.xlu1 %v1835_v44 }
 0x612   : > { %v1834_v45 = vpop.xlane.xlu0 %1833 }
 0x613   : > { %v1838_v7 = vmul.f32 %v1834_v45, %v3197_v17 }
 0x615   : > { %v3358_v46 = vsub.f32 %v3347_v39, %v1838_v7 }
 0x617   : > { %v1842_v47 = vmul.f32 %v3358_v46, %v3358_v46 }
 0x619   : > { %v1844_v16 = vsel %vm1058_vm1, %v1842_v47, 0.0  ;;  %v2857_v47 = vld [vmem:[%s3551_s22] ss:$0 sm:$0xff] }
 0x61a   : > { %v1837_v9 = vpop.xlane.xlu1 %1836  ;;  %1845 = vadd.xlane.f32.xlu2 %v1844_v16 }
 0x61b   : > { %v1839_v20 = vmul.f32 %v1837_v9, %v3197_v17 }
 0x61d   : > { %v3365_v22 = vsub.f32 %v3352_v43, %v1839_v20 }
 0x61f   : > { %v1843_v23 = vmul.f32 %v3365_v22, %v3365_v22 }
 0x621   : > { %v1847_v24 = vsel %vm1058_vm1, %v1843_v23, 0.0 }
 0x622   : > { %1848 = vadd.xlane.f32.xlu2 %v1847_v24 }
 0x68d   : > { %v1846_v2 = vpop.xlane.xlu2 %1845 }
 0x68e   : > { %v1850_v3 = vmul.f32 %v1846_v2, %v3197_v17 }
 0x690   : > { %v1852_v11 = vadd.f32 1e-05, %v1850_v3 }
 0x692   : > { %2897 = vrsqrt.f32 %v1852_v11  ;;  %vm1860_vm14 = vweird.f32 %v1852_v11 }
 0x695   : > { %v1849_v15 = vpop.xlane.xlu2 %1848 }
 0x696   : > { %v1851_v18 = vmul.f32 %v1849_v15, %v3197_v17 }
 0x698   : > { %v2898_v25 = vpop.eup %2897  ;;  %v1853_v26 = vadd.f32 1e-05, %v1851_v18 }
 0x699   : > { %v1855_v27 = vmul.f32 %v2898_v25, %v1852_v11  ;;  %vm1861_vm13 = vweird.f32 %v2898_v25  ;;  %v2858_v11 = vld [vmem:[%s1028_s10] ss:$0 sm:$0xff] }
 0x69a   : > { %2899 = vrsqrt.f32 %v1853_v26  ;;  %vm1862_vm15 = vmor %vm1860_vm14, %vm1861_vm13  ;;  %vm1870_vm2 = vweird.f32 %v1853_v26 }
 0x69b   : > { %v1856_v30 = vmul.f32 %v2898_v25, %v1855_v27 }
 0x69d   : > { %v1857_v31 = vmul.f32 0.5, %v1856_v30 }
 0x69f   : > { %v1858_v33 = vsub.f32 1.5, %v1857_v31 }
 0x6a0   : > { %v2900_v34 = vpop.eup %2899 }
 0x6a1   : > { %v1859_v35 = vmul.f32 %v2898_v25, %v1858_v33  ;;  %v1865_v36 = vmul.f32 %v2900_v34, %v1853_v26  ;;  %vm1871_vm0 = vweird.f32 %v2900_v34 }
 0x6a2   : > { %vm1872_vm3 = vmor %vm1870_vm2, %vm1871_vm0 }
 0x6a3   : > { %v1866_v37 = vmul.f32 %v2900_v34, %v1865_v36  ;;  %v1863_v38 = vsel %vm1862_vm15, %v2898_v25, %v1859_v35 }
 0x6a4   : > { %v1874_v44 = vmul.f32 %v1863_v38, %v3358_v46 }
 0x6a5   : > { %v1867_v40 = vmul.f32 0.5, %v1866_v37 }
 0x6a6   : > { %v1879_v16 = vmul.f32 %v2856_v42, %v1874_v44 }
 0x6a7   : > { %v1868_v41 = vsub.f32 1.5, %v1867_v40 }
 0x6a8   : > { %v1884_v23 = vadd.f32 %v2857_v47, %v1879_v16 }
 0x6a9   : > { %v1869_v45 = vmul.f32 %v2900_v34, %v1868_v41 }
 0x6ab   : > { %v1873_v7 = vsel %vm1872_vm3, %v2900_v34, %v1869_v45 }
 0x6ac   : > { %v1875_v9 = vmul.f32 %v1873_v7, %v3365_v22  ;;  %v2758_v22 = vld [vmem:[%s3181_s8 + $0x58] sm:$0xff] }
 0x6ad   : > { %2128 = vmatpush.bf16.msra.mxu0 %v2758_v22 }
 0x6ae   : > { %v1880_v20 = vmul.f32 %v2856_v42, %v1875_v9 }
 0x6b0   : > { %v1885_v46 = vadd.f32 %v2857_v47, %v1880_v20 }
 0x6b1   : > { %2129 = vmatpush.bf16.msra.mxu0 %v2757_v52 }
 0x6b2   : > { %v1886_v24 = vpack.c.bf16 %v1885_v46, %v1884_v23 }
 0x6b4   : > { %2657 = vmatmul.msk.bf16.vlgmr.msrb.gmra.mxu1 %vm1058_vm1, %v1886_v24  ;;  %2658 = vmatmul.msk.bf16.vlgmr.msrb.gmra.mxu2 %vm1058_vm1, %v1886_v24 }
 0x6b5   : > { %2130 = vmatpush.bf16.msra.mxu0 %v2756_v54 }
 0x6b9   : > { %2131 = vmatpush.bf16.msra.mxu0 %v2755_v55 }
 0x731   : > { %v1953_v57 = vpop.f32.mrf.mxu1 }
 0x732   : > { %v1954_v60 = vadd.f32 %v1953_v57, %v1897_v58 }
 0x734   : > { %v1972_v0 = vmax.f32 %v1954_v60, 0.0 }
 0x737   : > { %v1967_v59 = vpop.f32.mrf.mxu2 }
 0x738   : > { %v1968_v2 = vadd.f32 %v1967_v59, %v1898_v62 }
 0x739   : > { %v1955_v61 = vpop.f32.mrf.mxu1 }
 0x73a   : > { %v1956_v63 = vadd.f32 %v1955_v61, %v1897_v58  ;;  %v1973_v6 = vmax.f32 %v1968_v2, 0.0 }
 0x73c   : > { %v1974_v1 = vmax.f32 %v1956_v63, 0.0 }
 0x73e   : > { %v1976_v3 = vpack.c.bf16 %v1974_v1, %v1972_v0 }
 0x73f   : > { %v1969_v4 = vpop.f32.mrf.mxu2 }
 0x740   : > { %v1970_v5 = vadd.f32 %v1969_v4, %v1898_v62  ;;  %2118 = vmatmul.bf16.vlgmr.msrb.gmra.mxu3 %v1976_v3 }
 0x742   : > { %v1975_v8 = vmax.f32 %v1970_v5, 0.0 }
 0x744   : > { %v1977_v10 = vpack.c.bf16 %v1975_v8, %v1973_v6 }
 0x746   : > { %2132 = vmatmul.bf16.vlgmr.msra.gmra.mxu0 %v1977_v10 }
 0x7c3   : > { %v2119_v12 = vpop.f32.mrf.mxu3  ;;  %v2133_v13 = vpop.f32.mrf.mxu0 }
 0x7c4   : > { %v2120_v14 = vadd.f32 %v2858_v11, %v2119_v12 }
 0x7c6   : > { %v2134_v15 = vadd.f32 %v2133_v13, %v2120_v14 }
 0x7c8   : > { %v2138_v18 = vadd.f32 %v2134_v15, %v3347_v39 }
 0x7ca   : > { %2140 = vst.msk [vmem:[#allocation2] sm:$0xff] %vm1058_vm1, %v2138_v18 }
 0x7cb   : > { %v2121_v19 = vpop.f32.mrf.mxu3  ;;  %v2135_v25 = vpop.f32.mrf.mxu0 }
 0x7cc   : > { %v2122_v21 = vadd.f32 %v2858_v11, %v2121_v19 }
 0x7ce   : > { %v2136_v26 = vadd.f32 %v2135_v25, %v2122_v21  ;;  %2145 = sbr.rel (%p2723_p8) target bundleno = 2281 (0x8e9), region = 100 }
 0x7d0   : > { %v2139_v27 = vadd.f32 %v2136_v26, %v3352_v43 }
 0x7d2   : > { %2141 = vst.msk [vmem:[#allocation2 + $0x8] sm:$0xff] %vm1058_vm1, %v2139_v27 }
 0x7d3   : > { %vm2148_vm4 = vcmask 523271   ;;  %v2902_v22 = vld [vmem:[%s1034_s17] ss:$0 sm:$0xff] }
 0x7d4   : > { %v2149_v28 = vsel %vm2148_vm4, %v2138_v18, 0.0  ;;  %v2152_v29 = vsel %vm2148_vm4, %v2139_v27, 0.0 }
 0x7d5   : > { %2150 = vadd.xlane.f32.xlu0 %v2149_v28 }
 0x7dd   : > { %2153 = vadd.xlane.f32.xlu0 %v2152_v29 }
 0x848   : > { %v2151_v39 = vpop.xlane.xlu0 %2150 }
 0x849   : > { %v2155_v30 = vmul.f32 %v2151_v39, %v3197_v17 }
 0x84b   : > { %v2157_v31 = vsub.f32 %v2138_v18, %v2155_v30 }
 0x84d   : > { %v2159_v32 = vmul.f32 %v2157_v31, %v2157_v31 }
 0x84f   : > { %v2161_v33 = vsel %vm2148_vm4, %v2159_v32, 0.0 }
 0x850   : > { %2162 = vadd.xlane.f32.xlu1 %v2161_v33  ;;  %v2154_v43 = vpop.xlane.xlu0 %2153 }
 0x851   : > { %v2156_v34 = vmul.f32 %v2154_v43, %v3197_v17 }
 0x853   : > { %v2158_v35 = vsub.f32 %v2139_v27, %v2156_v34 }
 0x855   : > { %v2160_v36 = vmul.f32 %v2158_v35, %v2158_v35 }
 0x857   : > { %v2164_v37 = vsel %vm2148_vm4, %v2160_v36, 0.0 }
 0x858   : > { %2165 = vadd.xlane.f32.xlu1 %v2164_v37 }
 0x8c3   : > { %v2163_v38 = vpop.xlane.xlu1 %2162 }
 0x8c4   : > { %v2167_v40 = vmul.f32 %v2163_v38, %v3197_v17 }
 0x8c6   : > { %v2169_v41 = vadd.f32 1e-05, %v2167_v40 }
 0x8c8   : > { %2903 = vrsqrt.f32 %v2169_v41  ;;  %vm2177_vm5 = vweird.f32 %v2169_v41 }
 0x8cb   : > { %v2166_v42 = vpop.xlane.xlu1 %2165 }
 0x8cc   : > { %v2168_v44 = vmul.f32 %v2166_v42, %v3197_v17  ;;  %v2901_v17 = vld [vmem:[%s1031_s19] ss:$0 sm:$0xff] }
 0x8ce   : > { %v2904_v45 = vpop.eup %2903  ;;  %v2170_v7 = vadd.f32 1e-05, %v2168_v44 }
 0x8cf   : > { %v2172_v47 = vmul.f32 %v2904_v45, %v2169_v41  ;;  %vm2178_vm1 = vweird.f32 %v2904_v45 }
 0x8d0   : > { %2905 = vrsqrt.f32 %v2170_v7  ;;  %vm2179_vm6 = vmor %vm2177_vm5, %vm2178_vm1  ;;  %vm2187_vm8 = vweird.f32 %v2170_v7 }
 0x8d1   : > { %v2173_v16 = vmul.f32 %v2904_v45, %v2172_v47 }
 0x8d3   : > { %v2174_v9 = vmul.f32 0.5, %v2173_v16 }
 0x8d5   : > { %v2175_v20 = vsub.f32 1.5, %v2174_v9 }
 0x8d6   : > { %v2906_v23 = vpop.eup %2905 }
 0x8d7   : > { %v2176_v46 = vmul.f32 %v2904_v45, %v2175_v20  ;;  %v2182_v24 = vmul.f32 %v2906_v23, %v2170_v7  ;;  %vm2188_vm7 = vweird.f32 %v2906_v23 }
 0x8d8   : > { %vm2189_vm9 = vmor %vm2187_vm8, %vm2188_vm7 }
 0x8d9   : > { %v2180_v48 = vsel %vm2179_vm6, %v2904_v45, %v2176_v46  ;;  %v2183_v49 = vmul.f32 %v2906_v23, %v2182_v24 }
 0x8da   : > { %v2191_v50 = vmul.f32 %v2180_v48, %v2157_v31 }
 0x8db   : > { %v2184_v51 = vmul.f32 0.5, %v2183_v49 }
 0x8dc   : > { %v2196_v52 = vmul.f32 %v2901_v17, %v2191_v50 }
 0x8dd   : > { %v2185_v53 = vsub.f32 1.5, %v2184_v51 }
 0x8de   : > { %v2201_v54 = vadd.f32 %v2902_v22, %v2196_v52 }
 0x8df   : > { %v2186_v55 = vmul.f32 %v2906_v23, %v2185_v53 }
 0x8e0   : > { %2203 = vst.msk [vmem:[%s3176_s13 - $0x7] sm:$0x80] %vm2148_vm4, %v2201_v54 }
 0x8e1   : > { %v2190_v56 = vsel %vm2189_vm9, %v2906_v23, %v2186_v55 }
 0x8e2   : > { %v2192_v57 = vmul.f32 %v2190_v56, %v2158_v35 }
 0x8e4   : > { %v2197_v58 = vmul.f32 %v2901_v17, %v2192_v57 }
 0x8e6   : > { %v2202_v59 = vadd.f32 %v2902_v22, %v2197_v58 }
 0x8e8   : > { %2204 = vst.msk [vmem:[%s3176_s13 - $0x6] sm:$0x80] %vm2148_vm4, %v2202_v59 }
 0x8e9 PF: > { %s3558_s28 = sld [smem:[#allocation6_spill]] }
 0x8ea   : > { %s3559_s27 = sld [smem:[#allocation4_spill]] }
 0x8eb   : > { %s3561_s29 = sld [smem:[#allocation7_spill]] }
 0x8ec   : > { %s3562_s30 = sld [smem:[#allocation8_spill]] }
 0x8ef   : > { %s28_s0 = sadd.s32 1, %s3558_s28   ;;  %s3560_s28 = sld [smem:[#allocation5_spill]] }
 0x8f0   : > { %p25_p9 = scmp.ge.s32.totalorder %s28_s0, 11  }
 0x8f2   :  { %27 = sbr.rel (!%p25_p9) target bundleno = 17 (0x11), region = 178 }

</bundles_post_ra>
